<compile_context>
chip_gen: v5e
topology: v5e:2x2
jax: 0.10.0
libtpu: 0.0.40
codegen_flags: <defaults>
</compile_context>

<pallas_src>
import jax
import jax.numpy as jnp
import numpy as np
from jax.experimental import pallas as pl
from jax.experimental.pallas import tpu as pltpu

N_EMBD = 128                 # module default n_embd
TORSION_BIN = 1
N_BINS = 360 // TORSION_BIN  # 360
VOCAB = N_BINS + 1           # 361 rows per nn.Embedding
VOCAB_PAD = 384              # pad vocab to a multiple of 128 (MXU/lane friendly)
TOKEN_TILE = 512             # max tokens per grid step


def _round_up(x, m):
    return ((x + m - 1) // m) * m


def _mxu_is_256_wide():
    """True on TPU generations with 256-wide MXUs (v6e / v7x)."""
    try:
        kind = jax.devices()[0].device_kind.lower()
    except Exception:
        return False
    return any(tag in kind for tag in ("v6", "v7", "7x", "trillium"))


# ----------------------------------------------------------------------------
# Kernels
# ----------------------------------------------------------------------------
def _bb_embedding_kernel_stacked(idx_ref, tbl_ref, out_ref):
    # v5e-friendly path: three (T, Vp) x (Vp, D) matmuls.
    # idx_ref: (T, 3) int32       -- token-major, channel on lanes
    # tbl_ref: (3, Vp, D) bf16    -- stacked phi/psi/omega tables
    # out_ref: (T, 3*D)           -- tokens on sublanes, channels concat on lanes
    T = out_ref.shape[0]
    _, Vp, D = tbl_ref.shape

    # Hoisted lane iota, reused for all three channels (no CSE of broadcasts).
    lanes = jax.lax.broadcasted_iota(jnp.int32, (T, Vp), 1)          # (T, Vp)

    for chan in range(3):
        ids = idx_ref[:, chan:chan + 1]                              # (T, 1)
        onehot = (lanes == ids).astype(tbl_ref.dtype)                # bf16 0/1
        # Exact row gather: bf16 x bf16 with f32 accumulate.
        emb = jnp.dot(onehot, tbl_ref[chan],
                      preferred_element_type=jnp.float32)            # (T, D)
        out_ref[:, chan * D:(chan + 1) * D] = emb.astype(out_ref.dtype)


def _bb_embedding_kernel_paired(idx_ref, pp_ref, om_ref, out_ref):
    # v6e / v7x path: phi+psi fused into one (T, 2Vp) x (2Vp, 2D) matmul against
    # a block-diagonal table so the 256-wide MXU output is fully filled.
    # idx_ref: (T, 3) int32
    # pp_ref : (2*Vp, 2*D) bf16  -- diag(phi_tbl, psi_tbl)
    # om_ref : (Vp, D) bf16
    # out_ref: (T, 3*D)
    T = out_ref.shape[0]
    Vp2 = pp_ref.shape[0]
    Vp, D = om_ref.shape

    lanes2 = jax.lax.broadcasted_iota(jnp.int32, (T, Vp2), 1)        # (T, 2Vp)
    ids_phi = idx_ref[:, 0:1]                                        # (T, 1)
    ids_psi = idx_ref[:, 1:2] + Vp                                   # shift into psi block
    onehot_pp = ((lanes2 == ids_phi) | (lanes2 == ids_psi)).astype(pp_ref.dtype)
    pp_emb = jnp.dot(onehot_pp, pp_ref[...],
                     preferred_element_type=jnp.float32)             # (T, 2D)

    lanes1 = jax.lax.broadcasted_iota(jnp.int32, (T, Vp), 1)         # (T, Vp)
    onehot_om = (lanes1 == idx_ref[:, 2:3]).astype(om_ref.dtype)
    om_emb = jnp.dot(onehot_om, om_ref[...],
                     preferred_element_type=jnp.float32)             # (T, D)

    out_ref[...] = jnp.concatenate([pp_emb, om_emb], axis=1).astype(out_ref.dtype)


# ----------------------------------------------------------------------------
# One-time table preparation (init-time, out of the per-call hot path)
# ----------------------------------------------------------------------------
def prepare_tables(phi_tbl, psi_tbl, omega_tbl, *, vocab_pad=VOCAB_PAD,
                   table_dtype=jnp.bfloat16, pair_phi_psi=None):
    """Pad + cast the three nn.Embedding weights into kernel-ready layout.

    pair_phi_psi=None auto-detects: block-diagonal phi/psi pairing on 256-wide
    MXU chips (v6e/v7x), plain stacking on 128-wide MXU chips (v5e and older).
    """
    if pair_phi_psi is None:
        pair_phi_psi = _mxu_is_256_wide()

    def pad(t):
        assert t.shape[0] <= vocab_pad
        return jnp.pad(t.astype(table_dtype),
                       ((0, vocab_pad - t.shape[0]), (0, 0)))

    phi, psi, om = pad(phi_tbl), pad(psi_tbl), pad(omega_tbl)

    if pair_phi_psi:
        D = phi.shape[1]
        z = jnp.zeros((vocab_pad, D), table_dtype)
        top = jnp.concatenate([phi, z], axis=1)                      # (Vp, 2D)
        bot = jnp.concatenate([z, psi], axis=1)                      # (Vp, 2D)
        pp = jnp.concatenate([top, bot], axis=0)                     # (2Vp, 2D)
        return {"paired": True, "phi_psi": pp, "omega": om}
    return {"paired": False, "stacked": jnp.stack([phi, psi, om], axis=0)}


# ----------------------------------------------------------------------------
# Host wrapper
# ----------------------------------------------------------------------------
def bb_embedding(bbs_inf, tables, *, token_tile=None, out_dtype=jnp.bfloat16):
    """bbs_inf: int indices (B, L, 3). tables: dict from prepare_tables.

    Returns (B, L, 3*D) in `out_dtype` (default bfloat16).  The lookup is an
    exact row gather of the stored (bf16) embedding rows.
    """
    B, L, C = bbs_inf.shape
    assert C == 3
    N = B * L

    if token_tile is None:
        # >= 2 grid steps so both v7x TensorCores get work; capped at 512 so a
        # step stays small enough to pipeline but big enough to amortize the
        # ~0.35 us per-step overhead.
        token_tile = min(TOKEN_TILE, _round_up(pl.cdiv(N, 2), 128))
    assert token_tile % 8 == 0, "token_tile must be a multiple of 8 (sublanes)"

    Npad = pl.cdiv(N, token_tile) * token_tile
    out_bytes = int(np.dtype(out_dtype).itemsize)

    # Token-major indices; pad tokens use index 0 and are sliced off afterwards.
    idx = bbs_inf.astype(jnp.int32).reshape(N, 3)
    idx = jnp.pad(idx, ((0, Npad - N), (0, 0)))                      # (Npad, 3)

    grid = (Npad // token_tile,)
    compiler_params = pltpu.CompilerParams(dimension_semantics=("parallel",))

    if tables["paired"]:
        pp, om = tables["phi_psi"], tables["omega"]
        Vp, D = om.shape
        flops = 2 * Npad * (pp.shape[0] * pp.shape[1] + Vp * D)
        bytes_accessed = (idx.size * 4
                          + pp.size * pp.dtype.itemsize
                          + om.size * om.dtype.itemsize
                          + Npad * 3 * D * out_bytes)
        out = pl.pallas_call(
            _bb_embedding_kernel_paired,
            out_shape=jax.ShapeDtypeStruct((Npad, 3 * D), out_dtype),
            grid_spec=pltpu.PrefetchScalarGridSpec(
                num_scalar_prefetch=0,
                grid=grid,
                in_specs=[
                    pl.BlockSpec((token_tile, 3), lambda i: (i, 0)),
                    pl.BlockSpec(pp.shape, lambda i: (0, 0)),        # grid-invariant
                    pl.BlockSpec(om.shape, lambda i: (0, 0)),        # grid-invariant
                ],
                out_specs=pl.BlockSpec((token_tile, 3 * D), lambda i: (i, 0)),
            ),
            compiler_params=compiler_params,
            cost_estimate=pl.CostEstimate(flops=int(flops), transcendentals=0,
                                          bytes_accessed=int(bytes_accessed)),
        )(idx, pp, om)
    else:
        stacked = tables["stacked"]
        _, Vp, D = stacked.shape
        flops = 2 * Npad * 3 * Vp * D
        bytes_accessed = (idx.size * 4
                          + stacked.size * stacked.dtype.itemsize
                          + Npad * 3 * D * out_bytes)
        out = pl.pallas_call(
            _bb_embedding_kernel_stacked,
            out_shape=jax.ShapeDtypeStruct((Npad, 3 * D), out_dtype),
            grid_spec=pltpu.PrefetchScalarGridSpec(
                num_scalar_prefetch=0,
                grid=grid,
                in_specs=[
                    pl.BlockSpec((token_tile, 3), lambda i: (i, 0)),
                    pl.BlockSpec((3, Vp, D), lambda i: (0, 0, 0)),   # grid-invariant
                ],
                out_specs=pl.BlockSpec((token_tile, 3 * D), lambda i: (i, 0)),
            ),
            compiler_params=compiler_params,
            cost_estimate=pl.CostEstimate(flops=int(flops), transcendentals=0,
                                          bytes_accessed=int(bytes_accessed)),
        )(idx, stacked)

    D_out = out.shape[1]
    return out[:N].reshape(B, L, D_out)


if __name__ == "__main__":
    key = jax.random.PRNGKey(0)
    k_phi, k_psi, k_omega, k_idx = jax.random.split(key, 4)

    # Deterministic "parameters" (nn.Embedding weight shapes: (VOCAB, N_EMBD)).
    phi_tbl = jax.random.normal(k_phi, (VOCAB, N_EMBD), jnp.float32) * 0.02
    psi_tbl = jax.random.normal(k_psi, (VOCAB, N_EMBD), jnp.float32) * 0.02
    omega_tbl = jax.random.normal(k_omega, (VOCAB, N_EMBD), jnp.float32) * 0.02

    # Small input: batch=2, seq=100, 3 torsion-bin indices per residue.
    B, L = 2, 100
    bbs_inf = jax.random.randint(k_idx, (B, L, 3), 0, VOCAB, dtype=jnp.int32)

    # Pure-JAX reference: the stored (bf16) embedding rows, concatenated on the
    # last dim -- the kernel's one-hot matmul is an exact gather of these rows.
    phi_b = phi_tbl.astype(jnp.bfloat16)
    psi_b = psi_tbl.astype(jnp.bfloat16)
    omega_b = omega_tbl.astype(jnp.bfloat16)
    ref = jnp.concatenate(
        [phi_b[bbs_inf[:, :, 0]],
         psi_b[bbs_inf[:, :, 1]],
         omega_b[bbs_inf[:, :, 2]]], axis=2)

    # Exercise both table layouts (paired = v6e/v7x, stacked = v5e), then the
    # auto-detected one for the current chip.
    for pair in (True, False, None):
        tables = prepare_tables(phi_tbl, psi_tbl, omega_tbl, pair_phi_psi=pair)
        out = jax.block_until_ready(bb_embedding(bbs_inf, tables))
        assert out.shape == (B, L, 3 * N_EMBD), out.shape
        assert out.dtype == jnp.bfloat16
        assert jnp.array_equal(out, ref), f"mismatch (pair_phi_psi={pair})"

    print("KERNEL_OK")
</pallas_src>

<mosaic_0001>
module attributes {stable_mosaic.version = 11 : i64} {
  func.func @_bb_embedding_kernel_paired(%arg0: i32, %arg1: memref<128x3xi32, #tpu.memory_space<vmem>>, %arg2: memref<768x256xbf16, #tpu.memory_space<vmem>>, %arg3: memref<384x128xbf16, #tpu.memory_space<vmem>>, %arg4: memref<128x384xbf16, #tpu.memory_space<vmem>>) attributes {dimension_semantics = [#tpu.dimension_semantics<parallel>], iteration_bounds = array<i64: 2>, scalar_prefetch = 0 : i64, scratch_operands = 0 : i64, tpu.core_type = #tpu.core_type<tc>, window_params = [{transform_indices = @transform_0, window_bounds = array<i64: 128, 3>}, {pipeline_mode = #tpu.pipeline_mode<synchronous>, transform_indices = @transform_1, window_bounds = array<i64: 768, 256>}, {pipeline_mode = #tpu.pipeline_mode<synchronous>, transform_indices = @transform_2, window_bounds = array<i64: 384, 128>}, {transform_indices = @transform_3, window_bounds = array<i64: 128, 384>}]} {
    %0 = tpu.iota {dimensions = array<i32: 1>} : vector<128x768xi32>
    %c0 = arith.constant 0 : index
    %c0_0 = arith.constant 0 : index
    %1 = vector.load %arg1[%c0, %c0_0] : memref<128x3xi32, #tpu.memory_space<vmem>>, vector<128x1xi32>
    %c0_1 = arith.constant 0 : index
    %c1 = arith.constant 1 : index
    %2 = vector.load %arg1[%c0_1, %c1] : memref<128x3xi32, #tpu.memory_space<vmem>>, vector<128x1xi32>
    %c384_i32 = arith.constant 384 : i32
    %3 = vector.broadcast %c384_i32 : i32 to vector<128x1xi32>
    %4 = arith.addi %2, %3 : vector<128x1xi32>
    %5 = vector.broadcast %1 : vector<128x1xi32> to vector<128x768xi32>
    %6 = arith.cmpi eq, %0, %5 : vector<128x768xi32>
    %7 = vector.broadcast %4 : vector<128x1xi32> to vector<128x768xi32>
    %8 = arith.cmpi eq, %0, %7 : vector<128x768xi32>
    %9 = arith.ori %6, %8 : vector<128x768xi1>
    %10 = arith.extui %9 : vector<128x768xi1> to vector<128x768xi32>
    %11 = arith.sitofp %10 : vector<128x768xi32> to vector<128x768xf32>
    %12 = arith.truncf %11 : vector<128x768xf32> to vector<128x768xbf16>
    %c0_2 = arith.constant 0 : index
    %c0_3 = arith.constant 0 : index
    %13 = vector.load %arg2[%c0_2, %c0_3] : memref<768x256xbf16, #tpu.memory_space<vmem>>, vector<768x256xbf16>
    %cst = arith.constant dense<0.000000e+00> : vector<128x256xf32>
    %14 = tpu.matmul %12, %13, %cst {dimension_numbers = #tpu.dot_dimension_numbers<[1], [0], [0], [1], [0, 0, 1, 1], [], []>} : vector<128x768xbf16>, vector<768x256xbf16>, vector<128x256xf32> -> vector<128x256xf32>
    %15 = tpu.iota {dimensions = array<i32: 1>} : vector<128x384xi32>
    %c0_4 = arith.constant 0 : index
    %c2 = arith.constant 2 : index
    %16 = vector.load %arg1[%c0_4, %c2] : memref<128x3xi32, #tpu.memory_space<vmem>>, vector<128x1xi32>
    %17 = vector.broadcast %16 : vector<128x1xi32> to vector<128x384xi32>
    %18 = arith.cmpi eq, %15, %17 : vector<128x384xi32>
    %19 = arith.extui %18 : vector<128x384xi1> to vector<128x384xi32>
    %20 = arith.sitofp %19 : vector<128x384xi32> to vector<128x384xf32>
    %21 = arith.truncf %20 : vector<128x384xf32> to vector<128x384xbf16>
    %c0_5 = arith.constant 0 : index
    %c0_6 = arith.constant 0 : index
    %22 = vector.load %arg3[%c0_5, %c0_6] : memref<384x128xbf16, #tpu.memory_space<vmem>>, vector<384x128xbf16>
    %cst_7 = arith.constant dense<0.000000e+00> : vector<128x128xf32>
    %23 = tpu.matmul %21, %22, %cst_7 {dimension_numbers = #tpu.dot_dimension_numbers<[1], [0], [0], [1], [0, 0, 1, 1], [], []>} : vector<128x384xbf16>, vector<384x128xbf16>, vector<128x128xf32> -> vector<128x128xf32>
    %24 = tpu.concatenate %14, %23 in 1 : vector<128x256xf32>, vector<128x128xf32> -> vector<128x384xf32>
    %25 = arith.truncf %24 : vector<128x384xf32> to vector<128x384xbf16>
    %c0_8 = arith.constant 0 : index
    %c0_9 = arith.constant 0 : index
    %26 = vector.load %arg4[%c0_8, %c0_9] : memref<128x384xbf16, #tpu.memory_space<vmem>>, vector<128x384xbf16>
    tpu.vector_store %arg4[%c0_8, %c0_9], %25 {strides = array<i32>} : memref<128x384xbf16, #tpu.memory_space<vmem>>, vector<128x384xbf16>,
    return
  }
  func.func @transform_0(%arg0: i32) -> (i32, i32) {
    %c0_i32 = arith.constant 0 : i32
    %c0_i32_0 = arith.constant 0 : i32
    return %arg0, %c0_i32 : i32, i32
  }
  func.func @transform_1(%arg0: i32) -> (i32, i32) {
    %c0_i32 = arith.constant 0 : i32
    %c0_i32_0 = arith.constant 0 : i32
    %c0_i32_1 = arith.constant 0 : i32
    return %c0_i32, %c0_i32_0 : i32, i32
  }
  func.func @transform_2(%arg0: i32) -> (i32, i32) {
    %c0_i32 = arith.constant 0 : i32
    %c0_i32_0 = arith.constant 0 : i32
    %c0_i32_1 = arith.constant 0 : i32
    return %c0_i32, %c0_i32_0 : i32, i32
  }
  func.func @transform_3(%arg0: i32) -> (i32, i32) {
    %c0_i32 = arith.constant 0 : i32
    %c0_i32_0 = arith.constant 0 : i32
    return %arg0, %c0_i32 : i32, i32
  }
}

</mosaic_0001>

<bundles_post_ra>
// kernel: tpu_custom_call.1
= control target key start
LH: loop header
LB: loop body
LE: loop exit
PB: predicated region body
PF: predicated region fallthrough
CT: control target
= control target key end

     0   :  { %8 = vsyncpa [#allocation3], 0  ;;  %s6297_s0 = inlined_call_operand.vmem [shape: s32[256,3], index: 0, kind: input, shape index: {}]   ;;  %s6298_s1 = inlined_call_operand.hbm [shape: bf16[768,256], index: 1, kind: input, shape index: {}]   ;;  %s6299_s2 = inlined_call_operand.vmem [shape: bf16[384,128], index: 2, kind: input, shape index: {}]   ;;  %s6300_s3 = inlined_call_operand.hbm [shape: bf16[256,384], index: 3, kind: output, shape index: {}]  }
   0x1   :  { %9 = vsyncpa [#allocation4], 0 }
   0x2   :  { %11 = vsyncpa [#allocation4 + $0x1], 0  ;;  %s3971_s12 = smov 0   ;;  %s3973_s13 = smov 0  }
   0x3   :  { %s3975_s14 = smov 0   ;;  %s3977_s15 = smov 0  }
   0x4 LB: > { %s3992_s16 = sadd.s32 4294967295, %s3940_s15   ;;  %s2726_s17 = sadd.s32 4294967294, %s3940_s15   ;;  %s3940_s15 = sphi %s3977_s15, %s6992_s15   ;;  %s3936_s14 = sphi %s3975_s14, %s6991_s14   ;;  %s3932_s13 = sphi %s3973_s13, %s6990_s13   ;;  %s3928_s12 = sphi %s3971_s12, %s6989_s12  }
   0x5   : > { %s3996_s18 = sadd.s32 1, %s3940_s15   ;;  %s92_s19 = sadd.s32 1, %s3936_s14 }
   0x6   : > { %s89_s20 = ssub.s32 %s3940_s15, %s3996_s18  ;;  %p102_p0 = scmp.ne.s32.totalorder %s3936_s14, %s3932_s13 }
   0x7   : > { %p90_p1 = scmp.eq.s32.totalorder %s89_s20, 0  ;;  %p103_p2 = scmp.eq.s32.totalorder %s3992_s16, 1 }
   0x8   : > { %p108_p3 = scmp.ne.s32.totalorder %s3932_s13, %s3928_s12  ;;  %p109_p4 = scmp.eq.s32.totalorder %s2726_s17, 1 }
   0x9   : > { %s4007_s21 = scalar_select %p90_p1, %s3936_s14, %s92_s19  }
   0xa   : > { %p4009_p5 = por %p103_p2, %p102_p0  ;;  %p4013_p6 = por %p109_p4, %p108_p3 }
   0xb   : > { %p2727_p7 = scmp.ge.s32.totalorder %s3940_s15, 1  ;;  %p116_p8 = scmp.lt.s32.totalorder %s3940_s15, 3 }
   0xc   : > { %p3763_p9 = scmp.eq.s32.totalorder %s3992_s16, 0  ;;  %s127_s26 = sshll.u32 %s6298_s1, 4  ;;  %s128_s26 = int_to_ptr.hbm [resolvable:$true] %s127_s26 }
   0xd   : > { %p117_p10 = pnand %p2727_p7, %p116_p8  ;;  %s3942_s27 = smov [#allocation2]  }
   0xe   : > { %s129_s28 = sshll.u32 %s3942_s27, 4  ;;  %s3943_s29 = smov 128   ;;  %s130_s28 = int_to_ptr.vmem [resolvable:$true] %s129_s28 }
   0xf   : > { %p3755_p11 = pneg %p117_p10  ;;  %s3944_s30 = smov 8  }
  0x10   : > { %157 = sbr.rel (%p117_p10) target bundleno = 785 (0x311), region = 32 }
  0x11   : > { %p3756_p12 = pnand %p3763_p9, %p3755_p11 }
  0x13   : > { %3758 = dma.hbm_to_vmem [thread:$0]  (!%p3756_p12), %s128_s26, 12288, %s130_s28, [#allocation3], %s3943_s29, %s3943_s29, %s3944_s30  }
  0x15   : > { %3919 = dma.done.wait (%p3763_p9), [#allocation3], 12288  }
  0x16   : > { %3921 = vsyncadd (%p3763_p9), [#allocation3], 4294955008  ;;  %s2732_s4 = sshll.u32 %s3992_s16, 4  ;;  %v3945_v0 = vmov 0   ;;  %v3946_v1 = vmov 1   ;;  %s179_s30 = sand.u32 1, %s3932_s13  }
  0x17   : > { %3807 = vset.pattern.permute.xlu0 %v3945_v0  ;;  %p183_p13 = scmp.lt.s32.totalorder %s2732_s4, 31  ;;  %3809 = vset.pattern.permute.xlu1 %v3946_v1  ;;  %v2888_v30 = vld [vmem:[#allocation2 + $0x70] sm:$0xf]  ;;  %v3618_v31 = vld [vmem:[#allocation2 + $0x74] sm:$0xf0]  ;;  %s3748_s6 = smul.u32 192, %s3992_s16 }
  0x18   : > { %3808 = vset.pattern.permute.xlu2 %v3945_v0  ;;  %v2889_v33 = vor.u32 %v3618_v31, %v2888_v30  ;;  %v2952_v34 = vld [vmem:[#allocation2 + $0xf0] sm:$0xf]  ;;  %v3634_v35 = vld [vmem:[#allocation2 + $0xf4] sm:$0xf0]  ;;  %v2880_v39 = vld [vmem:[#allocation2 + $0x60] sm:$0xf] }
  0x19   : > { %s6994_s4 = smov (!%p183_p13, %s2732_s4), 31  ;;  %v3016_v36 = vld [vmem:[#allocation2 + $0x170] sm:$0xf]  ;;  %v4069_v37 = vor.u32 %v3634_v35, %v2952_v34  ;;  %v3650_v38 = vld [vmem:[#allocation2 + $0x174] sm:$0xf0]  ;;  %s2648_s9 = scalar_lea.hbm %s6300_s3, %s3748_s6 }
  0x1a   : > { %s2733_s5 = sshll.u32 %s6994_s4, 3  ;;  %v3616_v40 = vld [vmem:[#allocation2 + $0x64] sm:$0xf0]  ;;  %3723 = vmatpush.bf16.msra.mxu3 %v2889_v33  ;;  %v4071_v41 = vor.u32 %v3650_v38, %v3016_v36  ;;  %v2944_v43 = vld [vmem:[#allocation2 + $0xe0] sm:$0xf]  ;;  %1428 = vmatpush.bf16.msra.mxu0 %v2889_v33  ;;  %s3747_s4 = smul.u32 192, %s179_s30 }
  0x1b   : > { %s4036_s8 = scalar_lea.vmem %s6297_s0, %s2733_s5  ;;  %v2881_v42 = vor.u32 %v3616_v40, %v2880_v39  ;;  %v3632_v44 = vld [vmem:[#allocation2 + $0xe4] sm:$0xf0]  ;;  %v3008_v45 = vld [vmem:[#allocation2 + $0x160] sm:$0xf]  ;;  %3731 = vmatpush.bf16.msra.mxu1 %v4069_v37  ;;  %v2872_v48 = vld [vmem:[#allocation2 + $0x50] sm:$0xf] }
  0x1c   : > { %v200_v2 = vld [vmem:[%s4036_s8 + $0x20] sm:$0xff]  ;;  %v201_v5 = vld [vmem:[%s4036_s8 + $0x28] sm:$0xff]  ;;  %v202_v9 = vld [vmem:[%s4036_s8 + $0x30] sm:$0xff]  ;;  %v4074_v46 = vor.u32 %v3632_v44, %v2944_v43  ;;  %3739 = vmatpush.bf16.msra.mxu2 %v4071_v41  ;;  %s6199_s5 = scalar_lea.vmem [#allocation5], %s3747_s4  ;;  %s2651_s16 = sshll.u32 %s2648_s9, 4  ;;  %s2652_s16 = int_to_ptr.hbm [resolvable:$true] %s2651_s16 }
  0x1d   : > { %v196_v3 = vld [vmem:[%s4036_s8] sm:$0xff]  ;;  %241 = vperm.xlu0 %3807, %v200_v2   ;;  %v216_v4 = vadd.s32 384, %v200_v2  ;;  %v197_v6 = vld [vmem:[%s4036_s8 + $0x8] sm:$0xff]  ;;  %v217_v7 = vadd.s32 384, %v201_v5  ;;  %v203_v11 = vld [vmem:[%s4036_s8 + $0x38] sm:$0xff]  ;;  %v218_v13 = vadd.s32 384, %v202_v9 }
  0x1e   : > { %229 = vperm.xlu2 %3808, %v196_v3   ;;  %v212_v8 = vadd.s32 384, %v196_v3  ;;  %v213_v10 = vadd.s32 384, %v197_v6  ;;  %v219_v12 = vadd.s32 384, %v203_v11  ;;  %v198_v14 = vld [vmem:[%s4036_s8 + $0x10] sm:$0xff]  ;;  %v199_v16 = vld [vmem:[%s4036_s8 + $0x18] sm:$0xff]  ;;  %v205_v17 = vld [vmem:[%s4036_s8 + $0x48] sm:$0xff]  ;;  %3724 = vmatpush.bf16.msra.mxu3 %v2881_v42 }
  0x1f   : > { %385 = vperm.xlu1 %3809, %v216_v4   ;;  %v214_v15 = vadd.s32 384, %v198_v14  ;;  %v215_v18 = vadd.s32 384, %v199_v16  ;;  %v204_v19 = vld [vmem:[%s4036_s8 + $0x40] sm:$0xff]  ;;  %v206_v20 = vld [vmem:[%s4036_s8 + $0x50] sm:$0xff]  ;;  %v221_v22 = vadd.s32 384, %v205_v17  ;;  %v4058_v24 = vld [vmem:[%s4036_s8 + $0x68] sm:$0xff]  ;;  %3732 = vmatpush.bf16.msra.mxu1 %v4074_v46 }
  0x20   : > { %v222_v21 = vadd.s32 384, %v206_v20  ;;  %v220_v23 = vadd.s32 384, %v204_v19  ;;  %v225_v25 = vadd.s32 384, %v4058_v24  ;;  %v207_v26 = vld [vmem:[%s4036_s8 + $0x58] sm:$0xff]  ;;  %v4063_v27 = vld [vmem:[%s4036_s8 + $0x70] sm:$0xff]  ;;  %v208_v32 = vld [vmem:[%s4036_s8 + $0x60] sm:$0xff]  ;;  %1429 = vmatpush.bf16.msra.mxu0 %v2881_v42 }
  0x21   : > { %v223_v28 = vadd.s32 384, %v207_v26  ;;  %v226_v29 = vadd.s32 384, %v4063_v27  ;;  %v3648_v47 = vld [vmem:[#allocation2 + $0x164] sm:$0xf0]  ;;  %v3614_v49 = vld [vmem:[#allocation2 + $0x54] sm:$0xf0] }
  0x22   : > { %v4077_v50 = vor.u32 %v3648_v47, %v3008_v45  ;;  %v2936_v51 = vld [vmem:[#allocation2 + $0xd0] sm:$0xf]  ;;  %v3630_v52 = vld [vmem:[#allocation2 + $0xd4] sm:$0xf0]  ;;  %v2873_v55 = vor.u32 %v3614_v49, %v2872_v48  ;;  %v2864_v57 = vld [vmem:[#allocation2 + $0x40] sm:$0xf]  ;;  %v189_v48 = vlaneseq }
  0x23   : > { %v3000_v53 = vld [vmem:[#allocation2 + $0x150] sm:$0xf]  ;;  %v3646_v54 = vld [vmem:[#allocation2 + $0x154] sm:$0xf0]  ;;  %v4081_v56 = vor.u32 %v3630_v52, %v2936_v51  ;;  %v3612_v58 = vld [vmem:[#allocation2 + $0x44] sm:$0xf0] }
  0x24   : > { %3740 = vmatpush.bf16.msra.mxu2 %v4077_v50  ;;  %v4084_v59 = vor.u32 %v3646_v54, %v3000_v53  ;;  %v2928_v60 = vld [vmem:[#allocation2 + $0xc0] sm:$0xf]  ;;  %v3628_v61 = vld [vmem:[#allocation2 + $0xc4] sm:$0xf0]  ;;  %v224_v2 = vadd.s32 384, %v208_v32  ;;  %3725 = vmatpush.bf16.msra.mxu3 %v2873_v55  ;;  %v2865_v3 = vor.u32 %v3612_v58, %v2864_v57  ;;  %s2649_s10 = sshll.u32 %s6199_s5, 4  ;;  %s2650_s10 = int_to_ptr.vmem [resolvable:$true] %s2649_s10 }
  0x25   : > { %244 = vperm.xlu0 %3807, %v201_v5   ;;  %v2992_v62 = vld [vmem:[#allocation2 + $0x140] sm:$0xf]  ;;  %v3644_v63 = vld [vmem:[#allocation2 + $0x144] sm:$0xf0]  ;;  %3733 = vmatpush.bf16.msra.mxu1 %v4081_v56  ;;  %v4087_v4 = vor.u32 %v3628_v61, %v2928_v60  ;;  %v2856_v5 = vld [vmem:[#allocation2 + $0x30] sm:$0xf] }
  0x26   : > { %232 = vperm.xlu2 %3808, %v197_v6   ;;  %v3610_v6 = vld [vmem:[#allocation2 + $0x34] sm:$0xf0]  ;;  %1430 = vmatpush.bf16.msra.mxu0 %v2873_v55  ;;  %v2968_v31 = vld [vmem:[#allocation2 + $0x110] sm:$0xf]  ;;  %v2832_v35 = vld [vmem:[#allocation2] sm:$0xf] }
  0x27   : > { %388 = vperm.xlu1 %3809, %v217_v7   ;;  %v4090_v7 = vor.u32 %v3644_v63, %v2992_v62  ;;  %v3622_v30 = vld [vmem:[#allocation2 + $0x94] sm:$0xf0]  ;;  %v2896_v36 = vld [vmem:[#allocation2 + $0x80] sm:$0xf]  ;;  %v3620_v39 = vld [vmem:[#allocation2 + $0x84] sm:$0xf0] }
  0x28   : > { %3741 = vmatpush.bf16.msra.mxu2 %v4084_v59  ;;  %3726 = vmatpush.bf16.msra.mxu3 %v2865_v3  ;;  %v2960_v40 = vld [vmem:[#allocation2 + $0x100] sm:$0xf]  ;;  %v3636_v42 = vld [vmem:[#allocation2 + $0x104] sm:$0xf0]  ;;  %v4115_v44 = vor.u32 %v3620_v39, %v2896_v36  ;;  %v3080_v49 = vld [vmem:[#allocation2 + $0x1f0] sm:$0xf] }
  0x29   : > { %3734 = vmatpush.bf16.msra.mxu1 %v4087_v4  ;;  %v3666_v51 = vld [vmem:[#allocation2 + $0x1f4] sm:$0xf0]  ;;  %v3617_v52 = vld [vmem:[#allocation2 + $0x74] sm:$0xf]  ;;  %v2890_v53 = vld [vmem:[#allocation2 + $0x78] sm:$0xf0] }
  0x2a   : > { %1431 = vmatpush.bf16.msra.mxu0 %v2865_v3  ;;  %v2893_v54 = vor.u32 %v3617_v52, %v2890_v53  ;;  %v4130_v55 = vand.u32 127, %v189_v48  ;;  %v3208_v57 = vld [vmem:[#allocation2 + $0x2f0] sm:$0xf]  ;;  %v3698_v58 = vld [vmem:[#allocation2 + $0x2f4] sm:$0xf0]  ;;  %v6547_v52 = vmov 0 }
  0x2b   : > { %v3209_v61 = vor.u32 %v3698_v58, %v3208_v57  ;;  %v3072_v62 = vld [vmem:[#allocation2 + $0x1e0] sm:$0xf]  ;;  %v3664_v63 = vld [vmem:[#allocation2 + $0x1e4] sm:$0xf0]  ;;  %v3694_v48 = vld [vmem:[#allocation2 + $0x2d4] sm:$0xf0] }
  0x2c   : > { %3742 = vmatpush.bf16.msra.mxu2 %v4090_v7  ;;  %6507 = vst [vmem:[#allocation8_spill] sm:$0xff] %v4130_v55  ;;  %v4141_v60 = vadd.s32 256, %v4130_v55  ;;  %v3073_v3 = vor.u32 %v3664_v63, %v3072_v62  ;;  %v4291_v36 = vadd.s32 384, %v4130_v55  ;;  %v3660_v53 = vld [vmem:[#allocation2 + $0x1c4] sm:$0xf0]  ;;  %s2636_s11 = scalar_lea.sflag [#allocation4], %s179_s30 }
  0x2d   : > { %3810 = vset.pattern.permute.xlu0 %v3946_v1  ;;  %v2866_v62 = vld [vmem:[#allocation2 + $0x48] sm:$0xf0]  ;;  %v3184_v63 = vld [vmem:[#allocation2 + $0x2c0] sm:$0xf]  ;;  %s3888_s17 = sshra.s32 %s2652_s16, 4  ;;  %s3894_s25 = scalar_lea.hbm %s6300_s3, 384  ;;  %s3889_s17 = int_to_ptr.hbm [resolvable:$true] %s3888_s17 }
  0x2e   : > { %247 = vperm.xlu2 %3808, %v202_v9   ;;  %373 = vperm.xlu0 %3810, %v212_v8   ;;  %v2920_v8 = vld [vmem:[#allocation2 + $0xb0] sm:$0xf]  ;;  %v3626_v9 = vld [vmem:[#allocation2 + $0xb4] sm:$0xf0]  ;;  %6509 = vst [vmem:[#allocation10_spill] sm:$0xff] %v4141_v60  ;;  %s3890_s19 = scalar_lea.hbm %s3889_s17, 192  ;;  %p3895_p3 = scmp.lt.s32.totalorder %s3889_s17, %s6300_s3 }
  0x2f   : > { %376 = vperm.xlu1 %3809, %v213_v10   ;;  %v2984_v10 = vld [vmem:[#allocation2 + $0x130] sm:$0xf]  ;;  %p3891_p0 = scmp.ne.s32.totalorder %s3889_s17, %s3890_s19  ;;  %p3896_p4 = scmp.lt.s32.totalorder %s3894_s25, %s3890_s19 }
  0x31   : > { %p3892_p1 = pnand %p3891_p0, %p4009_p5  ;;  %p3897_p7 = por %p3896_p4, %p3895_p3 }
  0x33   : > { %p3893_p2 = pneg %p3892_p1 }
  0x35   : > { %p3898_p8 = pnand %p3897_p7, %p3893_p2 }
  0x36   : > { %3812 = vset.pattern.permute.xlu2 %v3946_v1  ;;  %394 = vperm.xlu0 %3810, %v219_v12   ;;  %v2857_v12 = vor.u32 %v3610_v6, %v2856_v5  ;;  %v2882_v5 = vld [vmem:[#allocation2 + $0x68] sm:$0xf0] }
  0x37   : > { %391 = vperm.xlu2 %3812, %v218_v13   ;;  %3811 = vset.pattern.permute.xlu1 %v3945_v0  ;;  %v4095_v13 = vor.u32 %v3626_v9, %v2920_v8  ;;  %v3200_v8 = vld [vmem:[#allocation2 + $0x2e0] sm:$0xf]  ;;  %v3696_v9 = vld [vmem:[#allocation2 + $0x2e4] sm:$0xf0] }
  0x38   : > { %250 = vperm.xlu1 %3811, %v203_v11   ;;  %v3642_v11 = vld [vmem:[#allocation2 + $0x134] sm:$0xf0]  ;;  %3727 = vmatpush.bf16.msra.mxu3 %v2857_v12 }
  0x39   : > { %3735 = vmatpush.bf16.msra.mxu1 %v4095_v13  ;;  %1432 = vmatpush.bf16.msra.mxu0 %v2857_v12  ;;  %v6510_v12 = vmov 0 }
  0x3e   : > { %379 = vperm.xlu0 %3810, %v214_v15   ;;  %v2848_v15 = vld [vmem:[#allocation2 + $0x20] sm:$0xf] }
  0x3f   : > { %3813 = vset.pattern.permute.xlu2 %v3945_v0 }
  0x40   : > { %238 = vperm.xlu2 %3813, %v199_v16   ;;  %235 = vperm.xlu1 %3811, %v198_v14   ;;  %v4099_v14 = vor.u32 %v3642_v11, %v2984_v10  ;;  %v3608_v16 = vld [vmem:[#allocation2 + $0x24] sm:$0xf0]  ;;  %v3201_v10 = vor.u32 %v3696_v9, %v3200_v8  ;;  %v6553_v8 = vmov 0  ;;  %v4403_v9 = vadd.s32 640, %v4130_v55 }
  0x42   : > { %3743 = vmatpush.bf16.msra.mxu2 %v4099_v14 }
  0x46   : > { %3815 = vset.pattern.permute.xlu0 %v3945_v0 }
  0x47   : > { %256 = vperm.xlu0 %3815, %v205_v17   ;;  %v2912_v17 = vld [vmem:[#allocation2 + $0xa0] sm:$0xf] }
  0x48   : > { %253 = vperm.xlu2 %3813, %v204_v19   ;;  %3814 = vset.pattern.permute.xlu1 %v3946_v1  ;;  %v2849_v19 = vor.u32 %v3608_v16, %v2848_v15  ;;  %v6512_v15 = vmov 0  ;;  %v6515_v16 = vmov 0 }
  0x49   : > { %382 = vperm.xlu1 %3814, %v215_v18   ;;  %v211_v18 = vld [vmem:[%s4036_s8 + $0x78] sm:$0xff] }
  0x4a   : > { %3728 = vmatpush.bf16.msra.mxu3 %v2849_v19  ;;  %1433 = vmatpush.bf16.msra.mxu0 %v2849_v19  ;;  %v227_v43 = vadd.s32 384, %v211_v18  ;;  %v6520_v19 = vmov 0 }
  0x4f   : > { %3819 = vset.pattern.permute.xlu0 %v3946_v1 }
  0x50   : > { %3816 = vset.pattern.permute.xlu2 %v3946_v1  ;;  %403 = vperm.xlu0 %3819, %v222_v21   ;;  %v2976_v21 = vld [vmem:[#allocation2 + $0x120] sm:$0xf] }
  0x51   : > { %400 = vperm.xlu2 %3816, %v221_v22   ;;  %397 = vperm.xlu1 %3814, %v220_v23   ;;  %v3640_v22 = vld [vmem:[#allocation2 + $0x124] sm:$0xf0] }
  0x58   : > { %412 = vperm.xlu0 %3819, %v225_v25   ;;  %v2840_v25 = vld [vmem:[#allocation2 + $0x10] sm:$0xf] }
  0x59   : > { %3818 = vset.pattern.permute.xlu2 %v3945_v0  ;;  %3817 = vset.pattern.permute.xlu1 %v3945_v0 }
  0x5a   : > { %262 = vperm.xlu2 %3818, %v207_v26   ;;  %259 = vperm.xlu1 %3817, %v206_v20   ;;  %v3624_v20 = vld [vmem:[#allocation2 + $0xa4] sm:$0xf0]  ;;  %v3606_v26 = vld [vmem:[#allocation2 + $0x14] sm:$0xf0] }
  0x5b   : > { %v2913_v23 = vor.u32 %v3624_v20, %v2912_v17  ;;  %v6518_v17 = vmov 0 }
  0x5d   : > { %3736 = vmatpush.bf16.msra.mxu1 %v2913_v23 }
  0x60   : > { %415 = vperm.xlu0 %3819, %v226_v29   ;;  %v2841_v29 = vor.u32 %v3606_v26, %v2840_v25 }
  0x62   : > { %265 = vperm.xlu2 %3818, %v208_v32   ;;  %3820 = vset.pattern.permute.xlu1 %v3946_v1  ;;  %v3638_v32 = vld [vmem:[#allocation2 + $0x114] sm:$0xf0] }
  0x63   : > { %406 = vperm.xlu1 %3820, %v223_v28   ;;  %v2904_v28 = vld [vmem:[#allocation2 + $0x90] sm:$0xf]  ;;  %v4111_v34 = vor.u32 %v3638_v32, %v2968_v31  ;;  %3729 = vmatpush.bf16.msra.mxu3 %v2841_v29  ;;  %v6526_v32 = vmov 0 }
  0x64   : > { %v4107_v33 = vor.u32 %v3622_v30, %v2904_v28  ;;  %1434 = vmatpush.bf16.msra.mxu0 %v2841_v29  ;;  %v3613_v28 = vld [vmem:[#allocation2 + $0x54] sm:$0xf]  ;;  %v2874_v29 = vld [vmem:[#allocation2 + $0x58] sm:$0xf0] }
  0x65   : > { %v2877_v31 = vor.u32 %v3613_v28, %v2874_v29 }
  0x66   : > { %3737 = vmatpush.bf16.msra.mxu1 %v4107_v33 }
  0x6a   : > { %3822 = vset.pattern.permute.xlu2 %v3946_v1  ;;  %3738 = vmatpush.bf16.msra.mxu1 %v4115_v44 }
  0x6b   : > { %409 = vperm.xlu2 %3822, %v224_v2   ;;  %3821 = vset.pattern.permute.xlu1 %v3945_v0 }
  0x6c   : > { %268 = vperm.xlu1 %3821, %v4058_v24   ;;  %v4104_v24 = vor.u32 %v3640_v22, %v2976_v21  ;;  %v6523_v21 = vmov 0  ;;  %v3064_v22 = vld [vmem:[#allocation2 + $0x1d0] sm:$0xf] }
  0x6e   : > { %3744 = vmatpush.bf16.msra.mxu2 %v4104_v24  ;;  %1673 = vmatpush.bf16.msrb.mxu1 %v3209_v61  ;;  %v3611_v61 = vld [vmem:[#allocation2 + $0x44] sm:$0xf] }
  0x72   : > { %3745 = vmatpush.bf16.msra.mxu2 %v4111_v34  ;;  %1674 = vmatpush.bf16.msrb.mxu1 %v3201_v10  ;;  %v6555_v10 = vmov 0 }
  0x73   : > { %3823 = vset.pattern.permute.xlu2 %v3945_v0  ;;  %v3604_v0 = vld [vmem:[#allocation2 + $0x4] sm:$0xf0] }
  0x74   : > { %274 = vperm.xlu2 %3823, %v211_v18   ;;  %271 = vperm.xlu1 %3821, %v4063_v27   ;;  %v2833_v38 = vor.u32 %v3604_v0, %v2832_v35  ;;  %v4117_v27 = vor.u32 %v3636_v42, %v2960_v40  ;;  %v6351_v18 = vmov 1.0|1.0   ;;  %v6530_v0 = vmov 0 }
  0x75   : > { %v6535_v40 = vmov 0  ;;  %v6540_v42 = vmov 0 }
  0x76   : > { %3730 = vmatpush.bf16.msra.mxu3 %v2833_v38  ;;  %3746 = vmatpush.bf16.msra.mxu2 %v4117_v27 }
  0x77   : > { %1435 = vmatpush.bf16.msra.mxu0 %v2833_v38  ;;  %v6532_v38 = vmov 0 }
  0x78   : > { %v4123_v45 = vpop.permute.xlu2 %229 }
  0x7a   : > { %1722 = vmatpush.bf16.msrb.mxu2 %v2893_v54  ;;  %v6550_v54 = vmov 0 }
  0x7b   : > { %1477 = vmatpush.bf16.msrb.mxu0 %v4069_v37 }
  0x7c   : > { %3824 = vset.pattern.permute.xlu1 %v3946_v1  ;;  %v3081_v1 = vor.u32 %v3666_v51, %v3080_v49  ;;  %v6545_v49 = vmov 0 }
  0x7d   : > { %418 = vperm.xlu1 %3824, %v227_v43  }
  0x7e   : > { %1575 = vmatpush.bf16.msrb.mxu3 %v3081_v1  ;;  %v3056_v1 = vld [vmem:[#allocation2 + $0x1c0] sm:$0xf] }
  0x7f   : > { %1478 = vmatpush.bf16.msrb.mxu0 %v4074_v46  ;;  %v3057_v58 = vor.u32 %v3660_v53, %v3056_v1  ;;  %v3609_v1 = vld [vmem:[#allocation2 + $0x34] sm:$0xf]  ;;  %v2858_v53 = vld [vmem:[#allocation2 + $0x38] sm:$0xf0] }
  0x80   : > { %v4127_v47 = vpop.permute.xlu2 %232 }
  0x82   : > { %1576 = vmatpush.bf16.msrb.mxu3 %v3073_v3  ;;  %v3692_v3 = vld [vmem:[#allocation2 + $0x2c4] sm:$0xf0] }
  0x83   : > { %1479 = vmatpush.bf16.msrb.mxu0 %v4081_v56  ;;  %v4138_v56 = vadd.s32 128, %v4130_v55 }
  0x85   : > { %6508 = vst [vmem:[#allocation9_spill] sm:$0xff] %v4138_v56 }
  0x87   : > { %1480 = vmatpush.bf16.msrb.mxu0 %v4087_v4  ;;  %v3615_v4 = vld [vmem:[#allocation2 + $0x64] sm:$0xf] }
  0x88   : > { %v4143_v2 = vpop.permute.xlu2 %247  ;;  %v2885_v6 = vor.u32 %v3615_v4, %v2882_v5 }
  0x8a   : > { %1723 = vmatpush.bf16.msrb.mxu2 %v2885_v6  ;;  %v3185_v6 = vor.u32 %v3692_v3, %v3184_v63  ;;  %v6572_v63 = vmov 0 }
  0x8b   : > { %1481 = vmatpush.bf16.msrb.mxu0 %v4095_v13 }
  0x8e   : > { %1724 = vmatpush.bf16.msrb.mxu2 %v2877_v31  ;;  %v6565_v31 = vmov 0 }
  0x8f   : > { %v4133_v37 = vpop.permute.xlu0 %241  ;;  %1482 = vmatpush.bf16.msrb.mxu0 %v2913_v23  ;;  %v3662_v23 = vld [vmem:[#allocation2 + $0x1d4] sm:$0xf0] }
  0x90   : > { %vm300_vm0 = vcmp.eq.s32.totalorder %v4130_v55, %v4133_v37  ;;  %vm301_vm2 = vcmp.eq.s32.totalorder %v4138_v56, %v4133_v37  ;;  %vm302_vm4 = vcmp.eq.s32.totalorder %v4141_v60, %v4133_v37  ;;  %v3065_v26 = vor.u32 %v3662_v23, %v3064_v22 }
  0x91   : > { %v4135_v46 = vpop.permute.xlu1 %385  ;;  %v4211_v20 = vpop.permute.xlu2 %391  ;;  %v6557_v22 = vmov 0  ;;  %v6560_v23 = vmov 0 }
  0x92   : > { %vm444_vm1 = vcmp.eq.s32.totalorder %v4130_v55, %v4135_v46  ;;  %vm445_vm3 = vcmp.eq.s32.totalorder %v4138_v56, %v4135_v46  ;;  %vm446_vm5 = vcmp.eq.s32.totalorder %v4141_v60, %v4135_v46  ;;  %1577 = vmatpush.bf16.msrb.mxu3 %v3065_v26  ;;  %v6563_v26 = vmov 0 }
  0x93   : > { %1483 = vmatpush.bf16.msrb.mxu0 %v4107_v33  ;;  %vm4168_vm7 = vmor %vm300_vm0, %vm444_vm1  ;;  %v6528_v33 = vmov 0 }
  0x94   : > { %v6511_v12 = vsel %vm4168_vm7, 4294967295, %v6510_v12  ;;  %vm4174_vm8 = vmor %vm301_vm2, %vm445_vm3 }
  0x95   : > { %v6513_v15 = vsel %vm4174_vm8, 4294967295, %v6512_v15  ;;  %vm4184_vm12 = vmor %vm302_vm4, %vm446_vm5  ;;  %vm276_vm5 = vcmp.eq.s32.totalorder %v4130_v55, %v4123_v45 }
  0x96   : > { %6514 = vst [vmem:[#allocation11_spill] sm:$0xff] %v6513_v15  ;;  %v6516_v16 = vsel %vm4184_vm12, 4294967295, %v6515_v16  ;;  %1578 = vmatpush.bf16.msrb.mxu3 %v3057_v58  ;;  %v6569_v58 = vmov 0  ;;  %v3678_v15 = vld [vmem:[#allocation2 + $0x254] sm:$0xf0] }
  0x97   : > { %v4154_v11 = vpop.permute.xlu0 %244  ;;  %6517 = vst [vmem:[#allocation12_spill] sm:$0xff] %v6516_v16  ;;  %1484 = vmatpush.bf16.msrb.mxu0 %v4115_v44  ;;  %v3192_v44 = vld [vmem:[#allocation2 + $0x2d0] sm:$0xf]  ;;  %v3680_v16 = vld [vmem:[#allocation2 + $0x264] sm:$0xf0] }
  0x98   : > { %vm306_vm6 = vcmp.eq.s32.totalorder %v4130_v55, %v4154_v11  ;;  %vm307_vm10 = vcmp.eq.s32.totalorder %v4138_v56, %v4154_v11  ;;  %vm308_vm15 = vcmp.eq.s32.totalorder %v4141_v60, %v4154_v11  ;;  %v3193_v51 = vor.u32 %v3694_v48, %v3192_v44  ;;  %v3658_v48 = vld [vmem:[#allocation2 + $0x1b4] sm:$0xf0] }
  0x99   : > { %v4172_v13 = vpop.permute.xlu1 %388  ;;  %v6567_v44 = vmov 0 }
  0x9a   : > { %vm450_vm9 = vcmp.eq.s32.totalorder %v4130_v55, %v4172_v13  ;;  %vm451_vm11 = vcmp.eq.s32.totalorder %v4138_v56, %v4172_v13  ;;  %vm452_vm0 = vcmp.eq.s32.totalorder %v4141_v60, %v4172_v13  ;;  %v4281_v35 = vpop.permute.xlu2 %238  ;;  %1675 = vmatpush.bf16.msrb.mxu1 %v3193_v51 }
  0x9b   : > { %vm4189_vm13 = vmor %vm306_vm6, %vm450_vm9  ;;  %vm282_vm9 = vcmp.eq.s32.totalorder %v4130_v55, %v4127_v47 }
  0x9c   : > { %v6519_v17 = vsel %vm4189_vm13, 4294967295, %v6518_v17  ;;  %vm6303_vm14 = vmpackc.low %vm4189_vm13, %vm4168_vm7 }
  0x9d   : > { %3219 = vmatmul.msk.bf16.vlgmr.msra.gmra.mxu3 %vm6303_vm14, %v6351_v18  ;;  %vm4207_vm1 = vmor %vm307_vm10, %vm451_vm11 }
  0x9e   : > { %v6521_v19 = vsel %vm4207_vm1, 4294967295, %v6520_v19  ;;  %vm6302_vm2 = vmpackc.low %vm4207_vm1, %vm4174_vm8  ;;  %vm278_vm8 = vcmp.eq.s32.totalorder %v4141_v60, %v4123_v45  ;;  %1676 = vmatpush.bf16.msrb.mxu1 %v3185_v6  ;;  %v6577_v6 = vmov 0 }
  0x9f   : > { %6522 = vst [vmem:[#allocation13_spill] sm:$0xff] %v6521_v19  ;;  %3235 = vmatmul.msk.bf16.vlgmr.msra.gmra.mxu1 %vm6302_vm2, %v6351_v18  ;;  %vm4223_vm3 = vmor %vm308_vm15, %vm452_vm0  ;;  %vm312_vm0 = vcmp.eq.s32.totalorder %v4130_v55, %v4143_v2  ;;  %vm458_vm2 = vcmp.eq.s32.totalorder %v4141_v60, %v4211_v20  ;;  %v3024_v19 = vld [vmem:[#allocation2 + $0x180] sm:$0xf] }
  0xa0   : > { %v6524_v21 = vsel %vm4223_vm3, 4294967295, %v6523_v21  ;;  %vm6301_vm4 = vmpackc.low %vm4223_vm3, %vm4184_vm12  ;;  %v4231_v25 = vpop.permute.xlu0 %373 }
  0xa1   : > { %6525 = vst [vmem:[#allocation14_spill] sm:$0xff] %v6524_v21  ;;  %3251 = vmatmul.msk.bf16.vlgmr.msra.gmra.mxu2 %vm6301_vm4, %v6351_v18  ;;  %v4239_v30 = vpop.permute.xlu1 %376  ;;  %vm420_vm6 = vcmp.eq.s32.totalorder %v4130_v55, %v4231_v25  ;;  %vm456_vm4 = vcmp.eq.s32.totalorder %v4130_v55, %v4211_v20  ;;  %vm422_vm14 = vcmp.eq.s32.totalorder %v4141_v60, %v4231_v25  ;;  %v3605_v21 = vld [vmem:[#allocation2 + $0x14] sm:$0xf] }
  0xa2   : > { %vm426_vm10 = vcmp.eq.s32.totalorder %v4130_v55, %v4239_v30  ;;  %vm4249_vm11 = vmor %vm276_vm5, %vm420_vm6  ;;  %vm313_vm6 = vcmp.eq.s32.totalorder %v4138_v56, %v4143_v2  ;;  %v4377_v57 = vpop.permute.xlu2 %253 }
  0xa3   : > { %v6527_v32 = vsel %vm4249_vm11, 4294967295, %v6526_v32  ;;  %vm4253_vm15 = vmor %vm282_vm9, %vm426_vm10  ;;  %vm457_vm9 = vcmp.eq.s32.totalorder %v4138_v56, %v4211_v20  ;;  %vm314_vm10 = vcmp.eq.s32.totalorder %v4141_v60, %v4143_v2 }
  0xa4   : > { %v6529_v33 = vsel %vm4253_vm15, 4294967295, %v6528_v33  ;;  %vm6305_vm5 = vmpackc.low %vm4253_vm15, %vm4249_vm11 }
  0xa5   : > { %3215 = vmatmul.msk.bf16.vlgmr.msra.gmra.mxu0 %vm6305_vm5, %v6351_v18  ;;  %vm4283_vm12 = vmor %vm312_vm0, %vm456_vm4  ;;  %vm428_vm5 = vcmp.eq.s32.totalorder %v4141_v60, %v4239_v30  ;;  %vm284_vm0 = vcmp.eq.s32.totalorder %v4141_v60, %v4127_v47 }
  0xa6   : > { %v6531_v0 = vsel %vm4283_vm12, 4294967295, %v6530_v0  ;;  %1526 = vmatpush.bf16.msra.mxu0 %v4071_v41  ;;  %vm4293_vm3 = vmor %vm313_vm6, %vm457_vm9  ;;  %v6538_v41 = vmov 0  ;;  %vm423_vm6 = vcmp.eq.s32.totalorder %v4291_v36, %v4231_v25 }
  0xa7   : > { %v6533_v38 = vsel %vm4293_vm3, 4294967295, %v6532_v38  ;;  %vm4301_vm4 = vmor %vm314_vm10, %vm458_vm2 }
  0xa8   : > { %6534 = vst [vmem:[#allocation15_spill] sm:$0xff] %v6533_v38  ;;  %v4299_v39 = vpop.permute.xlu0 %394  ;;  %v6536_v40 = vsel %vm4301_vm4, 4294967295, %v6535_v40  ;;  %vm4307_vm1 = vmor %vm278_vm8, %vm422_vm14  ;;  %vm279_vm14 = vcmp.eq.s32.totalorder %v4291_v36, %v4123_v45 }
  0xa9   : > { %6537 = vst [vmem:[#allocation16_spill] sm:$0xff] %v6536_v40  ;;  %v6539_v41 = vsel %vm4307_vm1, 4294967295, %v6538_v41  ;;  %vm462_vm9 = vcmp.eq.s32.totalorder %v4130_v55, %v4299_v39  ;;  %vm4315_vm7 = vmor %vm284_vm0, %vm428_vm5  ;;  %vm463_vm10 = vcmp.eq.s32.totalorder %v4138_v56, %v4299_v39  ;;  %vm464_vm15 = vcmp.eq.s32.totalorder %v4141_v60, %v4299_v39  ;;  %v3654_v40 = vld [vmem:[#allocation2 + $0x194] sm:$0xf0] }
  0xaa   : > { %v6541_v42 = vsel %vm4315_vm7, 4294967295, %v6540_v42  ;;  %v4319_v43 = vpop.permute.xlu1 %250  ;;  %1527 = vmatpush.bf16.msra.mxu0 %v4077_v50  ;;  %vm4334_vm0 = vmor %vm279_vm14, %vm423_vm6  ;;  %v6543_v50 = vmov 0  ;;  %vm429_vm14 = vcmp.eq.s32.totalorder %v4291_v36, %v4239_v30 }
  0xab   : > { %6542 = vst [vmem:[#allocation17_spill] sm:$0xff] %v6541_v42  ;;  %vm318_vm2 = vcmp.eq.s32.totalorder %v4130_v55, %v4319_v43  ;;  %vm319_vm5 = vcmp.eq.s32.totalorder %v4138_v56, %v4319_v43  ;;  %v6544_v50 = vsel %vm4334_vm0, 4294967295, %v6543_v50  ;;  %vm320_vm11 = vcmp.eq.s32.totalorder %v4141_v60, %v4319_v43 }
  0xac   : > { %vm4338_vm13 = vmor %vm318_vm2, %vm462_vm9  ;;  %vm6580_vm0 = vcmp.eq.s32.totalorder %v4138_v56, %v4231_v25 }
  0xad   : > { %v6546_v49 = vsel %vm4338_vm13, 4294967295, %v6545_v49  ;;  %vm6315_vm8 = vmpackc.low %vm4338_vm13, %vm4283_vm12 }
  0xae   : > { %3221 = vmatmul.msk.bf16.gmra.mxu3 %vm6315_vm8, %v6351_v18  ;;  %vm4356_vm6 = vmor %vm319_vm5, %vm463_vm10  ;;  %1528 = vmatpush.bf16.msra.mxu0 %v4084_v59  ;;  %v2869_v59 = vor.u32 %v3611_v61, %v2866_v62  ;;  %vm285_vm10 = vcmp.eq.s32.totalorder %v4291_v36, %v4127_v47  ;;  %v2861_v61 = vor.u32 %v3609_v1, %v2858_v53  ;;  %v3176_v62 = vld [vmem:[#allocation2 + $0x2b0] sm:$0xf]  ;;  %v6596_v1 = vmov 0 }
  0xaf   : > { %v6548_v52 = vsel %vm4356_vm6, 4294967295, %v6547_v52  ;;  %vm6314_vm9 = vmpackc.low %vm4356_vm6, %vm4293_vm3 }
  0xb0   : > { %6549 = vst [vmem:[#allocation18_spill] sm:$0xff] %v6548_v52  ;;  %3237 = vmatmul.msk.bf16.gmra.mxu1 %vm6314_vm9, %v6351_v18  ;;  %vm4373_vm2 = vmor %vm320_vm11, %vm464_vm15  ;;  %v4391_v4 = vpop.permute.xlu0 %379  ;;  %1725 = vmatpush.bf16.msrb.mxu2 %v2869_v59  ;;  %vm431_vm9 = vcmp.eq.s32.totalorder %v4403_v9, %v4239_v30  ;;  %v3690_v59 = vld [vmem:[#allocation2 + $0x2b4] sm:$0xf0]  ;;  %v3136_v52 = vld [vmem:[#allocation2 + $0x260] sm:$0xf] }
  0xb1   : > { %v6551_v54 = vsel %vm4373_vm2, 4294967295, %v6550_v54  ;;  %vm6313_vm5 = vmpackc.low %vm4373_vm2, %vm4301_vm4  ;;  %vm287_vm4 = vcmp.eq.s32.totalorder %v4403_v9, %v4127_v47  ;;  %v3177_v3 = vor.u32 %v3690_v59, %v3176_v62  ;;  %v2850_v62 = vld [vmem:[#allocation2 + $0x28] sm:$0xf0] }
  0xb2   : > { %6552 = vst [vmem:[#allocation19_spill] sm:$0xff] %v6551_v54  ;;  %3253 = vmatmul.msk.bf16.gmra.mxu2 %vm6313_vm5, %v6351_v18  ;;  %v4393_v5 = vpop.permute.xlu1 %235  ;;  %vm4398_vm11 = vmor %vm285_vm10, %vm429_vm14  ;;  %1529 = vmatpush.bf16.msra.mxu0 %v4090_v7  ;;  %vm425_vm14 = vcmp.eq.s32.totalorder %v4403_v9, %v4231_v25  ;;  %vm434_vm10 = vcmp.eq.s32.totalorder %v4141_v60, %v4391_v4  ;;  %v4419_v7 = vadd.s32 512, %v4130_v55  ;;  %v6617_v54 = vmov 0 }
  0xb3   : > { %v6554_v8 = vsel %vm4398_vm11, 4294967295, %v6553_v8  ;;  %vm290_vm15 = vcmp.eq.s32.totalorder %v4141_v60, %v4393_v5  ;;  %vm281_vm5 = vcmp.eq.s32.totalorder %v4403_v9, %v4123_v45  ;;  %vm4436_vm6 = vmor %vm287_vm4, %vm431_vm9  ;;  %vm432_vm4 = vcmp.eq.s32.totalorder %v4130_v55, %v4391_v4  ;;  %1677 = vmatpush.bf16.msrb.mxu1 %v3177_v3 }
  0xb4   : > { %vm4421_vm8 = vmor %vm290_vm15, %vm434_vm10  ;;  %vm424_vm3 = vcmp.eq.s32.totalorder %v4419_v7, %v4231_v25  ;;  %v6561_v23 = vsel %vm4436_vm6, 4294967295, %v6560_v23  ;;  %vm288_vm15 = vcmp.eq.s32.totalorder %v4130_v55, %v4393_v5  ;;  %vm294_vm9 = vcmp.eq.s32.totalorder %v4130_v55, %v4281_v35  ;;  %1726 = vmatpush.bf16.msrb.mxu2 %v2861_v61  ;;  %v3607_v61 = vld [vmem:[#allocation2 + $0x24] sm:$0xf] }
  0xb5   : > { %v6556_v10 = vsel %vm4421_vm8, 4294967295, %v6555_v10  ;;  %vm4430_vm2 = vmor %vm281_vm5, %vm425_vm14  ;;  %6562 = vst [vmem:[#allocation21_spill] sm:$0xff] %v6561_v23  ;;  %vm280_vm5 = vcmp.eq.s32.totalorder %v4419_v7, %v4123_v45  ;;  %v6590_v25 = vmov 0  ;;  %vm325_vm8 = vcmp.eq.s32.totalorder %v4138_v56, %v4377_v57 }
  0xb6   : > { %1530 = vmatpush.bf16.msra.mxu0 %v4099_v14  ;;  %v6558_v22 = vsel %vm4430_vm2, 4294967295, %v6557_v22  ;;  %v4448_v14 = vpop.permute.xlu2 %400  ;;  %vm4450_vm14 = vmor %vm280_vm5, %vm424_vm3  ;;  %v2853_v59 = vor.u32 %v3607_v61, %v2850_v62  ;;  %v6599_v3 = vmov 0  ;;  %v3688_v61 = vld [vmem:[#allocation2 + $0x2a4] sm:$0xf0]  ;;  %v6604_v62 = vmov 0 }
  0xb7   : > { %6559 = vst [vmem:[#allocation20_spill] sm:$0xff] %v6558_v22  ;;  %v6564_v26 = vsel %vm4450_vm14, 4294967295, %v6563_v26  ;;  %vm4465_vm12 = vmor %vm288_vm15, %vm432_vm4  ;;  %vm474_vm5 = vcmp.eq.s32.totalorder %v4130_v55, %v4448_v14  ;;  %vm475_vm6 = vcmp.eq.s32.totalorder %v4138_v56, %v4448_v14 }
  0xb8   : > { %v6566_v31 = vsel %vm4465_vm12, 4294967295, %v6565_v31  ;;  %1727 = vmatpush.bf16.msrb.mxu2 %v2853_v59 }
  0xb9   : > { %v4458_v29 = vpop.permute.xlu0 %256 }
  0xba   : > { %1531 = vmatpush.bf16.msra.mxu0 %v4104_v24  ;;  %vm330_vm3 = vcmp.eq.s32.totalorder %v4130_v55, %v4458_v29  ;;  %v3048_v24 = vld [vmem:[#allocation2 + $0x1b0] sm:$0xf] }
  0xbb   : > { %v4454_v28 = vpop.permute.xlu1 %382  ;;  %v3049_v51 = vor.u32 %v3658_v48, %v3048_v24  ;;  %v6588_v24 = vmov 0 }
  0xbc   : > { %vm438_vm10 = vcmp.eq.s32.totalorder %v4130_v55, %v4454_v28  ;;  %vm440_vm2 = vcmp.eq.s32.totalorder %v4141_v60, %v4454_v28 }
  0xbd   : > { %vm4473_vm13 = vmor %vm294_vm9, %vm438_vm10  ;;  %1579 = vmatpush.bf16.msrb.mxu3 %v3049_v51  ;;  %vm6576_vm10 = vcmp.eq.s32.totalorder %v4141_v60, %v4458_v29  ;;  %v3656_v51 = vld [vmem:[#allocation2 + $0x1a4] sm:$0xf0] }
  0xbe   : > { %v6568_v44 = vsel %vm4473_vm13, 4294967295, %v6567_v44  ;;  %vm6326_vm15 = vmpackc.low %vm4473_vm13, %vm4465_vm12  ;;  %1532 = vmatpush.bf16.msra.mxu0 %v4111_v34  ;;  %vm296_vm12 = vcmp.eq.s32.totalorder %v4141_v60, %v4281_v35  ;;  %vm430_vm13 = vcmp.eq.s32.totalorder %v4419_v7, %v4239_v30  ;;  %v6581_v34 = vmov 0 }
  0xbf   : > { %3217 = vmatmul.msk.bf16.gmra.mxu0 %vm6326_vm15, %v6351_v18  ;;  %vm4495_vm9 = vmor %vm330_vm3, %vm474_vm5  ;;  %vm6571_vm3 = vcmp.eq.s32.totalorder %v4138_v56, %v4458_v29  ;;  %vm6575_vm15 = vcmp.eq.s32.totalorder %v4141_v60, %v4448_v14 }
  0xc0   : > { %v6570_v58 = vsel %vm4495_vm9, 4294967295, %v6569_v58  ;;  %vm4511_vm5 = vmor %vm6571_vm3, %vm475_vm6  ;;  %vm277_vm6 = vcmp.eq.s32.totalorder %v4138_v56, %v4123_v45  ;;  %vm283_vm3 = vcmp.eq.s32.totalorder %v4138_v56, %v4127_v47  ;;  %v6585_v45 = vmov 0 }
  0xc1   : > { %v6573_v63 = vsel %vm4511_vm5, 4294967295, %v6572_v63  ;;  %vm4522_vm4 = vmor %vm6576_vm10, %vm6575_vm15  ;;  %vm6584_vm10 = vcmp.eq.s32.totalorder %v4138_v56, %v4239_v30  ;;  %v6592_v30 = vmov 0 }
  0xc2   : > { %6574 = vst [vmem:[#allocation22_spill] sm:$0xff] %v6573_v63  ;;  %v6578_v6 = vsel %vm4522_vm4, 4294967295, %v6577_v6  ;;  %vm4537_vm15 = vmor %vm277_vm6, %vm6580_vm0  ;;  %vm286_vm6 = vcmp.eq.s32.totalorder %v4419_v7, %v4127_v47  ;;  %1533 = vmatpush.bf16.msra.mxu0 %v4117_v27  ;;  %v4575_v47 = vpop.permute.xlu2 %262  ;;  %v3040_v27 = vld [vmem:[#allocation2 + $0x1a0] sm:$0xf] }
  0xc3   : > { %6579 = vst [vmem:[#allocation23_spill] sm:$0xff] %v6578_v6  ;;  %v6582_v34 = vsel %vm4537_vm15, 4294967295, %v6581_v34  ;;  %vm4544_vm11 = vmor %vm283_vm3, %vm6584_vm10  ;;  %v4552_v48 = vpop.permute.xlu1 %397  ;;  %vm324_vm3 = vcmp.eq.s32.totalorder %v4130_v55, %v4377_v57  ;;  %v3041_v53 = vor.u32 %v3656_v51, %v3040_v27  ;;  %v4623_v27 = vpop.permute.xlu0 %403  ;;  %v3144_v6 = vld [vmem:[#allocation2 + $0x270] sm:$0xf]  ;;  %vm344_vm14 = vcmp.eq.s32.totalorder %v4141_v60, %v4575_v47 }
  0xc4   : > { %6583 = vst [vmem:[#allocation24_spill] sm:$0xff] %v6582_v34  ;;  %v6586_v45 = vsel %vm4544_vm11, 4294967295, %v6585_v45  ;;  %vm4548_vm1 = vmor %vm296_vm12, %vm440_vm2  ;;  %vm468_vm10 = vcmp.eq.s32.totalorder %v4130_v55, %v4552_v48  ;;  %vm469_vm12 = vcmp.eq.s32.totalorder %v4138_v56, %v4552_v48  ;;  %v3652_v34 = vld [vmem:[#allocation2 + $0x184] sm:$0xf0] }
  0xc5   : > { %6587 = vst [vmem:[#allocation25_spill] sm:$0xff] %v6586_v45  ;;  %v6589_v24 = vsel %vm4548_vm1, 4294967295, %v6588_v24  ;;  %vm4567_vm2 = vmor %vm286_vm6, %vm430_vm13  ;;  %vm470_vm13 = vcmp.eq.s32.totalorder %v4141_v60, %v4552_v48  ;;  %1580 = vmatpush.bf16.msrb.mxu3 %v3041_v53  ;;  %v3168_v53 = vld [vmem:[#allocation2 + $0x2a0] sm:$0xf]  ;;  %v3603_v45 = vld [vmem:[#allocation2 + $0x4] sm:$0xf] }
  0xc6   : > { %v6591_v25 = vsel %vm4567_vm2, 4294967295, %v6590_v25  ;;  %vm4571_vm7 = vmor %vm324_vm3, %vm468_vm10  ;;  %6595 = vst [vmem:[#allocation27_spill] sm:$0xff] %v4575_v47  ;;  %vm326_vm10 = vcmp.eq.s32.totalorder %v4141_v60, %v4377_v57  ;;  %v3169_v59 = vor.u32 %v3688_v61, %v3168_v53  ;;  %v6613_v53 = vmov 0 }
  0xc7   : > { %v6593_v30 = vsel %vm4571_vm7, 4294967295, %v6592_v30  ;;  %vm6340_vm0 = vmpackc.low %vm4495_vm9, %vm4571_vm7  ;;  %6602 = vst [vmem:[#allocation30_spill] sm:$0xff] %v4623_v27 }
  0xc8   : > { %6594 = vst [vmem:[#allocation26_spill] sm:$0xff] %v6593_v30  ;;  %3223 = vmatmul.msk.bf16.gmra.mxu3 %vm6340_vm0, %v6351_v18  ;;  %vm4591_vm6 = vmor %vm325_vm8, %vm469_vm12  ;;  %1678 = vmatpush.bf16.msrb.mxu1 %v3169_v59  ;;  %v3128_v59 = vld [vmem:[#allocation2 + $0x250] sm:$0xf] }
  0xc9   : > { %v6597_v1 = vsel %vm4591_vm6, 4294967295, %v6596_v1  ;;  %vm6339_vm3 = vmpackc.low %vm4511_vm5, %vm4591_vm6  ;;  %vm481_vm6 = vcmp.eq.s32.totalorder %v4138_v56, %v4623_v27 }
  0xca   : > { %6598 = vst [vmem:[#allocation28_spill] sm:$0xff] %v6597_v1  ;;  %3239 = vmatmul.msk.bf16.gmra.mxu1 %vm6339_vm3, %v6351_v18  ;;  %vm4607_vm8 = vmor %vm326_vm10, %vm470_vm13  ;;  %vm289_vm13 = vcmp.eq.s32.totalorder %v4138_v56, %v4393_v5  ;;  %vm439_vm10 = vcmp.eq.s32.totalorder %v4138_v56, %v4454_v28  ;;  %vm295_vm3 = vcmp.eq.s32.totalorder %v4138_v56, %v4281_v35  ;;  %v3682_v1 = vld [vmem:[#allocation2 + $0x274] sm:$0xf0]  ;;  %v4659_v63 = vpop.permute.xlu2 %265 }
  0xcb   : > { %v6600_v3 = vsel %vm4607_vm8, 4294967295, %v6599_v3  ;;  %vm6341_vm12 = vmpackc.low %vm4522_vm4, %vm4607_vm8  ;;  %vm433_vm8 = vcmp.eq.s32.totalorder %v4138_v56, %v4391_v4  ;;  %6611 = vst [vmem:[#allocation34_spill] sm:$0xff] %v4659_v63  ;;  %v3145_v61 = vor.u32 %v3682_v1, %v3144_v6  ;;  %v3137_v6 = vor.u32 %v3680_v16, %v3136_v52  ;;  %v2842_v1 = vld [vmem:[#allocation2 + $0x18] sm:$0xf0]  ;;  %v3686_v16 = vld [vmem:[#allocation2 + $0x294] sm:$0xf0] }
  0xcc   : > { %6601 = vst [vmem:[#allocation29_spill] sm:$0xff] %v6600_v3  ;;  %3255 = vmatmul.msk.bf16.gmra.mxu2 %vm6341_vm12, %v6351_v18  ;;  %v4625_v51 = vpop.permute.xlu1 %259  ;;  %vm480_vm12 = vcmp.eq.s32.totalorder %v4130_v55, %v4623_v27  ;;  %vm4645_vm5 = vmor %vm289_vm13, %vm433_vm8  ;;  %v6608_v3 = vmov 0 }
  0xcd   : > { %6603 = vst [vmem:[#allocation31_spill] sm:$0xff] %v4625_v51  ;;  %v6605_v62 = vsel %vm4645_vm5, 4294967295, %v6604_v62  ;;  %vm6607_vm0 = vmpackc.low %vm4544_vm11, %vm4537_vm15  ;;  %vm6612_vm8 = vcmp.eq.s32.totalorder %v4130_v55, %v4625_v51  ;;  %vm338_vm4 = vcmp.eq.s32.totalorder %v4141_v60, %v4625_v51 }
  0xce   : > { %6606 = vst [vmem:[#allocation32_spill] sm:$0xff] %v6605_v62  ;;  %vm4655_vm7 = vmor %vm295_vm3, %vm439_vm10  ;;  %vm6616_vm3 = vcmp.eq.s32.totalorder %v4138_v56, %v4625_v51  ;;  %vm6627_vm10 = vcmp.eq.s32.totalorder %v4291_v36, %v4454_v28  ;;  %v3025_v62 = vor.u32 %v3652_v34, %v3024_v19  ;;  %v3104_v19 = vld [vmem:[#allocation2 + $0x220] sm:$0xf]  ;;  %v6660_v34 = vmov 0 }
  0xcf   : > { %3231 = vmatmul.msk.bf16.vlgmr.msrb.gmra.mxu0 %vm6607_vm0, %v6351_v18  ;;  %v6609_v3 = vsel %vm4655_vm7, 4294967295, %v6608_v3  ;;  %vm4664_vm13 = vmor %vm6612_vm8, %vm480_vm12  ;;  %vm482_vm0 = vcmp.eq.s32.totalorder %v4141_v60, %v4623_v27  ;;  %v3032_v18 = vld [vmem:[#allocation2 + $0x190] sm:$0xf]  ;;  %vm435_vm8 = vcmp.eq.s32.totalorder %v4291_v36, %v4391_v4  ;;  %v3152_v51 = vld [vmem:[#allocation2 + $0x280] sm:$0xf] }
  0xd0   : > { %6610 = vst [vmem:[#allocation33_spill] sm:$0xff] %v6609_v3  ;;  %v6614_v53 = vsel %vm4664_vm13, 4294967295, %v6613_v53  ;;  %vm4678_vm12 = vmor %vm6616_vm3, %vm481_vm6  ;;  %v3033_v38 = vor.u32 %v3654_v40, %v3032_v18  ;;  %1624 = vmatpush.bf16.msrb.mxu0 %v3145_v61  ;;  %v6620_v18 = vmov 0  ;;  %v2845_v40 = vor.u32 %v3605_v21, %v2842_v1  ;;  %v3160_v61 = vld [vmem:[#allocation2 + $0x290] sm:$0xf] }
  0xd1   : > { %6615 = vst [vmem:[#allocation35_spill] sm:$0xff] %v6614_v53  ;;  %v6618_v54 = vsel %vm4678_vm12, 4294967295, %v6617_v54  ;;  %vm4692_vm6 = vmor %vm338_vm4, %vm482_vm0  ;;  %v3161_v52 = vor.u32 %v3686_v16, %v3160_v61  ;;  %vm297_vm4 = vcmp.eq.s32.totalorder %v4291_v36, %v4281_v35  ;;  %vm6623_vm0 = vcmp.eq.s32.totalorder %v4291_v36, %v4393_v5  ;;  %v3674_v3 = vld [vmem:[#allocation2 + $0x234] sm:$0xf0]  ;;  %v4838_v53 = vpop.permute.xlu0 %412 }
  0xd2   : > { %6619 = vst [vmem:[#allocation36_spill] sm:$0xff] %v6618_v54  ;;  %v6621_v18 = vsel %vm4692_vm6, 4294967295, %v6620_v18  ;;  %1581 = vmatpush.bf16.msrb.mxu3 %v3033_v38  ;;  %vm4709_vm15 = vmor %vm6623_vm0, %vm435_vm8  ;;  %v6624_v21 = vmov 0  ;;  %1728 = vmatpush.bf16.msrb.mxu2 %v2845_v40  ;;  %v6628_v1 = vmov 0  ;;  %v3129_v40 = vor.u32 %v3678_v15, %v3128_v59  ;;  %v4764_v59 = vpop.permute.xlu2 %409 }
  0xd3   : > { %6622 = vst [vmem:[#allocation37_spill] sm:$0xff] %v6621_v18  ;;  %v6625_v21 = vsel %vm4709_vm15, 4294967295, %v6624_v21  ;;  %vm4720_vm11 = vmor %vm297_vm4, %vm6627_vm10  ;;  %1679 = vmatpush.bf16.msrb.mxu1 %v3161_v52  ;;  %vm6630_vm4 = vcmp.eq.s32.totalorder %v4130_v55, %v4575_v47  ;;  %v6631_v61 = vmov 0  ;;  %v6634_v15 = vmov 1.0|1.0  }
  0xd4   : > { %v6629_v1 = vsel %vm4720_vm11, 4294967295, %v6628_v1  ;;  %1625 = vmatpush.bf16.msrb.mxu0 %v3137_v6  ;;  %v6636_v6 = vmov 0  ;;  %6639 = vst [vmem:[#allocation41_spill] sm:$0xff] %v4764_v59  ;;  %vm293_vm15 = vcmp.eq.s32.totalorder %v4403_v9, %v4393_v5  ;;  %v6640_v16 = vmov 0  ;;  %v3120_v52 = vld [vmem:[#allocation2 + $0x240] sm:$0xf] }
  0xd5   : > { %v4713_v38 = vpop.permute.xlu1 %406  ;;  %v6643_v54 = vmov 0 }
  0xd6   : > { %6626 = vst [vmem:[#allocation38_spill] sm:$0xff] %v4713_v38  ;;  %vm486_vm9 = vcmp.eq.s32.totalorder %v4130_v55, %v4713_v38  ;;  %vm487_vm8 = vcmp.eq.s32.totalorder %v4138_v56, %v4713_v38  ;;  %vm488_vm2 = vcmp.eq.s32.totalorder %v4141_v60, %v4713_v38  ;;  %1582 = vmatpush.bf16.msrb.mxu3 %v3025_v62  ;;  %v6664_v38 = vmov 0 }
  0xd7   : > { %vm4739_vm3 = vmor %vm6630_vm4, %vm486_vm9  ;;  %vm6635_vm9 = vcmp.eq.s32.totalorder %v4138_v56, %v4575_v47  ;;  %v3670_v47 = vld [vmem:[#allocation2 + $0x214] sm:$0xf0] }
  0xd8   : > { %v6632_v61 = vsel %vm4739_vm3, 4294967295, %v6631_v61  ;;  %vm6369_vm0 = vmpackc.low %vm4739_vm3, %vm4664_vm13  ;;  %1626 = vmatpush.bf16.msrb.mxu0 %v3129_v40  ;;  %vm437_vm13 = vcmp.eq.s32.totalorder %v4403_v9, %v4391_v4  ;;  %v3676_v40 = vld [vmem:[#allocation2 + $0x244] sm:$0xf0] }
  0xd9   : > { %6633 = vst [vmem:[#allocation39_spill] sm:$0xff] %v6632_v61  ;;  %3225 = vmatmul.msk.bf16.gmra.mxu3 %vm6369_vm0, %v6634_v15  ;;  %vm4760_vm4 = vmor %vm6635_vm9, %vm487_vm8  ;;  %vm443_vm9 = vcmp.eq.s32.totalorder %v4403_v9, %v4454_v28  ;;  %v3121_v18 = vor.u32 %v3676_v40, %v3120_v52  ;;  %v3112_v52 = vld [vmem:[#allocation2 + $0x230] sm:$0xf]  ;;  %v6651_v40 = vmov 0  ;;  %v6655_v61 = vmov 0 }
  0xda   : > { %v6637_v6 = vsel %vm4760_vm4, 4294967295, %v6636_v6  ;;  %vm6371_vm10 = vmpackc.low %vm4760_vm4, %vm4678_vm12  ;;  %v3113_v27 = vor.u32 %v3674_v3, %v3112_v52  ;;  %v3672_v52 = vld [vmem:[#allocation2 + $0x224] sm:$0xf0] }
  0xdb   : > { %6638 = vst [vmem:[#allocation40_spill] sm:$0xff] %v6637_v6  ;;  %3241 = vmatmul.msk.bf16.gmra.mxu1 %vm6371_vm10, %v6634_v15  ;;  %vm4778_vm8 = vmor %vm344_vm14, %vm488_vm2  ;;  %vm492_vm2 = vcmp.eq.s32.totalorder %v4130_v55, %v4764_v59  ;;  %vm299_vm10 = vcmp.eq.s32.totalorder %v4403_v9, %v4281_v35  ;;  %v6646_v6 = vmov 0  ;;  %v3105_v62 = vor.u32 %v3672_v52, %v3104_v19  ;;  %v2954_v19 = vld [vmem:[#allocation2 + $0xf8] sm:$0xf0] }
  0xdc   : > { %v6641_v16 = vsel %vm4778_vm8, 4294967295, %v6640_v16  ;;  %vm6375_vm0 = vmpackc.low %vm4778_vm8, %vm4692_vm6  ;;  %1627 = vmatpush.bf16.msrb.mxu0 %v3121_v18  ;;  %v2834_v18 = vld [vmem:[#allocation2 + $0x8] sm:$0xf0]  ;;  %vm6659_vm8 = vcmp.eq.s32.totalorder %v4141_v60, %v4659_v63  ;;  %v3146_v52 = vld [vmem:[#allocation2 + $0x278] sm:$0xf0] }
  0xdd   : > { %6642 = vst [vmem:[#allocation42_spill] sm:$0xff] %v6641_v16  ;;  %3257 = vmatmul.msk.bf16.gmra.mxu2 %vm6375_vm0, %v6634_v15  ;;  %vm4802_vm12 = vmor %vm293_vm15, %vm437_vm13  ;;  %vm6654_vm13 = vcmp.eq.s32.totalorder %v4138_v56, %v4659_v63  ;;  %v2837_v3 = vor.u32 %v3603_v45, %v2834_v18  ;;  %v6667_v45 = vmov 0 }
  0xde   : > { %v6644_v54 = vsel %vm4802_vm12, 4294967295, %v6643_v54  ;;  %v4806_v16 = vpop.permute.xlu1 %268  ;;  %vm4812_vm6 = vmor %vm299_vm10, %vm443_vm9  ;;  %vm6650_vm9 = vcmp.eq.s32.totalorder %v4130_v55, %v4659_v63  ;;  %vm6653_vm10 = vcmp.eq.s32.totalorder %v4138_v56, %v4764_v59  ;;  %v6671_v63 = vmov 0 }
  0xdf   : > { %6645 = vst [vmem:[#allocation43_spill] sm:$0xff] %v6644_v54  ;;  %v6647_v6 = vsel %vm4812_vm6, 4294967295, %v6646_v6  ;;  %vm6649_vm15 = vmpackc.low %vm4655_vm7, %vm4645_vm5  ;;  %1729 = vmatpush.bf16.msrb.mxu2 %v2837_v3  ;;  %v3681_v3 = vld [vmem:[#allocation2 + $0x274] sm:$0xf] }
  0xe0   : > { %6648 = vst [vmem:[#allocation44_spill] sm:$0xff] %v6647_v6  ;;  %3233 = vmatmul.msk.bf16.gmra.mxu0 %vm6649_vm15, %v6634_v15  ;;  %vm4834_vm14 = vmor %vm6650_vm9, %vm492_vm2  ;;  %vm498_vm2 = vcmp.eq.s32.totalorder %v4130_v55, %v4838_v53  ;;  %vm6658_vm15 = vcmp.eq.s32.totalorder %v4141_v60, %v4764_v59  ;;  %vm499_vm9 = vcmp.eq.s32.totalorder %v4138_v56, %v4838_v53  ;;  %v3684_v59 = vld [vmem:[#allocation2 + $0x284] sm:$0xf0]  ;;  %v6773_v6 = vld [vmem:[#allocation27_spill] sm:$0xff] }
  0xe1   : > { %v6652_v40 = vsel %vm4834_vm14, 4294967295, %v6651_v40  ;;  %vm4848_vm0 = vmor %vm6654_vm13, %vm6653_vm10  ;;  %vm6663_vm13 = vcmp.eq.s32.totalorder %v4130_v55, %v4806_v16  ;;  %1628 = vmatpush.bf16.msrb.mxu0 %v3113_v27  ;;  %v3153_v18 = vor.u32 %v3684_v59, %v3152_v51  ;;  %v6674_v27 = vmov 0 }
  0xe2   : > { %v6656_v61 = vsel %vm4848_vm0, 4294967295, %v6655_v61  ;;  %vm4862_vm4 = vmor %vm6659_vm8, %vm6658_vm15  ;;  %vm292_vm8 = vcmp.eq.s32.totalorder %v4419_v7, %v4393_v5  ;;  %vm6666_vm15 = vcmp.eq.s32.totalorder %v4138_v56, %v4806_v16  ;;  %v3096_v5 = vld [vmem:[#allocation2 + $0x210] sm:$0xf] }
  0xe3   : > { %6657 = vst [vmem:[#allocation45_spill] sm:$0xff] %v6656_v61  ;;  %v6661_v34 = vsel %vm4862_vm4, 4294967295, %v6660_v34  ;;  %vm4869_vm10 = vmor %vm6663_vm13, %vm498_vm2  ;;  %vm500_vm2 = vcmp.eq.s32.totalorder %v4141_v60, %v4838_v53  ;;  %vm6670_vm13 = vcmp.eq.s32.totalorder %v4141_v60, %v4806_v16  ;;  %1680 = vmatpush.bf16.msrb.mxu1 %v3153_v18  ;;  %v3097_v51 = vor.u32 %v3670_v47, %v3096_v5  ;;  %v3633_v47 = vld [vmem:[#allocation2 + $0xf4] sm:$0xf]  ;;  %v4949_v18 = vpop.permute.xlu2 %274 }
  0xe4   : > { %6662 = vst [vmem:[#allocation46_spill] sm:$0xff] %v6661_v34  ;;  %v6665_v38 = vsel %vm4869_vm10, 4294967295, %v6664_v38  ;;  %vm4880_vm5 = vmor %vm6666_vm15, %vm499_vm9  ;;  %vm436_vm15 = vcmp.eq.s32.totalorder %v4419_v7, %v4391_v4  ;;  %vm298_vm9 = vcmp.eq.s32.totalorder %v4419_v7, %v4281_v35  ;;  %v6676_v4 = vmov 0  ;;  %v3088_v35 = vld [vmem:[#allocation2 + $0x200] sm:$0xf] }
  0xe5   : > { %v6668_v45 = vsel %vm4880_vm5, 4294967295, %v6667_v45  ;;  %vm4889_vm7 = vmor %vm6670_vm13, %vm500_vm2  ;;  %1629 = vmatpush.bf16.msrb.mxu0 %v3105_v62  ;;  %vm442_vm13 = vcmp.eq.s32.totalorder %v4419_v7, %v4454_v28  ;;  %v3668_v28 = vld [vmem:[#allocation2 + $0x204] sm:$0xf0]  ;;  %v2957_v5 = vor.u32 %v3633_v47, %v2954_v19  ;;  %v3649_v34 = vld [vmem:[#allocation2 + $0x174] sm:$0xf]  ;;  %v6695_v47 = vmov 0 }
  0xe6   : > { %6669 = vst [vmem:[#allocation47_spill] sm:$0xff] %v6668_v45  ;;  %v6672_v63 = vsel %vm4889_vm7, 4294967295, %v6671_v63  ;;  %v4893_v30 = vpop.permute.xlu1 %271  ;;  %vm4901_vm3 = vmor %vm292_vm8, %vm436_vm15  ;;  %v3089_v59 = vor.u32 %v3668_v28, %v3088_v35  ;;  %v3665_v61 = vld [vmem:[#allocation2 + $0x1f4] sm:$0xf]  ;;  %v4957_v35 = vpop.permute.xlu0 %415  ;;  %v3082_v45 = vld [vmem:[#allocation2 + $0x1f8] sm:$0xf0]  ;;  %vm366_vm15 = vcmp.eq.s32.totalorder %v4130_v55, %v4949_v18 }
  0xe7   : > { %6673 = vst [vmem:[#allocation48_spill] sm:$0xff] %v6672_v63  ;;  %v6675_v27 = vsel %vm4901_vm3, 4294967295, %v6674_v27  ;;  %vm6404_vm2 = vmpackc.low %vm4869_vm10, %vm4834_vm14  ;;  %v3018_v63 = vld [vmem:[#allocation2 + $0x178] sm:$0xf0]  ;;  %1771 = vmatpush.bf16.msra.mxu3 %v2957_v5  ;;  %vm505_vm10 = vcmp.eq.s32.totalorder %v4138_v56, %v4957_v35  ;;  %v2946_v19 = vld [vmem:[#allocation2 + $0xe8] sm:$0xf0] }
  0xe8   : > { %vm6406_vm8 = vmpackc.low %vm4880_vm5, %vm4848_vm0  ;;  %v3021_v28 = vor.u32 %v3649_v34, %v3018_v63  ;;  %vm367_vm5 = vcmp.eq.s32.totalorder %v4138_v56, %v4949_v18  ;;  %v6686_v34 = vmov 0  ;;  %v3138_v5 = vld [vmem:[#allocation2 + $0x268] sm:$0xf0] }
  0xe9   : > { %3227 = vmatmul.msk.bf16.gmra.mxu3 %vm6404_vm2, %v6634_v15  ;;  %vm4933_vm2 = vmor %vm298_vm9, %vm442_vm13  ;;  %1630 = vmatpush.bf16.msrb.mxu0 %v3097_v51  ;;  %vm6679_vm9 = vnez %v6541_v42  ;;  %vm6680_vm13 = vnez %v6539_v41  ;;  %v3149_v51 = vor.u32 %v3681_v3, %v3146_v52  ;;  %v3085_v42 = vor.u32 %v3665_v61, %v3082_v45  ;;  %v3679_v3 = vld [vmem:[#allocation2 + $0x264] sm:$0xf] }
  0xea   : > { %v6677_v4 = vsel %vm4933_vm2, 4294967295, %v6676_v4  ;;  %vm6678_vm14 = vmpackc.low %vm4889_vm7, %vm4862_vm4  ;;  %vm504_vm4 = vcmp.eq.s32.totalorder %v4130_v55, %v4957_v35  ;;  %vm361_vm7 = vcmp.eq.s32.totalorder %v4138_v56, %v4893_v30  ;;  %v6692_v45 = vmov 0 }
  0xeb   : > { %3243 = vmatmul.msk.bf16.gmra.mxu1 %vm6406_vm8, %v6634_v15  ;;  %vm6681_vm8 = vmpackc.low %vm6679_vm9, %vm6680_vm13  ;;  %1918 = vmatpush.bf16.msra.mxu2 %v3149_v51  ;;  %v3141_v51 = vor.u32 %v3679_v3, %v3138_v5  ;;  %v3002_v3 = vld [vmem:[#allocation2 + $0x158] sm:$0xf0] }
  0xec   : > { %1869 = vmatpush.bf16.msra.mxu1 %v3085_v42  ;;  %vm4983_vm3 = vmor %vm361_vm7, %vm505_vm10  ;;  %v6689_v42 = vmov 0  ;;  %vm362_vm7 = vcmp.eq.s32.totalorder %v4141_v60, %v4893_v30 }
  0xed   : > { %3259 = vmatmul.msk.bf16.gmra.mxu2 %vm6678_vm14, %v6634_v15  ;;  %1631 = vmatpush.bf16.msrb.mxu0 %v3089_v59  ;;  %vm360_vm14 = vcmp.eq.s32.totalorder %v4130_v55, %v4893_v30  ;;  %v6687_v34 = vsel %vm4983_vm3, 4294967295, %v6686_v34  ;;  %v3631_v59 = vld [vmem:[#allocation2 + $0xe4] sm:$0xf] }
  0xee   : > { %vm4969_vm0 = vmor %vm360_vm14, %vm504_vm4  ;;  %6688 = vst [vmem:[#allocation49_spill] sm:$0xff] %v6687_v34  ;;  %vm368_vm4 = vcmp.eq.s32.totalorder %v4141_v60, %v4949_v18  ;;  %v2949_v52 = vor.u32 %v3631_v59, %v2946_v19  ;;  %v3645_v19 = vld [vmem:[#allocation2 + $0x154] sm:$0xf]  ;;  %v3667_v34 = vld [vmem:[#allocation2 + $0x204] sm:$0xf] }
  0xef   : > { %v4947_v62 = vpop.permute.xlu1 %418  ;;  %1919 = vmatpush.bf16.msra.mxu2 %v3141_v51 }
  0xf0   : > { %3247 = vmatmul.msk.bf16.vlgmr.msra.gmra.mxu0 %vm6681_vm8, %v6634_v15  ;;  %vm510_vm8 = vcmp.eq.s32.totalorder %v4130_v55, %v4947_v62  ;;  %vm511_vm13 = vcmp.eq.s32.totalorder %v4138_v56, %v4947_v62  ;;  %vm512_vm14 = vcmp.eq.s32.totalorder %v4141_v60, %v4947_v62  ;;  %v3010_v55 = vld [vmem:[#allocation2 + $0x168] sm:$0xf0]  ;;  %1772 = vmatpush.bf16.msra.mxu3 %v2949_v52  ;;  %v3066_v52 = vld [vmem:[#allocation2 + $0x1d8] sm:$0xf0] }
  0xf1   : > { %1820 = vmatpush.bf16.msra.mxu0 %v3021_v28  ;;  %vm4977_vm9 = vmor %vm366_vm15, %vm510_vm8  ;;  %v3647_v28 = vld [vmem:[#allocation2 + $0x164] sm:$0xf] }
  0xf2   : > { %vm4991_vm2 = vmor %vm367_vm5, %vm511_vm13  ;;  %vm506_vm13 = vcmp.eq.s32.totalorder %v4141_v60, %v4957_v35  ;;  %v3663_v60 = vld [vmem:[#allocation2 + $0x1e4] sm:$0xf]  ;;  %v3013_v56 = vor.u32 %v3647_v28, %v3010_v55  ;;  %v3629_v55 = vld [vmem:[#allocation2 + $0xd4] sm:$0xf] }
  0xf3   : > { %v6690_v42 = vsel %vm4991_vm2, 4294967295, %v6689_v42  ;;  %vm6431_vm15 = vmpackc.low %vm4977_vm9, %vm4969_vm0  ;;  %v3627_v28 = vld [vmem:[#allocation2 + $0xc4] sm:$0xf] }
  0xf4   : > { %6691 = vst [vmem:[#allocation50_spill] sm:$0xff] %v6690_v42  ;;  %vm5007_vm10 = vmor %vm368_vm4, %vm512_vm14  ;;  %vm6698_vm14 = vnez %v6556_v10  ;;  %v3830_v42 = vld [vmem:[%s4036_s8] sm:$0xff] }
  0xf5   : > { %v6693_v45 = vsel %vm5007_vm10, 4294967295, %v6692_v45  ;;  %vm6430_vm5 = vmpackc.low %vm4991_vm2, %vm4983_vm3  ;;  %1821 = vmatpush.bf16.msra.mxu0 %v3013_v56  ;;  %vm6707_vm3 = vnez %v6527_v32  ;;  %v2938_v56 = vld [vmem:[#allocation2 + $0xd8] sm:$0xf0]  ;;  %v3005_v32 = vor.u32 %v3645_v19, %v3002_v3 }
  0xf6   : > { %6694 = vst [vmem:[#allocation51_spill] sm:$0xff] %v6693_v45  ;;  %vm5023_vm8 = vmor %vm362_vm7, %vm506_vm13  ;;  %vm6700_vm13 = vnez %v6554_v8  ;;  %v3720_v8 = vld [vmem:[%s6299_s2 + $0xa8] sm:$0xff] }
  0xf7   : > { %v6696_v47 = vsel %vm5023_vm8, 4294967295, %v6695_v47  ;;  %vm6429_vm4 = vmpackc.low %vm5007_vm10, %vm5023_vm8  ;;  %vm6706_vm10 = vnez %v6529_v33  ;;  %v3661_v33 = vld [vmem:[#allocation2 + $0x1d4] sm:$0xf] }
  0xf8   : > { %6697 = vst [vmem:[#allocation52_spill] sm:$0xff] %v6696_v47  ;;  %vm6699_vm7 = vmpackc.low %vm4548_vm1, %vm6698_vm14  ;;  %v3074_v47 = vld [vmem:[#allocation2 + $0x1e8] sm:$0xf0]  ;;  %vm6710_vm14 = vnez %v6564_v26  ;;  %v3069_v5 = vor.u32 %v3661_v33, %v3066_v52 }
  0xf9   : > { %3229 = vmatmul.msk.bf16.gmra.mxu3 %vm6431_vm15, %v6634_v15  ;;  %v3077_v45 = vor.u32 %v3663_v60, %v3074_v47  ;;  %vm6704_vm15 = vnez %v6558_v22  ;;  %vm6708_vm2 = vmpackc.low %vm6706_vm10, %vm6707_vm3  ;;  %v3677_v60 = vld [vmem:[#allocation2 + $0x254] sm:$0xf]  ;;  %v3130_v47 = vld [vmem:[#allocation2 + $0x258] sm:$0xf0]  ;;  %1822 = vmatpush.bf16.msra.mxu0 %v3005_v32  ;;  %vm6712_vm3 = vnez %v6625_v21  ;;  %vm6715_vm10 = vnez %v6568_v44 }
  0xfa   : > { %v3133_v59 = vor.u32 %v3677_v60, %v3130_v47  ;;  %v3643_v47 = vld [vmem:[#allocation2 + $0x144] sm:$0xf]  ;;  %v3058_v33 = vld [vmem:[#allocation2 + $0x1c8] sm:$0xf0]  ;;  %v6775_v22 = vld [vmem:[#allocation31_spill] sm:$0xff] }
  0xfb   : > { %3245 = vmatmul.msk.bf16.gmra.mxu1 %vm6430_vm5, %v6634_v15 }
  0xfc   : > { %1870 = vmatpush.bf16.msra.mxu1 %v3077_v45  ;;  %v2941_v45 = vor.u32 %v3629_v55, %v2938_v56  ;;  %1920 = vmatpush.bf16.msra.mxu2 %v3133_v59  ;;  %v2930_v55 = vld [vmem:[#allocation2 + $0xc8] sm:$0xf0]  ;;  %v3675_v56 = vld [vmem:[#allocation2 + $0x244] sm:$0xf] }
  0xfd   : > { %3261 = vmatmul.msk.bf16.gmra.mxu2 %vm6429_vm4, %v6634_v15  ;;  %vm6701_vm4 = vnez %v6544_v50  ;;  %v2933_v60 = vor.u32 %v3627_v28, %v2930_v55  ;;  %v2994_v59 = vld [vmem:[#allocation2 + $0x148] sm:$0xf0]  ;;  %v6721_v55 = vmov 0 }
  0xfe   : > { %vm6702_vm5 = vmpackc.low %vm6700_vm13, %vm6701_vm4  ;;  %1773 = vmatpush.bf16.msra.mxu3 %v2941_v45  ;;  %v3122_v45 = vld [vmem:[#allocation2 + $0x248] sm:$0xf0]  ;;  %v2997_v3 = vor.u32 %v3643_v47, %v2994_v59  ;;  %v6728_v59 = vmov 0 }
  0xff   : > { %v3125_v44 = vor.u32 %v3675_v56, %v3122_v45  ;;  %v6723_v56 = vmov 0 }
 0x100   : > { %3249 = vmatmul.msk.bf16.gmra.mxu0 %vm6699_vm7, %v6634_v15  ;;  %vm6703_vm7 = vnez %v6561_v23  ;;  %1871 = vmatpush.bf16.msra.mxu1 %v3069_v5  ;;  %v2898_v23 = vld [vmem:[#allocation2 + $0x88] sm:$0xf0] }
 0x101   : > { %vm6705_vm8 = vmpackc.low %vm6703_vm7, %vm6704_vm15  ;;  %vm6719_vm7 = vnez %v6675_v27  ;;  %1921 = vmatpush.bf16.msra.mxu2 %v3125_v44  ;;  %1823 = vmatpush.bf16.msra.mxu0 %v2997_v3  ;;  %v3673_v3 = vld [vmem:[#allocation2 + $0x234] sm:$0xf] }
 0x102   : > { %1774 = vmatpush.bf16.msra.mxu3 %v2933_v60  ;;  %v6725_v60 = vmov 0 }
 0x109   : > { %3263 = vmatmul.msk.bf16.vlgmr.msrb.gmra.mxu3 %vm6702_vm5, %v6634_v15  ;;  %vm6709_vm5 = vnez %v6591_v25 }
 0x10a   : > { %vm6711_vm1 = vmpackc.low %vm6709_vm5, %vm6710_vm14  ;;  %vm448_vm5 = vcmp.eq.s32.totalorder %v4419_v7, %v4135_v46 }
 0x10b   : > { %3295 = vmatmul.msk.bf16.vlgmr.msrb.gmra.mxu1 %vm6705_vm8, %v6634_v15  ;;  %vm6716_vm8 = vnez %v6566_v31  ;;  %v3659_v31 = vld [vmem:[#allocation2 + $0x1c4] sm:$0xf] }
 0x10c   : > { %vm6717_vm15 = vmpackc.low %vm6715_vm10, %vm6716_vm8  ;;  %v3061_v52 = vor.u32 %v3659_v31, %v3058_v33  ;;  %vm447_vm10 = vcmp.eq.s32.totalorder %v4291_v36, %v4135_v46  ;;  %vm311_vm8 = vcmp.eq.s32.totalorder %v4403_v9, %v4154_v11  ;;  %v3114_v33 = vld [vmem:[#allocation2 + $0x238] sm:$0xf0] }
 0x10d   : > { %3311 = vmatmul.msk.bf16.vlgmr.msrb.gmra.mxu2 %vm6708_vm2, %v6634_v15  ;;  %vm6713_vm2 = vmpackc.low %vm4720_vm11, %vm6712_vm3  ;;  %vm449_vm11 = vcmp.eq.s32.totalorder %v4403_v9, %v4135_v46 }
 0x10e   : > { %1872 = vmatpush.bf16.msra.mxu1 %v3061_v52  ;;  %v2986_v52 = vld [vmem:[#allocation2 + $0x138] sm:$0xf0] }
 0x110   : > { %3279 = vmatmul.msk.bf16.vlgmr.msrb.gmra.mxu0 %vm6711_vm1, %v6634_v15  ;;  %vm6714_vm1 = vmpackc.low %vm4812_vm6, %vm4802_vm12  ;;  %vm455_vm12 = vcmp.eq.s32.totalorder %v4403_v9, %v4172_v13 }
 0x111   : > { %vm5117_vm14 = vmor %vm311_vm8, %vm455_vm12  ;;  %vm304_vm8 = vcmp.eq.s32.totalorder %v4419_v7, %v4133_v37 }
 0x112   : > { %v6726_v60 = vsel %vm5117_vm14, 4294967295, %v6725_v60 }
 0x113   : > { %6727 = vst [vmem:[#allocation53_spill] sm:$0xff] %v6726_v60 }
 0x119   : > { %3265 = vmatmul.msk.bf16.gmra.mxu3 %vm6713_vm2, %v6634_v15  ;;  %vm6718_vm2 = vnez %v6677_v4 }
 0x11a   : > { %vm6720_vm3 = vmpackc.low %vm6718_vm2, %vm6719_vm7  ;;  %vm305_vm2 = vcmp.eq.s32.totalorder %v4403_v9, %v4133_v37 }
 0x11b   : > { %3297 = vmatmul.msk.bf16.gmra.mxu1 %vm6714_vm1, %v6634_v15  ;;  %vm453_vm1 = vcmp.eq.s32.totalorder %v4291_v36, %v4172_v13  ;;  %vm5135_vm12 = vmor %vm305_vm2, %vm449_vm11  ;;  %vm6733_vm2 = vnez %v6519_v17  ;;  %v2922_v17 = vld [vmem:[#allocation2 + $0xb8] sm:$0xf0] }
 0x11c   : > { %v1496_v51 = vpop.f32.mrf.mxu1  ;;  %v6729_v59 = vsel %vm5135_vm12, 4294967295, %v6728_v59 }
 0x11d   : > { %3313 = vmatmul.msk.bf16.gmra.mxu2 %vm6717_vm15, %v6634_v15  ;;  %vm309_vm15 = vcmp.eq.s32.totalorder %v4291_v36, %v4154_v11  ;;  %6730 = vst [vmem:[#allocation54_spill] sm:$0xff] %v6729_v59 }
 0x11e   : > { %vm5105_vm6 = vmor %vm309_vm15, %vm453_vm1  ;;  %vm310_vm1 = vcmp.eq.s32.totalorder %v4419_v7, %v4154_v11  ;;  %v6731_v11 = vmov 0 }
 0x11f   : > { %v6722_v55 = vsel %vm5105_vm6, 4294967295, %v6721_v55 }
 0x120   : > { %3281 = vmatmul.msk.bf16.gmra.mxu0 %vm6720_vm3, %v6634_v15  ;;  %v1447_v19 = vpop.f32.mrf.mxu3  ;;  %vm303_vm3 = vcmp.eq.s32.totalorder %v4291_v36, %v4133_v37  ;;  %v6736_v37 = vmov 0 }
 0x121   : > { %v1497_v32 = vadd.f32 %v1496_v51, %v1447_v19  ;;  %vm5109_vm7 = vmor %vm303_vm3, %vm447_vm10  ;;  %vm454_vm3 = vcmp.eq.s32.totalorder %v4419_v7, %v4172_v13 }
 0x122   : > { %v6724_v56 = vsel %vm5109_vm7, 4294967295, %v6723_v56  ;;  %vm6440_vm15 = vmpackc.low %vm5105_vm6, %vm5109_vm7  ;;  %v5139_v19 = vpop.f32.mrf.mxu0 }
 0x123   : > { %vm6445_vm10 = vmpackc.low %vm5117_vm14, %vm5135_vm12  ;;  %vm317_vm12 = vcmp.eq.s32.totalorder %v4403_v9, %v4143_v2  ;;  %vm461_vm14 = vcmp.eq.s32.totalorder %v4403_v9, %v4211_v20 }
 0x124   : > { %v1545_v5 = vpop.f32.mrf.mxu2  ;;  %v1498_v28 = vpop.f32.mrf.mxu1  ;;  %vm5155_vm11 = vmor %vm310_vm1, %vm454_vm3  ;;  %vm459_vm3 = vcmp.eq.s32.totalorder %v4291_v36, %v4211_v20 }
 0x125   : > { %v5103_v51 = vadd.f32 %v1545_v5, %v1497_v32  ;;  %v6732_v11 = vsel %vm5155_vm11, 4294967295, %v6731_v11  ;;  %vm5167_vm6 = vmor %vm304_vm8, %vm448_vm5  ;;  %v3641_v32 = vld [vmem:[#allocation2 + $0x134] sm:$0xf]  ;;  %vm465_vm5 = vcmp.eq.s32.totalorder %v4291_v36, %v4299_v39  ;;  %vm323_vm8 = vcmp.eq.s32.totalorder %v4403_v9, %v4319_v43 }
 0x126   : > { %v6737_v37 = vsel %vm5167_vm6, 4294967295, %v6736_v37  ;;  %vm6446_vm1 = vmpackc.low %vm5155_vm11, %vm5167_vm6 }
 0x128   : > { %v1449_v45 = vpop.f32.mrf.mxu3 }
 0x129   : > { %v1499_v47 = vadd.f32 %v1498_v28, %v1449_v45  ;;  %3267 = vmatmul.msk.bf16.gmra.mxu3 %vm6440_vm15, %v6634_v15  ;;  %vm6734_vm15 = vnez %v6511_v12  ;;  %v3625_v12 = vld [vmem:[#allocation2 + $0xb4] sm:$0xf]  ;;  %v3117_v28 = vor.u32 %v3673_v3, %v3114_v33  ;;  %v2989_v45 = vor.u32 %v3641_v32, %v2986_v52 }
 0x12a   : > { %vm6735_vm7 = vmpackc.low %vm6733_vm2, %vm6734_vm15  ;;  %v2925_v31 = vor.u32 %v3625_v12, %v2922_v17  ;;  %vm315_vm15 = vcmp.eq.s32.totalorder %v4291_v36, %v4143_v2  ;;  %v5189_v12 = vpop.f32.mrf.mxu0  ;;  %vm467_vm2 = vcmp.eq.s32.totalorder %v4403_v9, %v4299_v39  ;;  %v6738_v17 = vmov 0 }
 0x12b   : > { %3299 = vmatmul.msk.bf16.gmra.mxu1 %vm6445_vm10, %v6634_v15  ;;  %1922 = vmatpush.bf16.msra.mxu2 %v3117_v28  ;;  %vm5209_vm6 = vmor %vm323_vm8, %vm467_vm2  ;;  %v6742_v33 = vmov 0  ;;  %v6745_v32 = vmov 0  ;;  %vm316_vm8 = vcmp.eq.s32.totalorder %v4419_v7, %v4143_v2  ;;  %vm460_vm2 = vcmp.eq.s32.totalorder %v4419_v7, %v4211_v20  ;;  %v2914_v28 = vld [vmem:[#allocation2 + $0xa8] sm:$0xf0] }
 0x12c   : > { %v1547_v13 = vpop.f32.mrf.mxu2  ;;  %1775 = vmatpush.bf16.msra.mxu3 %v2925_v31  ;;  %1824 = vmatpush.bf16.msra.mxu0 %v2989_v45  ;;  %v6740_v31 = vmov 0  ;;  %v6743_v33 = vsel %vm5209_vm6, 4294967295, %v6742_v33  ;;  %v6750_v20 = vmov 0  ;;  %v3671_v45 = vld [vmem:[#allocation2 + $0x224] sm:$0xf] }
 0x12d   : > { %v5159_v44 = vadd.f32 %v1547_v13, %v1499_v47  ;;  %3315 = vmatmul.msk.bf16.gmra.mxu2 %vm6735_vm7, %v6634_v15  ;;  %v1501_v46 = vpop.f32.mrf.mxu1  ;;  %v3657_v47 = vld [vmem:[#allocation2 + $0x1b4] sm:$0xf]  ;;  %v3050_v13 = vld [vmem:[#allocation2 + $0x1b8] sm:$0xf0]  ;;  %vm321_vm7 = vcmp.eq.s32.totalorder %v4291_v36, %v4319_v43  ;;  %6744 = vst [vmem:[#allocation55_spill] sm:$0xff] %v6743_v33 }
 0x12e   : > { %v3053_v60 = vor.u32 %v3657_v47, %v3050_v13  ;;  %vm5195_vm10 = vmor %vm321_vm7, %vm465_vm5  ;;  %vm322_vm5 = vcmp.eq.s32.totalorder %v4419_v7, %v4319_v43  ;;  %v6748_v43 = vmov 0  ;;  %v3653_v33 = vld [vmem:[#allocation2 + $0x194] sm:$0xf] }
 0x12f   : > { %v6739_v17 = vsel %vm5195_vm10, 4294967295, %v6738_v17 }
 0x130   : > { %3283 = vmatmul.msk.bf16.gmra.mxu0 %vm6446_vm1, %v6634_v15  ;;  %1873 = vmatpush.bf16.msra.mxu1 %v3053_v60  ;;  %vm5201_vm1 = vmor %vm315_vm15, %vm459_vm3  ;;  %vm466_vm15 = vcmp.eq.s32.totalorder %v4419_v7, %v4299_v39 }
 0x131   : > { %v1452_v5 = vpop.f32.mrf.mxu3  ;;  %v6741_v31 = vsel %vm5201_vm1, 4294967295, %v6740_v31  ;;  %vm6451_vm7 = vmpackc.low %vm5195_vm10, %vm5201_vm1  ;;  %vm6753_vm1 = vnez %v6531_v0 }
 0x132   : > { %v1502_v59 = vadd.f32 %v1501_v46, %v1452_v5  ;;  %vm5227_vm3 = vmor %vm317_vm12, %vm461_vm14  ;;  %v3623_v5 = vld [vmem:[#allocation2 + $0xa4] sm:$0xf] }
 0x133   : > { %v6746_v32 = vsel %vm5227_vm3, 4294967295, %v6745_v32  ;;  %vm6454_vm11 = vmpackc.low %vm5209_vm6, %vm5227_vm3  ;;  %v2917_v13 = vor.u32 %v3623_v5, %v2914_v28  ;;  %v6755_v5 = vmov 0 }
 0x134   : > { %6747 = vst [vmem:[#allocation56_spill] sm:$0xff] %v6746_v32  ;;  %vm5245_vm14 = vmor %vm322_vm5, %vm466_vm15  ;;  %vm327_vm15 = vcmp.eq.s32.totalorder %v4291_v36, %v4377_v57 }
 0x135   : > { %v1550_v46 = vpop.f32.mrf.mxu2  ;;  %v1503_v60 = vpop.f32.mrf.mxu1  ;;  %v6749_v43 = vsel %vm5245_vm14, 4294967295, %v6748_v43  ;;  %vm5251_vm12 = vmor %vm316_vm8, %vm460_vm2  ;;  %1776 = vmatpush.bf16.msra.mxu3 %v2917_v13  ;;  %vm473_vm8 = vcmp.eq.s32.totalorder %v4403_v9, %v4552_v48  ;;  %v6757_v13 = vmov 0 }
 0x136   : > { %v5199_v3 = vadd.f32 %v1550_v46, %v1502_v59  ;;  %v6751_v20 = vsel %vm5251_vm12, 4294967295, %v6750_v20  ;;  %vm6455_vm5 = vmpackc.low %vm5245_vm14, %vm5251_vm12  ;;  %v3106_v46 = vld [vmem:[#allocation2 + $0x228] sm:$0xf0] }
 0x137   : > { %v3109_v0 = vor.u32 %v3671_v45, %v3106_v46  ;;  %v6759_v46 = vmov 0 }
 0x139   : > { %v1454_v59 = vpop.f32.mrf.mxu3  ;;  %3269 = vmatmul.msk.bf16.gmra.mxu3 %vm6451_vm7, %v6634_v15  ;;  %vm6752_vm7 = vnez %v6546_v49  ;;  %1923 = vmatpush.bf16.msra.mxu2 %v3109_v0  ;;  %v3639_v49 = vld [vmem:[#allocation2 + $0x124] sm:$0xf] }
 0x13a   : > { %v1504_v39 = vadd.f32 %v1503_v60, %v1454_v59  ;;  %vm6754_vm10 = vmpackc.low %vm6752_vm7, %vm6753_vm1  ;;  %vm333_vm1 = vcmp.eq.s32.totalorder %v4291_v36, %v4458_v29  ;;  %vm477_vm7 = vcmp.eq.s32.totalorder %v4291_v36, %v4448_v14  ;;  %v2978_v60 = vld [vmem:[#allocation2 + $0x128] sm:$0xf0]  ;;  %v3655_v59 = vld [vmem:[#allocation2 + $0x1a4] sm:$0xf] }
 0x13b   : > { %3301 = vmatmul.msk.bf16.gmra.mxu1 %vm6454_vm11, %v6634_v15  ;;  %vm335_vm11 = vcmp.eq.s32.totalorder %v4403_v9, %v4458_v29  ;;  %vm5296_vm3 = vmor %vm333_vm1, %vm477_vm7  ;;  %vm472_vm1 = vcmp.eq.s32.totalorder %v4419_v7, %v4552_v48 }
 0x13c   : > { %v5249_v2 = vpop.f32.mrf.mxu0  ;;  %v6758_v13 = vsel %vm5296_vm3, 4294967295, %v6757_v13 }
 0x13d   : > { %v1552_v52 = vpop.f32.mrf.mxu2  ;;  %3317 = vmatmul.msk.bf16.gmra.mxu2 %vm6754_vm10, %v6634_v15  ;;  %vm471_vm10 = vcmp.eq.s32.totalorder %v4291_v36, %v4552_v48 }
 0x13e   : > { %v5261_v47 = vadd.f32 %v1552_v52, %v1504_v39  ;;  %v2981_v39 = vor.u32 %v3639_v49, %v2978_v60  ;;  %v3042_v52 = vld [vmem:[#allocation2 + $0x1a8] sm:$0xf0]  ;;  %vm5283_vm2 = vmor %vm327_vm15, %vm471_vm10  ;;  %vm329_vm10 = vcmp.eq.s32.totalorder %v4403_v9, %v4377_v57  ;;  %v6762_v49 = vmov 0 }
 0x13f   : > { %v6756_v5 = vsel %vm5283_vm2, 4294967295, %v6755_v5  ;;  %v3045_v28 = vor.u32 %v3655_v59, %v3042_v52  ;;  %vm5302_vm15 = vmor %vm329_vm10, %vm473_vm8  ;;  %vm334_vm8 = vcmp.eq.s32.totalorder %v4419_v7, %v4458_v29  ;;  %vm478_vm10 = vcmp.eq.s32.totalorder %v4419_v7, %v4448_v14  ;;  %v3621_v52 = vld [vmem:[#allocation2 + $0x94] sm:$0xf] }
 0x140   : > { %3285 = vmatmul.msk.bf16.gmra.mxu0 %vm6455_vm5, %v6634_v15  ;;  %vm479_vm5 = vcmp.eq.s32.totalorder %v4403_v9, %v4448_v14  ;;  %v6760_v46 = vsel %vm5302_vm15, 4294967295, %v6759_v46  ;;  %vm6459_vm7 = vmpackc.low %vm5296_vm3, %vm5283_vm2  ;;  %v6765_v29 = vmov 0  ;;  %v6767_v60 = vmov 0 }
 0x141   : > { %1825 = vmatpush.bf16.msra.mxu0 %v2981_v39  ;;  %6761 = vst [vmem:[#allocation57_spill] sm:$0xff] %v6760_v46  ;;  %1874 = vmatpush.bf16.msra.mxu1 %v3045_v28  ;;  %vm5306_vm6 = vmor %vm335_vm11, %vm479_vm5  ;;  %vm328_vm5 = vcmp.eq.s32.totalorder %v4419_v7, %v4377_v57  ;;  %vm6769_vm2 = vnez %v6570_v58  ;;  %v6770_v57 = vld [vmem:[#allocation26_spill] sm:$0xff]  ;;  %v2906_v28 = vld [vmem:[#allocation2 + $0x98] sm:$0xf0] }
 0x142   : > { %v6763_v49 = vsel %vm5306_vm6, 4294967295, %v6762_v49  ;;  %vm6468_vm11 = vmpackc.low %vm5306_vm6, %vm5302_vm15  ;;  %v3669_v46 = vld [vmem:[#allocation2 + $0x214] sm:$0xf] }
 0x143   : > { %6764 = vst [vmem:[#allocation58_spill] sm:$0xff] %v6763_v49  ;;  %vm5332_vm12 = vmor %vm328_vm5, %vm472_vm1  ;;  %vm6771_vm1 = vnez %v6770_v57  ;;  %v2970_v57 = vld [vmem:[#allocation2 + $0x118] sm:$0xf0] }
 0x144   : > { %v5291_v45 = vpop.f32.mrf.mxu0  ;;  %v6766_v29 = vsel %vm5332_vm12, 4294967295, %v6765_v29  ;;  %vm6772_vm5 = vmpackc.low %vm6769_vm2, %vm6771_vm1  ;;  %vm345_vm2 = vcmp.eq.s32.totalorder %v4291_v36, %v6773_v6  ;;  %vm339_vm1 = vcmp.eq.s32.totalorder %v4291_v36, %v6775_v22 }
 0x147   : > { %v1506_v0 = vpop.f32.mrf.mxu1 }
 0x149   : > { %3271 = vmatmul.msk.bf16.gmra.mxu3 %vm6459_vm7, %v6634_v15  ;;  %vm5342_vm7 = vmor %vm334_vm8, %vm478_vm10 }
 0x14a   : > { %v6768_v60 = vsel %vm5342_vm7, 4294967295, %v6767_v60  ;;  %vm6469_vm8 = vmpackc.low %vm5342_vm7, %vm5332_vm12  ;;  %vm341_vm12 = vcmp.eq.s32.totalorder %v4403_v9, %v6775_v22 }
 0x14b   : > { %v1457_v48 = vpop.f32.mrf.mxu3  ;;  %3303 = vmatmul.msk.bf16.gmra.mxu1 %vm6468_vm11, %v6634_v15  ;;  %vm347_vm11 = vcmp.eq.s32.totalorder %v4403_v9, %v6773_v6 }
 0x14c   : > { %v1507_v14 = vadd.f32 %v1506_v0, %v1457_v48  ;;  %v1486_v59 = vpop.f32.mrf.mxu0  ;;  %v2909_v0 = vor.u32 %v3621_v52, %v2906_v28  ;;  %v3098_v48 = vld [vmem:[#allocation2 + $0x218] sm:$0xf0] }
 0x14d   : > { %3319 = vmatmul.msk.bf16.gmra.mxu2 %vm6772_vm5, %v6634_v15  ;;  %v5353_v39 = vadd.f32 %v1486_v59, %v5139_v19  ;;  %v3101_v58 = vor.u32 %v3669_v46, %v3098_v48  ;;  %v3637_v59 = vld [vmem:[#allocation2 + $0x114] sm:$0xf]  ;;  %v3034_v52 = vld [vmem:[#allocation2 + $0x198] sm:$0xf0] }
 0x14e   : > { %1777 = vmatpush.bf16.msra.mxu3 %v2909_v0  ;;  %v6776_v46 = vld [vmem:[#allocation30_spill] sm:$0xff]  ;;  %v3037_v0 = vor.u32 %v3653_v33, %v3034_v52 }
 0x14f   : > { %v1555_v49 = vpop.f32.mrf.mxu2  ;;  %v1508_v19 = vpop.f32.mrf.mxu1  ;;  %1924 = vmatpush.bf16.msra.mxu2 %v3101_v58  ;;  %vm483_vm5 = vcmp.eq.s32.totalorder %v4291_v36, %v6776_v46  ;;  %vm485_vm7 = vcmp.eq.s32.totalorder %v4403_v9, %v6776_v46 }
 0x150   : > { %v5359_v32 = vadd.f32 %v1555_v49, %v1507_v14  ;;  %3287 = vmatmul.msk.bf16.gmra.mxu0 %vm6469_vm8, %v6634_v15  ;;  %v6774_v49 = vld [vmem:[#allocation38_spill] sm:$0xff]  ;;  %v2973_v14 = vor.u32 %v3637_v59, %v2970_v57  ;;  %1875 = vmatpush.bf16.msra.mxu1 %v3037_v0  ;;  %vm5386_vm6 = vmor %vm339_vm1, %vm483_vm5  ;;  %v6779_v59 = vmov 0  ;;  %vm484_vm5 = vcmp.eq.s32.totalorder %v4419_v7, %v6776_v46  ;;  %v3829_v0 = vld [vmem:[%s4036_s8 + $0x8] sm:$0xff] }
 0x151   : > { %vm489_vm10 = vcmp.eq.s32.totalorder %v4291_v36, %v6774_v49  ;;  %vm491_vm8 = vcmp.eq.s32.totalorder %v4403_v9, %v6774_v49  ;;  %v6780_v59 = vsel %vm5386_vm6, 4294967295, %v6779_v59  ;;  %vm490_vm1 = vcmp.eq.s32.totalorder %v4419_v7, %v6774_v49  ;;  %v3828_v49 = vld [vmem:[%s4036_s8 + $0x10] sm:$0xff] }
 0x152   : > { %1826 = vmatpush.bf16.msra.mxu0 %v2973_v14  ;;  %vm5382_vm15 = vmor %vm345_vm2, %vm489_vm10  ;;  %vm346_vm10 = vcmp.eq.s32.totalorder %v4419_v7, %v6773_v6  ;;  %v6784_v14 = vmov 0  ;;  %v3948_v6 = vmov 2   ;;  %v6790_v46 = vmov 0 }
 0x153   : > { %v1459_v54 = vpop.f32.mrf.mxu3  ;;  %vm5396_vm3 = vmor %vm347_vm11, %vm491_vm8  ;;  %vm340_vm8 = vcmp.eq.s32.totalorder %v4419_v7, %v6775_v22  ;;  %3827 = vset.pattern.permute.xlu1 %v3948_v6  ;;  %3826 = vset.pattern.permute.xlu0 %v3948_v6  ;;  %v6787_v22 = vmov 0 }
 0x154   : > { %v1509_v28 = vadd.f32 %v1508_v19, %v1459_v54  ;;  %v1488_v48 = vpop.f32.mrf.mxu0  ;;  %v6777_v54 = vmov 0  ;;  %vm6476_vm2 = vmpackc.low %vm5382_vm15, %vm5386_vm6  ;;  %2023 = vperm.xlu1 %3827, %v3828_v49   ;;  %2020 = vperm.xlu0 %3826, %v3829_v0   ;;  %v3619_v49 = vld [vmem:[#allocation2 + $0x84] sm:$0xf]  ;;  %v3090_v0 = vld [vmem:[#allocation2 + $0x208] sm:$0xf0] }
 0x155   : > { %v5380_v58 = vadd.f32 %v1488_v48, %v5189_v12  ;;  %v6778_v54 = vsel %vm5382_vm15, 4294967295, %v6777_v54  ;;  %v6781_v12 = vmov 0  ;;  %vm5414_vm11 = vmor %vm341_vm12, %vm485_vm7  ;;  %3825 = vset.pattern.permute.xlu2 %v3948_v6  ;;  %v6793_v48 = vld [vmem:[#allocation39_spill] sm:$0xff]  ;;  %v2901_v6 = vor.u32 %v3619_v49, %v2898_v23  ;;  %v3651_v23 = vld [vmem:[#allocation2 + $0x184] sm:$0xf] }
 0x156   : > { %v6782_v12 = vsel %vm5396_vm3, 4294967295, %v6781_v12  ;;  %v6785_v14 = vsel %vm5414_vm11, 4294967295, %v6784_v14  ;;  %vm6477_vm14 = vmpackc.low %vm5396_vm3, %vm5414_vm11  ;;  %2017 = vperm.xlu2 %3825, %v3830_v42   ;;  %v3026_v49 = vld [vmem:[#allocation2 + $0x188] sm:$0xf0]  ;;  %vm502_vm15 = vcmp.eq.s32.totalorder %v4419_v7, %v4838_v53 }
 0x157   : > { %v1557_v19 = vpop.f32.mrf.mxu2  ;;  %6783 = vst [vmem:[#allocation26_spill] sm:$0xff] %v6782_v12  ;;  %vm5432_vm12 = vmor %vm346_vm10, %vm490_vm1  ;;  %1778 = vmatpush.bf16.msra.mxu3 %v2901_v6 }
 0x158   : > { %v5394_v33 = vadd.f32 %v1557_v19, %v1509_v28  ;;  %v1511_v57 = vpop.f32.mrf.mxu1  ;;  %6786 = vst [vmem:[#allocation27_spill] sm:$0xff] %v6785_v14  ;;  %v6788_v22 = vsel %vm5432_vm12, 4294967295, %v6787_v22  ;;  %vm5437_vm7 = vmor %vm340_vm8, %vm484_vm5  ;;  %v6795_v19 = vld [vmem:[#allocation35_spill] sm:$0xff]  ;;  %vm501_vm5 = vcmp.eq.s32.totalorder %v4291_v36, %v4838_v53 }
 0x159   : > { %3273 = vmatmul.msk.bf16.gmra.mxu3 %vm6476_vm2, %v6634_v15  ;;  %6789 = vst [vmem:[#allocation38_spill] sm:$0xff] %v6788_v22  ;;  %v6791_v46 = vsel %vm5437_vm7, 4294967295, %v6790_v46  ;;  %vm6794_vm2 = vnez %v6793_v48  ;;  %vm6485_vm1 = vmpackc.low %vm5432_vm12, %vm5437_vm7  ;;  %v2962_v48 = vld [vmem:[#allocation2 + $0x108] sm:$0xf0] }
 0x15a   : > { %6792 = vst [vmem:[#allocation31_spill] sm:$0xff] %v6791_v46  ;;  %v6798_v46 = vld [vmem:[#allocation34_spill] sm:$0xff]  ;;  %v6799_v22 = vld [vmem:[#allocation41_spill] sm:$0xff] }
 0x15b   : > { %3305 = vmatmul.msk.bf16.gmra.mxu1 %vm6477_vm14, %v6634_v15  ;;  %vm6796_vm14 = vnez %v6795_v19  ;;  %vm495_vm8 = vcmp.eq.s32.totalorder %v4291_v36, %v6799_v22  ;;  %vm353_vm3 = vcmp.eq.s32.totalorder %v4403_v9, %v6798_v46  ;;  %vm496_vm12 = vcmp.eq.s32.totalorder %v4419_v7, %v6799_v22 }
 0x15c   : > { %v1462_v52 = vpop.f32.mrf.mxu3  ;;  %vm6797_vm10 = vmpackc.low %vm6794_vm2, %vm6796_vm14  ;;  %vm357_vm14 = vcmp.eq.s32.totalorder %v4291_v36, %v4806_v16  ;;  %vm351_vm2 = vcmp.eq.s32.totalorder %v4291_v36, %v6798_v46 }
 0x15d   : > { %v1491_v28 = vpop.f32.mrf.mxu0  ;;  %3321 = vmatmul.msk.bf16.gmra.mxu2 %vm6797_vm10, %v6634_v15  ;;  %v1512_v14 = vadd.f32 %v1511_v57, %v1462_v52  ;;  %vm359_vm10 = vcmp.eq.s32.totalorder %v4403_v9, %v4806_v16  ;;  %vm5493_vm11 = vmor %vm351_vm2, %vm495_vm8  ;;  %vm358_vm8 = vcmp.eq.s32.totalorder %v4419_v7, %v4806_v16  ;;  %v6809_v16 = vmov 0 }
 0x15e   : > { %v5449_v12 = vadd.f32 %v1491_v28, %v5249_v2  ;;  %v3093_v2 = vor.u32 %v3667_v34, %v3090_v0  ;;  %v3635_v28 = vld [vmem:[#allocation2 + $0x104] sm:$0xf] }
 0x15f   : > { %v2965_v19 = vor.u32 %v3635_v28, %v2962_v48  ;;  %v3831_v34 = vld [vmem:[%s4036_s8 + $0x20] sm:$0xff]  ;;  %v6935_v48 = vld [vmem:[#allocation46_spill] sm:$0xff] }
 0x160   : > { %3289 = vmatmul.msk.bf16.gmra.mxu0 %vm6485_vm1, %v6634_v15  ;;  %v1560_v57 = vpop.f32.mrf.mxu2  ;;  %v1513_v52 = vpop.f32.mrf.mxu1  ;;  %1925 = vmatpush.bf16.msra.mxu2 %v3093_v2  ;;  %v3832_v2 = vld [vmem:[%s4036_s8 + $0x30] sm:$0xff]  ;;  %vm5482_vm1 = vmor %vm357_vm14, %vm501_vm5  ;;  %vm497_vm14 = vcmp.eq.s32.totalorder %v4403_v9, %v6799_v22  ;;  %vm503_vm5 = vcmp.eq.s32.totalorder %v4403_v9, %v4838_v53  ;;  %v3834_v22 = vld [vmem:[%s4036_s8 + $0x38] sm:$0xff] }
 0x161   : > { %v5462_v42 = vadd.f32 %v1560_v57, %v1512_v14  ;;  %2029 = vperm.xlu1 %3827, %v3831_v34   ;;  %v3029_v14 = vor.u32 %v3651_v23, %v3026_v49  ;;  %2035 = vperm.xlu0 %3826, %v3832_v2   ;;  %v3833_v23 = vld [vmem:[%s4036_s8 + $0x18] sm:$0xff]  ;;  %vm5503_vm7 = vmor %vm359_vm10, %vm503_vm5  ;;  %vm352_vm5 = vcmp.eq.s32.totalorder %v4419_v7, %v6798_v46  ;;  %v3835_v53 = vld [vmem:[%s4036_s8 + $0x48] sm:$0xff] }
 0x162   : > { %1827 = vmatpush.bf16.msra.mxu0 %v2965_v19  ;;  %2026 = vperm.xlu2 %3825, %v3833_v23   ;;  %vm6492_vm2 = vmpackc.low %vm5482_vm1, %vm5493_vm11  ;;  %v3697_v23 = vld [vmem:[#allocation2 + $0x2f4] sm:$0xf] }
 0x163   : > { %1876 = vmatpush.bf16.msra.mxu1 %v3029_v14  ;;  %vm5521_vm10 = vmor %vm353_vm3, %vm497_vm14  ;;  %v6806_v14 = vmov 0 }
 0x164   : > { %v1464_v6 = vpop.f32.mrf.mxu3  ;;  %v6807_v14 = vsel %vm5521_vm10, 4294967295, %v6806_v14  ;;  %vm6494_vm6 = vmpackc.low %vm5503_vm7, %vm5521_vm10  ;;  %vm6814_vm10 = vnez %v6652_v40 }
 0x165   : > { %v1493_v0 = vpop.f32.mrf.mxu0  ;;  %v1514_v57 = vadd.f32 %v1513_v52, %v1464_v6  ;;  %v6802_v52 = vmov 0  ;;  %6808 = vst [vmem:[#allocation30_spill] sm:$0xff] %v6807_v14  ;;  %vm5541_vm3 = vmor %vm358_vm8, %vm502_vm15  ;;  %v3836_v14 = vld [vmem:[%s4036_s8 + $0x28] sm:$0xff]  ;;  %vm371_vm8 = vcmp.eq.s32.totalorder %v4403_v9, %v4949_v18 }
 0x166   : > { %v5477_v28 = vadd.f32 %v1493_v0, %v5291_v45  ;;  %v6803_v52 = vsel %vm5493_vm11, 4294967295, %v6802_v52  ;;  %v6804_v45 = vmov 0  ;;  %v6810_v16 = vsel %vm5541_vm3, 4294967295, %v6809_v16  ;;  %vm5546_vm14 = vmor %vm352_vm5, %vm496_vm12 }
 0x167   : > { %v6805_v45 = vsel %vm5503_vm7, 4294967295, %v6804_v45  ;;  %v6811_v0 = vmov 0  ;;  %vm6496_vm15 = vmpackc.low %vm5541_vm3, %vm5546_vm14  ;;  %vm513_vm12 = vcmp.eq.s32.totalorder %v4291_v36, %v4947_v62  ;;  %vm507_vm5 = vcmp.eq.s32.totalorder %v4291_v36, %v4957_v35 }
 0x168   : > { %v1562_v19 = vpop.f32.mrf.mxu2  ;;  %v1516_v49 = vpop.f32.mrf.mxu1  ;;  %v6812_v0 = vsel %vm5546_vm14, 4294967295, %v6811_v0  ;;  %vm365_vm14 = vcmp.eq.s32.totalorder %v4403_v9, %v4893_v30 }
 0x169   : > { %v5513_v34 = vadd.f32 %v1562_v19, %v1514_v57  ;;  %3275 = vmatmul.msk.bf16.gmra.mxu3 %vm6492_vm2, %v6634_v15  ;;  %2038 = vperm.xlu1 %3827, %v3834_v22   ;;  %vm6813_vm2 = vnez %v6665_v38  ;;  %v3210_v19 = vld [vmem:[#allocation2 + $0x2f8] sm:$0xf0] }
 0x16a   : > { %2044 = vperm.xlu0 %3826, %v3835_v53   ;;  %v3722_v22 = vld [vmem:[%s6299_s2 + $0xb8] sm:$0xff]  ;;  %2032 = vperm.xlu2 %3825, %v3836_v14   ;;  %v3213_v38 = vor.u32 %v3697_v23, %v3210_v19  ;;  %v3838_v23 = vld [vmem:[%s4036_s8 + $0x60] sm:$0xff] }
 0x16b   : > { %3307 = vmatmul.msk.bf16.gmra.mxu1 %vm6494_vm6, %v6634_v15  ;;  %vm6815_vm6 = vmpackc.low %vm6813_vm2, %vm6814_vm10  ;;  %2522 = vmatpush.bf16.msrb.mxu2 %v3722_v22  ;;  %v3706_v14 = vld [vmem:[%s6299_s2 + $0x38] sm:$0xff]  ;;  %vm363_vm2 = vcmp.eq.s32.totalorder %v4291_v36, %v4893_v30  ;;  %vm515_vm10 = vcmp.eq.s32.totalorder %v4403_v9, %v4947_v62 }
 0x16c   : > { %v1467_v46 = vpop.f32.mrf.mxu3  ;;  %1967 = vmatpush.bf16.msrb.mxu3 %v3213_v38  ;;  %2424 = vmatpush.bf16.msrb.mxu0 %v3706_v14  ;;  %vm5613_vm7 = vmor %vm363_vm2, %vm507_vm5  ;;  %vm370_vm2 = vcmp.eq.s32.totalorder %v4419_v7, %v4949_v18  ;;  %vm364_vm5 = vcmp.eq.s32.totalorder %v4419_v7, %v4893_v30  ;;  %v3840_v30 = vld [vmem:[%s4036_s8 + $0x68] sm:$0xff]  ;;  %v6947_v38 = vld [vmem:[#allocation52_spill] sm:$0xff] }
 0x16d   : > { %v1535_v6 = vpop.f32.mrf.mxu0  ;;  %3323 = vmatmul.msk.bf16.gmra.mxu2 %vm6815_vm6, %v6634_v15  ;;  %v1517_v2 = vadd.f32 %v1516_v49, %v1467_v46  ;;  %v3714_v46 = vld [vmem:[%s6299_s2 + $0x78] sm:$0xff]  ;;  %vm369_vm6 = vcmp.eq.s32.totalorder %v4291_v36, %v4949_v18  ;;  %vm5619_vm3 = vmor %vm371_vm8, %vm515_vm10  ;;  %vm514_vm8 = vcmp.eq.s32.totalorder %v4419_v7, %v4947_v62 }
 0x16e   : > { %v5558_v57 = vadd.f32 %v1535_v6, %v5353_v39  ;;  %v3837_v6 = vld [vmem:[%s4036_s8 + $0x50] sm:$0xff]  ;;  %2473 = vmatpush.bf16.msrb.mxu1 %v3714_v46 }
 0x170   : > { %3291 = vmatmul.msk.bf16.gmra.mxu0 %vm6496_vm15, %v6634_v15  ;;  %v1565_v40 = vpop.f32.mrf.mxu2  ;;  %v1518_v39 = vpop.f32.mrf.mxu1  ;;  %vm5605_vm15 = vmor %vm369_vm6, %vm513_vm12  ;;  %vm509_vm12 = vcmp.eq.s32.totalorder %v4403_v9, %v4957_v35 }
 0x171   : > { %v5574_v49 = vadd.f32 %v1565_v40, %v1517_v2  ;;  %2047 = vperm.xlu1 %3827, %v3837_v6   ;;  %v3839_v40 = vld [vmem:[%s4036_s8 + $0x40] sm:$0xff]  ;;  %vm6501_vm6 = vmpackc.low %vm5605_vm15, %vm5613_vm7  ;;  %v6822_v6 = vmov 0 }
 0x172   : > { %2053 = vperm.xlu0 %3826, %v3838_v23   ;;  %2041 = vperm.xlu2 %3825, %v3839_v40   ;;  %vm5641_vm10 = vmor %vm365_vm14, %vm509_vm12  ;;  %vm508_vm14 = vcmp.eq.s32.totalorder %v4419_v7, %v4957_v35  ;;  %v3695_v23 = vld [vmem:[#allocation2 + $0x2e4] sm:$0xf]  ;;  %v3721_v40 = vld [vmem:[%s6299_s2 + $0xb0] sm:$0xff] }
 0x173   : > { %v6823_v6 = vsel %vm5641_vm10, 4294967295, %v6822_v6  ;;  %vm6502_vm11 = vmpackc.low %vm5619_vm3, %vm5641_vm10  ;;  %2523 = vmatpush.bf16.msrb.mxu2 %v3721_v40  ;;  %v3843_v40 = vld [vmem:[%s4036_s8 + $0x70] sm:$0xff] }
 0x174   : > { %v1469_v53 = vpop.f32.mrf.mxu3  ;;  %6824 = vst [vmem:[#allocation39_spill] sm:$0xff] %v6823_v6  ;;  %vm5659_vm12 = vmor %vm370_vm2, %vm514_vm8  ;;  %v6832_v6 = vld [vmem:[#allocation24_spill] sm:$0xff] }
 0x175   : > { %v1537_v2 = vpop.f32.mrf.mxu0  ;;  %v1519_v19 = vadd.f32 %v1518_v39, %v1469_v53  ;;  %vm6835_vm8 = vmpackc.low %vm6700_vm13, %vm6701_vm4  ;;  %vm6841_vm13 = vnez %v6539_v41 }
 0x176   : > { %v5595_v22 = vadd.f32 %v1537_v2, %v5380_v58  ;;  %v3841_v2 = vld [vmem:[%s4036_s8 + $0x78] sm:$0xff] }
 0x177   : > { %2524 = vmatpush.bf16.msrb.mxu2 %v3720_v8 }
 0x178   : > { %v1567_v14 = vpop.f32.mrf.mxu2  ;;  %v1521_v46 = vpop.f32.mrf.mxu1 }
 0x179   : > { %v5633_v36 = vadd.f32 %v1567_v14, %v1519_v19  ;;  %3277 = vmatmul.msk.bf16.gmra.mxu3 %vm6501_vm6, %v6634_v15  ;;  %2056 = vperm.xlu1 %3827, %v3840_v30   ;;  %vm5664_vm6 = vmor %vm364_vm5, %vm508_vm14  ;;  %v3202_v19 = vld [vmem:[#allocation2 + $0x2e8] sm:$0xf0]  ;;  %v3842_v14 = vld [vmem:[%s4036_s8 + $0x58] sm:$0xff]  ;;  %vm6836_vm5 = vnez %v6591_v25  ;;  %vm6837_vm14 = vnez %v6564_v26 }
 0x17a   : > { %2062 = vperm.xlu0 %3826, %v3841_v2   ;;  %2050 = vperm.xlu2 %3825, %v3842_v14   ;;  %vm6504_vm2 = vmpackc.low %vm5659_vm12, %vm5664_vm6  ;;  %v3205_v63 = vor.u32 %v3695_v23, %v3202_v19  ;;  %v3705_v30 = vld [vmem:[%s6299_s2 + $0x30] sm:$0xff] }
 0x17b   : > { %3309 = vmatmul.msk.bf16.gmra.mxu1 %vm6502_vm11, %v6634_v15  ;;  %vm6829_vm11 = vmpackc.low %vm4977_vm9, %vm4969_vm0  ;;  %2425 = vmatpush.bf16.msrb.mxu0 %v3705_v30  ;;  %vm6833_vm9 = vnez %v6832_v6  ;;  %v3693_v30 = vld [vmem:[#allocation2 + $0x2d4] sm:$0xf] }
 0x17c   : > { %v1472_v62 = vpop.f32.mrf.mxu3  ;;  %1968 = vmatpush.bf16.msrb.mxu3 %v3205_v63 }
 0x17d   : > { %v1540_v18 = vpop.f32.mrf.mxu0  ;;  %3325 = vmatmul.msk.bf16.gmra.mxu2 %vm6829_vm11, %v6634_v15  ;;  %v1522_v7 = vadd.f32 %v1521_v46, %v1472_v62  ;;  %v3713_v62 = vld [vmem:[%s6299_s2 + $0x70] sm:$0xff] }
 0x17e   : > { %v1541_v35 = vadd.f32 %v1540_v18, %v5449_v12  ;;  %2474 = vmatpush.bf16.msrb.mxu1 %v3713_v62  ;;  %v3194_v62 = vld [vmem:[#allocation2 + $0x2d8] sm:$0xf0] }
 0x17f   : > { %v3197_v50 = vor.u32 %v3693_v30, %v3194_v62  ;;  %v6843_v30 = vld [vmem:[#allocation33_spill] sm:$0xff]  ;;  %v6845_v62 = vld [vmem:[#allocation32_spill] sm:$0xff] }
 0x180   : > { %3293 = vmatmul.msk.bf16.gmra.mxu0 %vm6504_vm2, %v6634_v15  ;;  %v1570_v61 = vpop.f32.mrf.mxu2  ;;  %v1523_v12 = vpop.f32.mrf.mxu1  ;;  %vm6838_vm2 = vmpackc.low %vm6836_vm5, %vm6837_vm14  ;;  %vm6849_vm5 = vnez %v6625_v21 }
 0x181   : > { %v5690_v46 = vadd.f32 %v1570_v61, %v1522_v7  ;;  %v6830_v61 = vld [vmem:[#allocation25_spill] sm:$0xff]  ;;  %1969 = vmatpush.bf16.msrb.mxu3 %v3197_v50 }
 0x182   : > { %2059 = vperm.xlu2 %3825, %v3843_v40   ;;  %vm6831_vm0 = vnez %v6830_v61  ;;  %v3712_v40 = vld [vmem:[%s6299_s2 + $0x68] sm:$0xff] }
 0x183   : > { %vm6834_vm11 = vmpackc.low %vm6831_vm0, %vm6833_vm9  ;;  %2475 = vmatpush.bf16.msrb.mxu1 %v3712_v40  ;;  %vm6846_vm9 = vnez %v6845_v62  ;;  %v3711_v40 = vld [vmem:[%s6299_s2 + $0x60] sm:$0xff]  ;;  %v6859_v62 = vld [vmem:[#allocation11_spill] sm:$0xff] }
 0x184   : > { %v1474_v18 = vpop.f32.mrf.mxu3 }
 0x185   : > { %v1542_v2 = vpop.f32.mrf.mxu0  ;;  %v1524_v23 = vadd.f32 %v1523_v12, %v1474_v18 }
 0x186   : > { %v1543_v19 = vadd.f32 %v1542_v2, %v5477_v28  ;;  %v6839_v2 = vld [vmem:[#allocation17_spill] sm:$0xff] }
 0x187   : > { %vm6840_vm4 = vnez %v6839_v2  ;;  %v3186_v2 = vld [vmem:[#allocation2 + $0x2c8] sm:$0xf0]  ;;  %2476 = vmatpush.bf16.msrb.mxu1 %v3711_v40 }
 0x188   : > { %v1572_v14 = vpop.f32.mrf.mxu2  ;;  %v1682_v7 = vpop.f32.mrf.mxu1  ;;  %vm6842_vm0 = vmpackc.low %vm6840_vm4, %vm6841_vm13  ;;  %vm6851_vm4 = vnez %v6677_v4  ;;  %vm6852_vm13 = vnez %v6675_v27 }
 0x189   : > { %v5700_v63 = vadd.f32 %v1572_v14, %v1524_v23  ;;  %3327 = vmatmul.msk.bf16.vlgmr.msra.gmra.mxu3 %vm6834_vm11, %v6634_v15  ;;  %v3704_v23 = vld [vmem:[%s6299_s2 + $0x28] sm:$0xff] }
 0x18a   : > { %2426 = vmatpush.bf16.msrb.mxu0 %v3704_v23  ;;  %v3703_v23 = vld [vmem:[%s6299_s2 + $0x20] sm:$0xff] }
 0x18b   : > { %3359 = vmatmul.msk.bf16.vlgmr.msra.gmra.mxu1 %vm6835_vm8, %v6634_v15  ;;  %vm6848_vm8 = vnez %v6629_v1  ;;  %v3719_v1 = vld [vmem:[%s6299_s2 + $0xa0] sm:$0xff] }
 0x18c   : > { %v1584_v28 = vpop.f32.mrf.mxu3  ;;  %vm6850_vm14 = vmpackc.low %vm6848_vm8, %vm6849_vm5  ;;  %2525 = vmatpush.bf16.msrb.mxu2 %v3719_v1  ;;  %vm6860_vm5 = vnez %v6859_v62  ;;  %v6868_v1 = vld [vmem:[#allocation14_spill] sm:$0xff]  ;;  %v6875_v62 = vld [vmem:[#allocation15_spill] sm:$0xff] }
 0x18d   : > { %v1633_v12 = vpop.f32.mrf.mxu0  ;;  %3375 = vmatmul.msk.bf16.vlgmr.msra.gmra.mxu2 %vm6838_vm2, %v6634_v15  ;;  %v1585_v6 = vadd.f32 %v1584_v28, %v5558_v57  ;;  %vm6844_vm2 = vnez %v6843_v30 }
 0x18e   : > { %vm6847_vm11 = vmpackc.low %vm6844_vm2, %vm6846_vm9  ;;  %vm6854_vm2 = vnez %v6589_v24  ;;  %vm6855_vm9 = vnez %v6556_v10  ;;  %2427 = vmatpush.bf16.msrb.mxu0 %v3703_v23 }
 0x18f   : > { %v1634_v18 = vadd.f32 %v1633_v12, %v1585_v6 }
 0x190   : > { %3343 = vmatmul.msk.bf16.vlgmr.msra.gmra.mxu0 %vm6842_vm0, %v6634_v15  ;;  %v5730_v26 = vpop.f32.mrf.mxu2  ;;  %v1684_v25 = vpop.f32.mrf.mxu1  ;;  %vm6853_vm0 = vmpackc.low %vm6851_vm4, %vm6852_vm13  ;;  %vm6862_vm4 = vnez %v6722_v55  ;;  %vm6863_vm13 = vnez %v6724_v56  ;;  %v3718_v55 = vld [vmem:[%s6299_s2 + $0x98] sm:$0xff] }
 0x191   : > { %v5732_v57 = vadd.f32 %v1682_v7, %v1634_v18  ;;  %v3691_v18 = vld [vmem:[#allocation2 + $0x2c4] sm:$0xf]  ;;  %2526 = vmatpush.bf16.msrb.mxu2 %v3718_v55  ;;  %v6884_v55 = vld [vmem:[#allocation19_spill] sm:$0xff] }
 0x194   : > { %v1586_v41 = vpop.f32.mrf.mxu3 }
 0x195   : > { %v1635_v14 = vpop.f32.mrf.mxu0  ;;  %v1587_v61 = vadd.f32 %v1586_v41, %v5595_v22 }
 0x197   : > { %v1636_v28 = vadd.f32 %v1635_v14, %v1587_v61 }
 0x198   : > { %v5741_v12 = vpop.f32.mrf.mxu2  ;;  %v1687_v6 = vpop.f32.mrf.mxu1 }
 0x199   : > { %v5743_v7 = vadd.f32 %v1684_v25, %v1636_v28  ;;  %3329 = vmatmul.msk.bf16.gmra.mxu3 %vm6847_vm11, %v6634_v15  ;;  %v3189_v25 = vor.u32 %v3691_v18, %v3186_v2  ;;  %vm6856_vm11 = vmpackc.low %vm6854_vm2, %vm6855_vm9  ;;  %vm6865_vm2 = vnez %v6732_v11  ;;  %vm6866_vm9 = vnez %v6737_v37  ;;  %v3178_v18 = vld [vmem:[#allocation2 + $0x2b8] sm:$0xf0] }
 0x19b   : > { %3361 = vmatmul.msk.bf16.gmra.mxu1 %vm6850_vm14, %v6634_v15  ;;  %1970 = vmatpush.bf16.msrb.mxu3 %v3189_v25  ;;  %v6870_v25 = vld [vmem:[#allocation12_spill] sm:$0xff] }
 0x19c   : > { %v1589_v22 = vpop.f32.mrf.mxu3 }
 0x19d   : > { %v1638_v8 = vpop.f32.mrf.mxu0  ;;  %3377 = vmatmul.msk.bf16.gmra.mxu2 %vm6853_vm0, %v6634_v15  ;;  %v1590_v50 = vadd.f32 %v1589_v22, %v1541_v35  ;;  %vm6864_vm0 = vmpackc.low %vm6862_vm4, %vm6863_vm13  ;;  %vm6876_vm13 = vnez %v6875_v62 }
 0x19f   : > { %v1639_v21 = vadd.f32 %v1638_v8, %v1590_v50  ;;  %v3689_v50 = vld [vmem:[#allocation2 + $0x2b4] sm:$0xf] }
 0x1a0   : > { %3345 = vmatmul.msk.bf16.gmra.mxu0 %vm6856_vm11, %v6634_v15  ;;  %v5772_v27 = vpop.f32.mrf.mxu2  ;;  %v1689_v4 = vpop.f32.mrf.mxu1  ;;  %vm6867_vm11 = vmpackc.low %vm6865_vm2, %vm6866_vm9  ;;  %v3181_v56 = vor.u32 %v3689_v50, %v3178_v18  ;;  %vm6878_vm2 = vnez %v6739_v17  ;;  %vm6879_vm9 = vnez %v6741_v31  ;;  %v3170_v50 = vld [vmem:[#allocation2 + $0x2a8] sm:$0xf0]  ;;  %v3717_v17 = vld [vmem:[%s6299_s2 + $0x90] sm:$0xff] }
 0x1a1   : > { %v5774_v35 = vadd.f32 %v1687_v6, %v1639_v21  ;;  %v6857_v6 = vld [vmem:[#allocation13_spill] sm:$0xff]  ;;  %v3702_v21 = vld [vmem:[%s6299_s2 + $0x18] sm:$0xff]  ;;  %2527 = vmatpush.bf16.msrb.mxu2 %v3717_v17 }
 0x1a2   : > { %vm6858_vm8 = vnez %v6857_v6  ;;  %1971 = vmatpush.bf16.msrb.mxu3 %v3181_v56  ;;  %2428 = vmatpush.bf16.msrb.mxu0 %v3702_v21  ;;  %v6873_v6 = vld [vmem:[#allocation18_spill] sm:$0xff]  ;;  %v6886_v56 = vld [vmem:[#allocation16_spill] sm:$0xff]  ;;  %v3700_v17 = vld [vmem:[%s6299_s2 + $0x8] sm:$0xff] }
 0x1a3   : > { %vm6861_vm14 = vmpackc.low %vm6858_vm8, %vm6860_vm5  ;;  %vm6869_vm8 = vnez %v6868_v1  ;;  %vm6871_vm5 = vnez %v6870_v25  ;;  %vm6874_vm4 = vnez %v6873_v6  ;;  %v3709_v1 = vld [vmem:[%s6299_s2 + $0x50] sm:$0xff] }
 0x1a4   : > { %v1591_v10 = vpop.f32.mrf.mxu3 }
 0x1a5   : > { %v1640_v24 = vpop.f32.mrf.mxu0  ;;  %v1592_v41 = vadd.f32 %v1591_v10, %v1543_v19 }
 0x1a7   : > { %v1641_v14 = vadd.f32 %v1640_v24, %v1592_v41 }
 0x1a8   : > { %v5782_v61 = vpop.f32.mrf.mxu2  ;;  %v1692_v28 = vpop.f32.mrf.mxu1 }
 0x1a9   : > { %v5784_v30 = vadd.f32 %v1689_v4, %v1641_v14  ;;  %3331 = vmatmul.msk.bf16.gmra.mxu3 %vm6861_vm14, %v6634_v15  ;;  %vm6872_vm14 = vmpackc.low %vm6869_vm8, %vm6871_vm5  ;;  %v3710_v4 = vld [vmem:[%s6299_s2 + $0x58] sm:$0xff]  ;;  %vm6881_vm8 = vnez %v6749_v43  ;;  %vm6882_vm5 = vnez %v6751_v20 }
 0x1aa   : > { %2477 = vmatpush.bf16.msrb.mxu1 %v3710_v4 }
 0x1ab   : > { %3363 = vmatmul.msk.bf16.gmra.mxu1 %vm6864_vm0, %v6634_v15  ;;  %vm6877_vm0 = vmpackc.low %vm6874_vm4, %vm6876_vm13  ;;  %vm6885_vm4 = vnez %v6884_v55  ;;  %vm6887_vm13 = vnez %v6886_v56 }
 0x1ac   : > { %v1594_v19 = vpop.f32.mrf.mxu3 }
 0x1ad   : > { %v1643_v22 = vpop.f32.mrf.mxu0  ;;  %3379 = vmatmul.msk.bf16.gmra.mxu2 %vm6867_vm11, %v6634_v15  ;;  %v1595_v8 = vadd.f32 %v1594_v19, %v5103_v51  ;;  %vm6880_vm11 = vmpackc.low %vm6878_vm2, %vm6879_vm9 }
 0x1ae   : > { %2478 = vmatpush.bf16.msrb.mxu1 %v3709_v1 }
 0x1af   : > { %v1644_v2 = vadd.f32 %v1643_v22, %v1595_v8  ;;  %v3687_v8 = vld [vmem:[#allocation2 + $0x2a4] sm:$0xf] }
 0x1b0   : > { %3347 = vmatmul.msk.bf16.gmra.mxu0 %vm6872_vm14, %v6634_v15  ;;  %v5814_v11 = vpop.f32.mrf.mxu2  ;;  %v1694_v37 = vpop.f32.mrf.mxu1  ;;  %vm6883_vm14 = vmpackc.low %vm6881_vm8, %vm6882_vm5  ;;  %v3173_v31 = vor.u32 %v3687_v8, %v3170_v50  ;;  %vm6894_vm8 = vnez %v6758_v13  ;;  %vm6895_vm5 = vnez %v6756_v5  ;;  %v3716_v13 = vld [vmem:[%s6299_s2 + $0x88] sm:$0xff]  ;;  %v6900_v8 = vld [vmem:[#allocation23_spill] sm:$0xff] }
 0x1b1   : > { %v5816_v51 = vadd.f32 %v1692_v28, %v1644_v2  ;;  %v3701_v2 = vld [vmem:[%s6299_s2 + $0x10] sm:$0xff]  ;;  %v6902_v50 = vld [vmem:[#allocation29_spill] sm:$0xff]  ;;  %2528 = vmatpush.bf16.msrb.mxu2 %v3716_v13  ;;  %v2018_v9 = vpop.permute.xlu2 %2017 }
 0x1b2   : > { %1972 = vmatpush.bf16.msrb.mxu3 %v3173_v31  ;;  %2429 = vmatpush.bf16.msrb.mxu0 %v3701_v2  ;;  %v3708_v31 = vld [vmem:[%s6299_s2 + $0x48] sm:$0xff] }
 0x1b3   : > { %2479 = vmatpush.bf16.msrb.mxu1 %v3708_v31 }
 0x1b4   : > { %v1596_v23 = vpop.f32.mrf.mxu3 }
 0x1b5   : > { %v1645_v40 = vpop.f32.mrf.mxu0  ;;  %v1597_v10 = vadd.f32 %v1596_v23, %v5159_v44 }
 0x1b6   : > { %2430 = vmatpush.bf16.msrb.mxu0 %v3700_v17 }
 0x1b7   : > { %v1646_v24 = vadd.f32 %v1645_v40, %v1597_v10 }
 0x1b8   : > { %v5825_v41 = vpop.f32.mrf.mxu2  ;;  %v1697_v14 = vpop.f32.mrf.mxu1 }
 0x1b9   : > { %v5827_v28 = vadd.f32 %v1694_v37, %v1646_v24  ;;  %3333 = vmatmul.msk.bf16.gmra.mxu3 %vm6877_vm0, %v6634_v15  ;;  %vm6888_vm0 = vmpackc.low %vm6885_vm4, %vm6887_vm13  ;;  %v6889_v24 = vld [vmem:[#allocation22_spill] sm:$0xff]  ;;  %vm6897_vm4 = vnez %v6768_v60  ;;  %vm6898_vm13 = vnez %v6766_v29 }
 0x1ba   : > { %vm6890_vm2 = vnez %v6889_v24  ;;  %v6915_v24 = vld [vmem:[#allocation31_spill] sm:$0xff] }
 0x1bb   : > { %3365 = vmatmul.msk.bf16.gmra.mxu1 %vm6880_vm11, %v6634_v15 }
 0x1bc   : > { %v1599_v44 = vpop.f32.mrf.mxu3 }
 0x1bd   : > { %v1648_v19 = vpop.f32.mrf.mxu0  ;;  %3381 = vmatmul.msk.bf16.gmra.mxu2 %vm6883_vm14, %v6634_v15  ;;  %v1600_v22 = vadd.f32 %v1599_v44, %v5199_v3  ;;  %vm6896_vm14 = vmpackc.low %vm6894_vm8, %vm6895_vm5  ;;  %v3685_v44 = vld [vmem:[#allocation2 + $0x294] sm:$0xf] }
 0x1bf   : > { %v1649_v18 = vadd.f32 %v1648_v19, %v1600_v22  ;;  %v3162_v19 = vld [vmem:[#allocation2 + $0x298] sm:$0xf0] }
 0x1c0   : > { %3349 = vmatmul.msk.bf16.gmra.mxu0 %vm6888_vm0, %v6634_v15  ;;  %v5857_v43 = vpop.f32.mrf.mxu2  ;;  %v1699_v20 = vpop.f32.mrf.mxu1  ;;  %vm6899_vm0 = vmpackc.low %vm6897_vm4, %vm6898_vm13  ;;  %v3165_v5 = vor.u32 %v3685_v44, %v3162_v19  ;;  %vm6910_vm4 = vnez %v6778_v54  ;;  %vm6911_vm13 = vnez %v6780_v59  ;;  %v3715_v54 = vld [vmem:[%s6299_s2 + $0x80] sm:$0xff]  ;;  %v6918_v44 = vld [vmem:[#allocation42_spill] sm:$0xff] }
 0x1c1   : > { %v5859_v3 = vadd.f32 %v1697_v14, %v1649_v18  ;;  %v6891_v14 = vld [vmem:[#allocation28_spill] sm:$0xff]  ;;  %v6920_v19 = vld [vmem:[#allocation37_spill] sm:$0xff]  ;;  %2529 = vmatpush.bf16.msrb.mxu2 %v3715_v54 }
 0x1c2   : > { %vm6892_vm9 = vnez %v6891_v14  ;;  %1973 = vmatpush.bf16.msrb.mxu3 %v3165_v5 }
 0x1c3   : > { %vm6893_vm11 = vmpackc.low %vm6890_vm2, %vm6892_vm9  ;;  %vm6901_vm2 = vnez %v6900_v8  ;;  %vm6903_vm9 = vnez %v6902_v50  ;;  %v3707_v8 = vld [vmem:[%s6299_s2 + $0x40] sm:$0xff] }
 0x1c4   : > { %v1601_v25 = vpop.f32.mrf.mxu3  ;;  %2480 = vmatpush.bf16.msrb.mxu1 %v3707_v8 }
 0x1c5   : > { %v1650_v37 = vpop.f32.mrf.mxu0  ;;  %v1602_v21 = vadd.f32 %v1601_v25, %v5261_v47 }
 0x1c7   : > { %v1651_v4 = vadd.f32 %v1650_v37, %v1602_v21  ;;  %v6905_v37 = vld [vmem:[#allocation40_spill] sm:$0xff] }
 0x1c8   : > { %v5868_v23 = vpop.f32.mrf.mxu2  ;;  %v1702_v40 = vpop.f32.mrf.mxu1  ;;  %vm6906_vm8 = vnez %v6905_v37  ;;  %v6907_v21 = vld [vmem:[#allocation36_spill] sm:$0xff] }
 0x1c9   : > { %v5870_v10 = vadd.f32 %v1699_v20, %v1651_v4  ;;  %3335 = vmatmul.msk.bf16.gmra.mxu3 %vm6893_vm11, %v6634_v15  ;;  %vm6904_vm11 = vmpackc.low %vm6901_vm2, %vm6903_vm9  ;;  %vm6908_vm5 = vnez %v6907_v21  ;;  %vm6916_vm9 = vnez %v6915_v24 }
 0x1cb   : > { %3367 = vmatmul.msk.bf16.gmra.mxu1 %vm6896_vm14, %v6634_v15  ;;  %vm6909_vm14 = vmpackc.low %vm6906_vm8, %vm6908_vm5  ;;  %vm6919_vm8 = vnez %v6918_v44  ;;  %vm6921_vm5 = vnez %v6920_v19 }
 0x1cc   : > { %v1604_v47 = vpop.f32.mrf.mxu3 }
 0x1cd   : > { %v1653_v6 = vpop.f32.mrf.mxu0  ;;  %3383 = vmatmul.msk.bf16.gmra.mxu2 %vm6899_vm0, %v6634_v15  ;;  %v1605_v62 = vadd.f32 %v1604_v47, %v5359_v32  ;;  %vm6912_vm0 = vmpackc.low %vm6910_vm4, %vm6911_vm13  ;;  %v3683_v47 = vld [vmem:[#allocation2 + $0x284] sm:$0xf] }
 0x1cf   : > { %v1654_v22 = vadd.f32 %v1653_v6, %v1605_v62  ;;  %v3154_v6 = vld [vmem:[#allocation2 + $0x288] sm:$0xf0] }
 0x1d0   : > { %3351 = vmatmul.msk.bf16.gmra.mxu0 %vm6904_vm11, %v6634_v15  ;;  %v5900_v29 = vpop.f32.mrf.mxu2  ;;  %v1704_v60 = vpop.f32.mrf.mxu1  ;;  %v3157_v59 = vor.u32 %v3683_v47, %v3154_v6 }
 0x1d1   : > { %v5902_v32 = vadd.f32 %v1702_v40, %v1654_v22  ;;  %v6913_v40 = vld [vmem:[#allocation38_spill] sm:$0xff]  ;;  %v3699_v22 = vld [vmem:[%s6299_s2] sm:$0xff] }
 0x1d2   : > { %vm6914_vm2 = vnez %v6913_v40  ;;  %1974 = vmatpush.bf16.msrb.mxu3 %v3157_v59  ;;  %2431 = vmatpush.bf16.msrb.mxu0 %v3699_v22  ;;  %v6938_v59 = vld [vmem:[#allocation50_spill] sm:$0xff]  ;;  %v6945_v22 = vld [vmem:[#allocation51_spill] sm:$0xff] }
 0x1d3   : > { %vm6917_vm11 = vmpackc.low %vm6914_vm2, %vm6916_vm9  ;;  %vm6928_vm2 = vnez %v6803_v52 }
 0x1d4   : > { %v1606_v18 = vpop.f32.mrf.mxu3  ;;  %vm6929_vm9 = vmpackc.low %vm5482_vm1, %vm6928_vm2  ;;  %vm6939_vm1 = vnez %v6938_v59 }
 0x1d5   : > { %v1655_v55 = vpop.f32.mrf.mxu0  ;;  %v1607_v56 = vadd.f32 %v1606_v18, %v5394_v33 }
 0x1d7   : > { %v1656_v20 = vadd.f32 %v1655_v55, %v1607_v56 }
 0x1d8   : > { %v5911_v2 = vpop.f32.mrf.mxu2  ;;  %v1707_v1 = vpop.f32.mrf.mxu1 }
 0x1d9   : > { %v5913_v25 = vadd.f32 %v1704_v60, %v1656_v20  ;;  %3337 = vmatmul.msk.bf16.gmra.mxu3 %vm6909_vm14, %v6634_v15  ;;  %vm6922_vm14 = vmpackc.low %vm6919_vm8, %vm6921_vm5  ;;  %v6923_v20 = vld [vmem:[#allocation47_spill] sm:$0xff]  ;;  %vm6931_vm8 = vnez %v6812_v0 }
 0x1da   : > { %vm6924_vm4 = vnez %v6923_v20 }
 0x1db   : > { %3369 = vmatmul.msk.bf16.gmra.mxu1 %vm6912_vm0, %v6634_v15 }
 0x1dc   : > { %v1609_v33 = vpop.f32.mrf.mxu3 }
 0x1dd   : > { %v1658_v4 = vpop.f32.mrf.mxu0  ;;  %3385 = vmatmul.msk.bf16.gmra.mxu2 %vm6917_vm11, %v6634_v15  ;;  %v1610_v14 = vadd.f32 %v1609_v33, %v5462_v42  ;;  %vm6930_vm11 = vnez %v6810_v16 }
 0x1de   : > { %vm6932_vm5 = vmpackc.low %vm6930_vm11, %vm6931_vm8  ;;  %vm6946_vm8 = vnez %v6945_v22 }
 0x1df   : > { %v1659_v62 = vadd.f32 %v1658_v4, %v1610_v14  ;;  %v6933_v4 = vld [vmem:[#allocation48_spill] sm:$0xff]  ;;  %vm6944_vm11 = vmpackc.low %vm5659_vm12, %vm5664_vm6 }
 0x1e0   : > { %3353 = vmatmul.msk.bf16.gmra.mxu0 %vm6922_vm14, %v6634_v15  ;;  %v5943_v13 = vpop.f32.mrf.mxu2  ;;  %v1709_v5 = vpop.f32.mrf.mxu1  ;;  %vm6934_vm14 = vnez %v6933_v4 }
 0x1e1   : > { %v5945_v42 = vadd.f32 %v1707_v1, %v1659_v62  ;;  %v6925_v1 = vld [vmem:[#allocation45_spill] sm:$0xff] }
 0x1e2   : > { %vm6926_vm13 = vnez %v6925_v1  ;;  %v6940_v62 = vld [vmem:[#allocation49_spill] sm:$0xff] }
 0x1e3   : > { %vm6927_vm0 = vmpackc.low %vm6924_vm4, %vm6926_vm13  ;;  %vm6936_vm4 = vnez %v6935_v48 }
 0x1e4   : > { %v1611_v50 = vpop.f32.mrf.mxu3  ;;  %vm6937_vm13 = vmpackc.low %vm6934_vm14, %vm6936_vm4 }
 0x1e5   : > { %v1660_v60 = vpop.f32.mrf.mxu0  ;;  %v1612_v17 = vadd.f32 %v1611_v50, %v5513_v34 }
 0x1e7   : > { %v1661_v31 = vadd.f32 %v1660_v60, %v1612_v17  ;;  %v2021_v60 = vpop.permute.xlu0 %2020 }
 0x1e8   : > { %v5954_v18 = vpop.f32.mrf.mxu2  ;;  %v1712_v55 = vpop.f32.mrf.mxu1 }
 0x1e9   : > { %v5956_v56 = vadd.f32 %v1709_v5, %v1661_v31  ;;  %3339 = vmatmul.msk.bf16.gmra.mxu3 %vm6927_vm0, %v6634_v15  ;;  %vm6941_vm0 = vnez %v6940_v62  ;;  %v6950_v31 = vld [vmem:[#allocation9_spill] sm:$0xff] }
 0x1ea   : > { %vm6942_vm2 = vmpackc.low %vm6939_vm1, %vm6941_vm0 }
 0x1eb   : > { %3371 = vmatmul.msk.bf16.gmra.mxu1 %vm6929_vm9, %v6634_v15  ;;  %vm6943_vm9 = vmpackc.low %vm5605_vm15, %vm5613_vm7  ;;  %vm2065_vm7 = vcmp.eq.s32.totalorder %v6950_v31, %v2018_v9  ;;  %vm2068_vm15 = vcmp.eq.s32.totalorder %v6950_v31, %v2021_v60 }
 0x1ec   : > { %v1614_v34 = vpop.f32.mrf.mxu3  ;;  %vm3566_vm4 = vmpackc.low %vm2068_vm15, %vm2065_vm7 }
 0x1ed   : > { %v1663_v37 = vpop.f32.mrf.mxu0  ;;  %3387 = vmatmul.msk.bf16.gmra.mxu2 %vm6932_vm5, %v6634_v15  ;;  %v1615_v21 = vadd.f32 %v1614_v34, %v5574_v49  ;;  %vm6948_vm5 = vnez %v6947_v38 }
 0x1ee   : > { %vm6949_vm14 = vmpackc.low %vm6946_vm8, %vm6948_vm5 }
 0x1ef   : > { %v1664_v33 = vadd.f32 %v1663_v37, %v1615_v21  ;;  %v6952_v21 = vld [vmem:[#allocation21_spill] sm:$0xff] }
 0x1f0   : > { %3355 = vmatmul.msk.bf16.gmra.mxu0 %vm6937_vm13, %v6634_v15  ;;  %v5983_v52 = vpop.f32.mrf.mxu2  ;;  %v1714_v40 = vpop.f32.mrf.mxu1  ;;  %vm6953_vm13 = vnez %v6952_v21 }
 0x1f1   : > { %v5985_v24 = vadd.f32 %v1712_v55, %v1664_v33  ;;  %v6951_v55 = vld [vmem:[#allocation10_spill] sm:$0xff]  ;;  %v6954_v33 = vld [vmem:[#allocation20_spill] sm:$0xff] }
 0x1f2   : > { %vm2066_vm6 = vcmp.eq.s32.totalorder %v6951_v55, %v2018_v9  ;;  %vm2069_vm12 = vcmp.eq.s32.totalorder %v6951_v55, %v2021_v60  ;;  %vm6955_vm1 = vnez %v6954_v33 }
 0x1f3   : > { %vm6956_vm0 = vmpackc.low %vm6953_vm13, %vm6955_vm1 }
 0x1f4   : > { %v1616_v16 = vpop.f32.mrf.mxu3 }
 0x1f5   : > { %v1665_v14 = vpop.f32.mrf.mxu0  ;;  %v1617_v0 = vadd.f32 %v1616_v16, %v5633_v36 }
 0x1f7   : > { %v1666_v47 = vadd.f32 %v1665_v14, %v1617_v0 }
 0x1f8   : > { %v5988_v6 = vpop.f32.mrf.mxu2  ;;  %v1717_v49 = vpop.f32.mrf.mxu1 }
 0x1f9   : > { %v5990_v54 = vadd.f32 %v1714_v40, %v1666_v47  ;;  %3341 = vmatmul.msk.bf16.gmra.mxu3 %vm6942_vm2, %v6634_v15  ;;  %vm3582_vm2 = vmpackc.low %vm2069_vm12, %vm2066_vm6 }
 0x1fb   : > { %3373 = vmatmul.msk.bf16.gmra.mxu1 %vm6943_vm9, %v6634_v15 }
 0x1fc   : > { %v1619_v36 = vpop.f32.mrf.mxu3 }
 0x1fd   : > { %v1668_v44 = vpop.f32.mrf.mxu0  ;;  %3389 = vmatmul.msk.bf16.gmra.mxu2 %vm6944_vm11, %v6634_v15  ;;  %v1620_v19 = vadd.f32 %v1619_v36, %v5690_v46 }
 0x1ff   : > { %v1669_v5 = vadd.f32 %v1668_v44, %v1620_v19  ;;  %v2024_v44 = vpop.permute.xlu1 %2023  ;;  %v2027_v19 = vpop.permute.xlu2 %2026 }
 0x200   : > { %3357 = vmatmul.msk.bf16.gmra.mxu0 %vm6949_vm14, %v6634_v15  ;;  %v6017_v58 = vpop.f32.mrf.mxu2  ;;  %v1719_v8 = vpop.f32.mrf.mxu1  ;;  %vm2071_vm5 = vcmp.eq.s32.totalorder %v6950_v31, %v2024_v44  ;;  %vm2074_vm14 = vcmp.eq.s32.totalorder %v6950_v31, %v2027_v19  ;;  %vm2072_vm7 = vcmp.eq.s32.totalorder %v6951_v55, %v2024_v44  ;;  %vm2075_vm15 = vcmp.eq.s32.totalorder %v6951_v55, %v2027_v19 }
 0x201   : > { %v6019_v50 = vadd.f32 %v1717_v49, %v1669_v5  ;;  %vm3568_vm13 = vmpackc.low %vm2074_vm14, %vm2071_vm5 }
 0x204   : > { %v1621_v53 = vpop.f32.mrf.mxu3 }
 0x205   : > { %v1670_v17 = vpop.f32.mrf.mxu0  ;;  %v1622_v46 = vadd.f32 %v1621_v53, %v5700_v63  ;;  %v6957_v63 = vld [vmem:[#allocation8_spill] sm:$0xff] }
 0x206   : > { %vm2064_vm9 = vcmp.eq.s32.totalorder %v6957_v63, %v2018_v9  ;;  %vm2067_vm11 = vcmp.eq.s32.totalorder %v6957_v63, %v2021_v60  ;;  %v6960_v9 = vld [vmem:[#allocation43_spill] sm:$0xff]  ;;  %vm2070_vm1 = vcmp.eq.s32.totalorder %v6957_v63, %v2024_v44 }
 0x207   : > { %v1671_v20 = vadd.f32 %v1670_v17, %v1622_v46  ;;  %vm3550_vm8 = vmpackc.low %vm2067_vm11, %vm2064_vm9  ;;  %vm6961_vm12 = vnez %v6960_v9 }
 0x208   : > { %v6026_v1 = vpop.f32.mrf.mxu2  ;;  %v1878_v34 = vpop.f32.mrf.mxu1 }
 0x209   : > { %v6028_v37 = vadd.f32 %v1719_v8, %v1671_v20  ;;  %3391 = vmatmul.msk.bf16.vlgmr.msrb.gmra.mxu3 %vm6956_vm0, %v6634_v15  ;;  %v6958_v8 = vld [vmem:[#allocation44_spill] sm:$0xff]  ;;  %vm2073_vm0 = vcmp.eq.s32.totalorder %v6957_v63, %v2027_v19 }
 0x20a   : > { %vm6959_vm6 = vnez %v6958_v8  ;;  %vm3552_vm9 = vmpackc.low %vm2073_vm0, %vm2070_vm1 }
 0x20b   : > { %3567 = vmatmul.msk.bf16.vlgmr.msrb.gmra.mxu1 %vm3566_vm4, %v6634_v15  ;;  %vm6962_vm4 = vmpackc.low %vm6959_vm6, %vm6961_vm12 }
 0x20c   : > { %v1780_v4 = vpop.f32.mrf.mxu3 }
 0x20d   : > { %v1829_v48 = vpop.f32.mrf.mxu0  ;;  %3583 = vmatmul.msk.bf16.vlgmr.msrb.gmra.mxu2 %vm3582_vm2, %v6634_v15  ;;  %v1781_v40 = vadd.f32 %v1780_v4, %v5730_v26  ;;  %vm3584_vm2 = vmpackc.low %vm2075_vm15, %vm2072_vm7 }
 0x20f   : > { %v1830_v16 = vadd.f32 %v1829_v48, %v1781_v40 }
 0x210   : > { %3551 = vmatmul.msk.bf16.vlgmr.msrb.gmra.mxu0 %vm3550_vm8, %v6634_v15  ;;  %v1927_v14 = vpop.f32.mrf.mxu2  ;;  %v1880_v0 = vpop.f32.mrf.mxu1 }
 0x211   : > { %v1879_v47 = vadd.f32 %v1878_v34, %v1830_v16  ;;  %v2030_v16 = vpop.permute.xlu1 %2029 }
 0x212   : > { %vm2077_vm11 = vcmp.eq.s32.totalorder %v6950_v31, %v2030_v16  ;;  %vm2078_vm5 = vcmp.eq.s32.totalorder %v6951_v55, %v2030_v16 }
 0x213   : > { %v6042_v49 = vadd.f32 %v1927_v14, %v1879_v47  ;;  %v2033_v14 = vpop.permute.xlu2 %2032 }
 0x214   : > { %v1782_v59 = vpop.f32.mrf.mxu3  ;;  %vm2080_vm8 = vcmp.eq.s32.totalorder %v6950_v31, %v2033_v14  ;;  %vm2081_vm14 = vcmp.eq.s32.totalorder %v6951_v55, %v2033_v14 }
 0x215   : > { %v1831_v62 = vpop.f32.mrf.mxu0  ;;  %v1783_v36 = vadd.f32 %v1782_v59, %v5741_v12  ;;  %vm3570_vm12 = vmpackc.low %vm2080_vm8, %vm2077_vm11 }
 0x216   : > { %vm3586_vm1 = vmpackc.low %vm2081_vm14, %vm2078_vm5 }
 0x217   : > { %v1832_v26 = vadd.f32 %v1831_v62, %v1783_v36  ;;  %v6963_v62 = vld [vmem:[#allocation53_spill] sm:$0xff]  ;;  %v6965_v36 = vld [vmem:[#allocation54_spill] sm:$0xff] }
 0x218   : > { %v1929_v5 = vpop.f32.mrf.mxu2  ;;  %v1883_v22 = vpop.f32.mrf.mxu1  ;;  %vm6964_vm7 = vnez %v6963_v62  ;;  %vm6966_vm15 = vnez %v6965_v36 }
 0x219   : > { %v1881_v38 = vadd.f32 %v1880_v0, %v1832_v26  ;;  %3393 = vmatmul.msk.bf16.gmra.mxu3 %vm6962_vm4, %v6634_v15  ;;  %vm6967_vm6 = vmpackc.low %vm6964_vm7, %vm6966_vm15  ;;  %vm2076_vm4 = vcmp.eq.s32.totalorder %v6957_v63, %v2030_v16 }
 0x21b   : > { %v6057_v12 = vadd.f32 %v1929_v5, %v1881_v38  ;;  %3569 = vmatmul.msk.bf16.gmra.mxu1 %vm3568_vm13, %v6634_v15  ;;  %vm2079_vm13 = vcmp.eq.s32.totalorder %v6957_v63, %v2033_v14 }
 0x21c   : > { %v1785_v60 = vpop.f32.mrf.mxu3  ;;  %vm3554_vm0 = vmpackc.low %vm2079_vm13, %vm2076_vm4 }
 0x21d   : > { %v1834_v53 = vpop.f32.mrf.mxu0  ;;  %3585 = vmatmul.msk.bf16.gmra.mxu2 %vm3584_vm2, %v6634_v15  ;;  %v1786_v17 = vadd.f32 %v1785_v60, %v5772_v27 }
 0x21f   : > { %v1835_v46 = vadd.f32 %v1834_v53, %v1786_v17 }
 0x220   : > { %3553 = vmatmul.msk.bf16.gmra.mxu0 %vm3552_vm9, %v6634_v15  ;;  %v1932_v20 = vpop.f32.mrf.mxu2  ;;  %v1885_v34 = vpop.f32.mrf.mxu1 }
 0x221   : > { %v1884_v21 = vadd.f32 %v1883_v22, %v1835_v46  ;;  %v2036_v46 = vpop.permute.xlu0 %2035 }
 0x222   : > { %vm2083_vm2 = vcmp.eq.s32.totalorder %v6950_v31, %v2036_v46  ;;  %vm2084_vm11 = vcmp.eq.s32.totalorder %v6951_v55, %v2036_v46 }
 0x223   : > { %v6063_v33 = vadd.f32 %v1932_v20, %v1884_v21  ;;  %v2039_v20 = vpop.permute.xlu1 %2038 }
 0x224   : > { %v1787_v4 = vpop.f32.mrf.mxu3  ;;  %vm2086_vm9 = vcmp.eq.s32.totalorder %v6950_v31, %v2039_v20  ;;  %vm2087_vm8 = vcmp.eq.s32.totalorder %v6951_v55, %v2039_v20 }
 0x225   : > { %v1836_v48 = vpop.f32.mrf.mxu0  ;;  %v1788_v40 = vadd.f32 %v1787_v4, %v5782_v61  ;;  %vm3572_vm15 = vmpackc.low %vm2086_vm9, %vm2083_vm2 }
 0x226   : > { %vm3588_vm4 = vmpackc.low %vm2087_vm8, %vm2084_vm11 }
 0x227   : > { %v1837_v27 = vadd.f32 %v1836_v48, %v1788_v40  ;;  %v6968_v48 = vld [vmem:[#allocation55_spill] sm:$0xff]  ;;  %v6970_v40 = vld [vmem:[#allocation56_spill] sm:$0xff] }
 0x228   : > { %v1934_v0 = vpop.f32.mrf.mxu2  ;;  %v1888_v47 = vpop.f32.mrf.mxu1  ;;  %vm6969_vm5 = vnez %v6968_v48  ;;  %vm6971_vm14 = vnez %v6970_v40 }
 0x229   : > { %v1886_v59 = vadd.f32 %v1885_v34, %v1837_v27  ;;  %3395 = vmatmul.msk.bf16.gmra.mxu3 %vm6967_vm6, %v6634_v15  ;;  %vm6972_vm7 = vmpackc.low %vm6969_vm5, %vm6971_vm14  ;;  %vm2082_vm6 = vcmp.eq.s32.totalorder %v6957_v63, %v2036_v46 }
 0x22b   : > { %v6078_v61 = vadd.f32 %v1934_v0, %v1886_v59  ;;  %3571 = vmatmul.msk.bf16.gmra.mxu1 %vm3570_vm12, %v6634_v15  ;;  %vm2085_vm12 = vcmp.eq.s32.totalorder %v6957_v63, %v2039_v20 }
 0x22c   : > { %v1790_v44 = vpop.f32.mrf.mxu3  ;;  %vm3556_vm13 = vmpackc.low %vm2085_vm12, %vm2082_vm6 }
 0x22d   : > { %v1839_v19 = vpop.f32.mrf.mxu0  ;;  %3587 = vmatmul.msk.bf16.gmra.mxu2 %vm3586_vm1, %v6634_v15  ;;  %v1791_v26 = vadd.f32 %v1790_v44, %v5814_v11 }
 0x22f   : > { %v1840_v5 = vadd.f32 %v1839_v19, %v1791_v26 }
 0x230   : > { %3555 = vmatmul.msk.bf16.gmra.mxu0 %vm3554_vm0, %v6634_v15  ;;  %v1937_v22 = vpop.f32.mrf.mxu2  ;;  %v1890_v38 = vpop.f32.mrf.mxu1 }
 0x231   : > { %v1889_v8 = vadd.f32 %v1888_v47, %v1840_v5  ;;  %v2042_v5 = vpop.permute.xlu2 %2041 }
 0x232   : > { %vm2089_vm1 = vcmp.eq.s32.totalorder %v6950_v31, %v2042_v5  ;;  %vm2090_vm2 = vcmp.eq.s32.totalorder %v6951_v55, %v2042_v5 }
 0x233   : > { %v6084_v9 = vadd.f32 %v1937_v22, %v1889_v8  ;;  %v2045_v22 = vpop.permute.xlu0 %2044 }
 0x234   : > { %v1792_v60 = vpop.f32.mrf.mxu3  ;;  %vm2092_vm0 = vcmp.eq.s32.totalorder %v6950_v31, %v2045_v22  ;;  %vm2093_vm9 = vcmp.eq.s32.totalorder %v6951_v55, %v2045_v22 }
 0x235   : > { %v1841_v53 = vpop.f32.mrf.mxu0  ;;  %v1793_v17 = vadd.f32 %v1792_v60, %v5825_v41  ;;  %vm3574_vm14 = vmpackc.low %vm2092_vm0, %vm2089_vm1 }
 0x236   : > { %vm3590_vm6 = vmpackc.low %vm2093_vm9, %vm2090_vm2 }
 0x237   : > { %v1842_v11 = vadd.f32 %v1841_v53, %v1793_v17  ;;  %v6973_v53 = vld [vmem:[#allocation58_spill] sm:$0xff]  ;;  %v6975_v17 = vld [vmem:[#allocation57_spill] sm:$0xff] }
 0x238   : > { %v1939_v34 = vpop.f32.mrf.mxu2  ;;  %v1893_v21 = vpop.f32.mrf.mxu1  ;;  %vm6974_vm11 = vnez %v6973_v53  ;;  %vm6976_vm8 = vnez %v6975_v17 }
 0x239   : > { %v1891_v4 = vadd.f32 %v1890_v38, %v1842_v11  ;;  %3397 = vmatmul.msk.bf16.gmra.mxu3 %vm6972_vm7, %v6634_v15  ;;  %vm6977_vm5 = vmpackc.low %vm6974_vm11, %vm6976_vm8  ;;  %vm2088_vm7 = vcmp.eq.s32.totalorder %v6957_v63, %v2042_v5 }
 0x23b   : > { %v6099_v41 = vadd.f32 %v1939_v34, %v1891_v4  ;;  %3573 = vmatmul.msk.bf16.gmra.mxu1 %vm3572_vm15, %v6634_v15  ;;  %vm2091_vm15 = vcmp.eq.s32.totalorder %v6957_v63, %v2045_v22 }
 0x23c   : > { %v1795_v16 = vpop.f32.mrf.mxu3  ;;  %vm3558_vm12 = vmpackc.low %vm2091_vm15, %vm2088_vm7 }
 0x23d   : > { %v1844_v14 = vpop.f32.mrf.mxu0  ;;  %3589 = vmatmul.msk.bf16.gmra.mxu2 %vm3588_vm4, %v6634_v15  ;;  %v1796_v27 = vadd.f32 %v1795_v16, %v5857_v43 }
 0x23f   : > { %v1845_v0 = vadd.f32 %v1844_v14, %v1796_v27 }
 0x240   : > { %3557 = vmatmul.msk.bf16.gmra.mxu0 %vm3556_vm13, %v6634_v15  ;;  %v1942_v47 = vpop.f32.mrf.mxu2  ;;  %v1895_v59 = vpop.f32.mrf.mxu1 }
 0x241   : > { %v1894_v62 = vadd.f32 %v1893_v21, %v1845_v0  ;;  %v2048_v0 = vpop.permute.xlu1 %2047 }
 0x242   : > { %vm2095_vm4 = vcmp.eq.s32.totalorder %v6950_v31, %v2048_v0  ;;  %vm2096_vm1 = vcmp.eq.s32.totalorder %v6951_v55, %v2048_v0 }
 0x243   : > { %v6105_v36 = vadd.f32 %v1942_v47, %v1894_v62  ;;  %v2051_v47 = vpop.permute.xlu2 %2050 }
 0x244   : > { %v1797_v44 = vpop.f32.mrf.mxu3  ;;  %vm2098_vm13 = vcmp.eq.s32.totalorder %v6950_v31, %v2051_v47  ;;  %vm2099_vm0 = vcmp.eq.s32.totalorder %v6951_v55, %v2051_v47 }
 0x245   : > { %v1846_v19 = vpop.f32.mrf.mxu0  ;;  %v1798_v26 = vadd.f32 %v1797_v44, %v5868_v23  ;;  %vm3576_vm8 = vmpackc.low %vm2098_vm13, %vm2095_vm4 }
 0x246   : > { %vm3592_vm7 = vmpackc.low %vm2099_vm0, %vm2096_vm1  ;;  %vm6983_vm1 = vnez %v6805_v45 }
 0x247   : > { %v1847_v43 = vadd.f32 %v1846_v19, %v1798_v26  ;;  %v6978_v19 = vld [vmem:[#allocation26_spill] sm:$0xff]  ;;  %v6980_v26 = vld [vmem:[#allocation27_spill] sm:$0xff] }
 0x248   : > { %v1944_v38 = vpop.f32.mrf.mxu2  ;;  %v1898_v8 = vpop.f32.mrf.mxu1  ;;  %vm6979_vm2 = vnez %v6978_v19  ;;  %vm6981_vm9 = vnez %v6980_v26 }
 0x249   : > { %v1896_v60 = vadd.f32 %v1895_v59, %v1847_v43  ;;  %3399 = vmatmul.msk.bf16.gmra.mxu3 %vm6977_vm5, %v6634_v15  ;;  %vm6982_vm11 = vmpackc.low %vm6979_vm2, %vm6981_vm9  ;;  %vm2094_vm5 = vcmp.eq.s32.totalorder %v6957_v63, %v2048_v0  ;;  %v2057_v17 = vpop.permute.xlu1 %2056 }
 0x24a   : > { %vm2105_vm13 = vcmp.eq.s32.totalorder %v6951_v55, %v2057_v17 }
 0x24b   : > { %v6120_v23 = vadd.f32 %v1944_v38, %v1896_v60  ;;  %3575 = vmatmul.msk.bf16.gmra.mxu1 %vm3574_vm14, %v6634_v15  ;;  %vm2097_vm14 = vcmp.eq.s32.totalorder %v6957_v63, %v2051_v47 }
 0x24c   : > { %v1800_v46 = vpop.f32.mrf.mxu3  ;;  %vm3560_vm15 = vmpackc.low %vm2097_vm14, %vm2094_vm5 }
 0x24d   : > { %v1849_v20 = vpop.f32.mrf.mxu0  ;;  %3591 = vmatmul.msk.bf16.gmra.mxu2 %vm3590_vm6, %v6634_v15  ;;  %v1801_v11 = vadd.f32 %v1800_v46, %v5900_v29 }
 0x24f   : > { %v1850_v34 = vadd.f32 %v1849_v20, %v1801_v11 }
 0x250   : > { %3559 = vmatmul.msk.bf16.gmra.mxu0 %vm3558_vm12, %v6634_v15  ;;  %v1947_v21 = vpop.f32.mrf.mxu2  ;;  %v1900_v4 = vpop.f32.mrf.mxu1  ;;  %vm2104_vm12 = vcmp.eq.s32.totalorder %v6950_v31, %v2057_v17 }
 0x251   : > { %v1899_v48 = vadd.f32 %v1898_v8, %v1850_v34 }
 0x253   : > { %v6126_v40 = vadd.f32 %v1947_v21, %v1899_v48  ;;  %v2054_v21 = vpop.permute.xlu0 %2053 }
 0x254   : > { %v1802_v16 = vpop.f32.mrf.mxu3  ;;  %vm2101_vm6 = vcmp.eq.s32.totalorder %v6950_v31, %v2054_v21  ;;  %vm2102_vm4 = vcmp.eq.s32.totalorder %v6951_v55, %v2054_v21 }
 0x255   : > { %v1851_v14 = vpop.f32.mrf.mxu0  ;;  %v1803_v27 = vadd.f32 %v1802_v16, %v5911_v2  ;;  %vm3578_vm9 = vmpackc.low %vm2104_vm12, %vm2101_vm6 }
 0x256   : > { %vm3594_vm5 = vmpackc.low %vm2105_vm13, %vm2102_vm4 }
 0x257   : > { %v1852_v29 = vadd.f32 %v1851_v14, %v1803_v27  ;;  %v6984_v14 = vld [vmem:[#allocation30_spill] sm:$0xff]  ;;  %vm6988_vm4 = vmpackc.low %vm5619_vm3, %vm5641_vm10 }
 0x258   : > { %v1949_v59 = vpop.f32.mrf.mxu2  ;;  %v1903_v62 = vpop.f32.mrf.mxu1  ;;  %vm6985_vm0 = vnez %v6984_v14 }
 0x259   : > { %v1901_v44 = vadd.f32 %v1900_v4, %v1852_v29  ;;  %3401 = vmatmul.msk.bf16.gmra.mxu3 %vm6982_vm11, %v6634_v15  ;;  %vm6986_vm2 = vmpackc.low %vm6983_vm1, %vm6985_vm0  ;;  %vm2100_vm11 = vcmp.eq.s32.totalorder %v6957_v63, %v2054_v21 }
 0x25b   : > { %v6141_v2 = vadd.f32 %v1949_v59, %v1901_v44  ;;  %3577 = vmatmul.msk.bf16.gmra.mxu1 %vm3576_vm8, %v6634_v15  ;;  %vm2103_vm8 = vcmp.eq.s32.totalorder %v6957_v63, %v2057_v17  ;;  %v2060_v44 = vpop.permute.xlu2 %2059  ;;  %v2063_v19 = vpop.permute.xlu0 %2062 }
 0x25c   : > { %v1805_v5 = vpop.f32.mrf.mxu3  ;;  %vm3562_vm14 = vmpackc.low %vm2103_vm8, %vm2100_vm11  ;;  %vm2108_vm6 = vcmp.eq.s32.totalorder %v6951_v55, %v2060_v44  ;;  %vm2111_vm12 = vcmp.eq.s32.totalorder %v6951_v55, %v2063_v19  ;;  %vm2106_vm1 = vcmp.eq.s32.totalorder %v6957_v63, %v2060_v44  ;;  %vm2109_vm0 = vcmp.eq.s32.totalorder %v6957_v63, %v2063_v19 }
 0x25d   : > { %v1854_v22 = vpop.f32.mrf.mxu0  ;;  %3593 = vmatmul.msk.bf16.gmra.mxu2 %vm3592_vm7, %v6634_v15  ;;  %v1806_v43 = vadd.f32 %v1805_v5, %v5943_v13  ;;  %vm2107_vm7 = vcmp.eq.s32.totalorder %v6950_v31, %v2060_v44  ;;  %vm3564_vm3 = vmpackc.low %vm2109_vm0, %vm2106_vm1 }
 0x25f   : > { %v1855_v38 = vadd.f32 %v1854_v22, %v1806_v43 }
 0x260   : > { %3561 = vmatmul.msk.bf16.gmra.mxu0 %vm3560_vm15, %v6634_v15  ;;  %v1952_v8 = vpop.f32.mrf.mxu2  ;;  %v1905_v60 = vpop.f32.mrf.mxu1  ;;  %vm2110_vm15 = vcmp.eq.s32.totalorder %v6950_v31, %v2063_v19 }
 0x261   : > { %v1904_v53 = vadd.f32 %v1903_v62, %v1855_v38  ;;  %vm3580_vm13 = vmpackc.low %vm2110_vm15, %vm2107_vm7 }
 0x263   : > { %v6147_v46 = vadd.f32 %v1952_v8, %v1904_v53 }
 0x264   : > { %v1807_v20 = vpop.f32.mrf.mxu3 }
 0x265   : > { %v1856_v11 = vpop.f32.mrf.mxu0  ;;  %v1808_v34 = vadd.f32 %v1807_v20, %v5954_v18 }
 0x267   : > { %v1857_v13 = vadd.f32 %v1856_v11, %v1808_v34 }
 0x268   : > { %v1954_v4 = vpop.f32.mrf.mxu2  ;;  %v1908_v48 = vpop.f32.mrf.mxu1 }
 0x269   : > { %v1906_v16 = vadd.f32 %v1905_v60, %v1857_v13  ;;  %3403 = vmatmul.msk.bf16.gmra.mxu3 %vm6986_vm2, %v6634_v15  ;;  %vm3596_vm2 = vmpackc.low %vm2111_vm12, %vm2108_vm6 }
 0x26b   : > { %v6162_v18 = vadd.f32 %v1954_v4, %v1906_v16  ;;  %3579 = vmatmul.msk.bf16.gmra.mxu1 %vm3578_vm9, %v6634_v15 }
 0x26c   : > { %v1810_v27 = vpop.f32.mrf.mxu3 }
 0x26d   : > { %v1859_v0 = vpop.f32.mrf.mxu0  ;;  %3595 = vmatmul.msk.bf16.gmra.mxu2 %vm3594_vm5, %v6634_v15  ;;  %v1811_v45 = vadd.f32 %v1810_v27, %v5983_v52 }
 0x26f   : > { %v1860_v47 = vadd.f32 %v1859_v0, %v1811_v45 }
 0x270   : > { %3563 = vmatmul.msk.bf16.gmra.mxu0 %vm3562_vm14, %v6634_v15  ;;  %v1957_v29 = vpop.f32.mrf.mxu2  ;;  %v1910_v59 = vpop.f32.mrf.mxu1 }
 0x271   : > { %v1909_v62 = vadd.f32 %v1908_v48, %v1860_v47 }
 0x273   : > { %v6168_v26 = vadd.f32 %v1957_v29, %v1909_v62 }
 0x274   : > { %v1812_v5 = vpop.f32.mrf.mxu3 }
 0x275   : > { %v1861_v22 = vpop.f32.mrf.mxu0  ;;  %v1813_v43 = vadd.f32 %v1812_v5, %v5988_v6 }
 0x277   : > { %v1862_v52 = vadd.f32 %v1861_v22, %v1813_v43 }
 0x278   : > { %v1959_v38 = vpop.f32.mrf.mxu2  ;;  %v1913_v8 = vpop.f32.mrf.mxu1 }
 0x279   : > { %v1911_v60 = vadd.f32 %v1910_v59, %v1862_v52  ;;  %3405 = vmatmul.msk.bf16.gmra.mxu3 %vm6988_vm4, %v6634_v15 }
 0x27b   : > { %v6183_v6 = vadd.f32 %v1959_v38, %v1911_v60  ;;  %3581 = vmatmul.msk.bf16.gmra.mxu1 %vm3580_vm13, %v6634_v15 }
 0x27c   : > { %v1815_v31 = vpop.f32.mrf.mxu3 }
 0x27d   : > { %v1864_v55 = vpop.f32.mrf.mxu0  ;;  %3597 = vmatmul.msk.bf16.gmra.mxu2 %vm3596_vm2, %v6634_v15  ;;  %v1816_v39 = vadd.f32 %v1815_v31, %v6017_v58 }
 0x27f   : > { %v1865_v17 = vadd.f32 %v1864_v55, %v1816_v39 }
 0x280   : > { %3565 = vmatmul.msk.bf16.gmra.mxu0 %vm3564_vm3, %v6634_v15  ;;  %v1962_v20 = vpop.f32.mrf.mxu2  ;;  %v1915_v11 = vpop.f32.mrf.mxu1 }
 0x281   : > { %v1914_v63 = vadd.f32 %v1913_v8, %v1865_v17 }
 0x283   : > { %v6189_v34 = vadd.f32 %v1962_v20, %v1914_v63 }
 0x284   : > { %v1817_v21 = vpop.f32.mrf.mxu3 }
 0x285   : > { %v1866_v13 = vpop.f32.mrf.mxu0  ;;  %v1818_v4 = vadd.f32 %v1817_v21, %v6026_v1 }
 0x287   : > { %v1867_v48 = vadd.f32 %v1866_v13, %v1818_v4 }
 0x288   : > { %v1964_v16 = vpop.f32.mrf.mxu2  ;;  %v2482_v14 = vpop.f32.mrf.mxu1 }
 0x289   : > { %v1916_v27 = vadd.f32 %v1915_v11, %v1867_v48 }
 0x28b   : > { %v6195_v58 = vadd.f32 %v1964_v16, %v1916_v27 }
 0x28c   : > { %v1976_v0 = vpop.f32.mrf.mxu3 }
 0x28d   : > { %v2433_v15 = vpop.f32.mrf.mxu0  ;;  %v1977_v45 = vadd.f32 %v1976_v0, %v6042_v49 }
 0x28e   : > { %v2483_v47 = vadd.f32 %v2482_v14, %v2433_v15 }
 0x28f   : > { %v2571_v29 = vpack.c.bf16 %v1977_v45, %v5732_v57 }
 0x290   : > { %v2531_v59 = vpop.f32.mrf.mxu2  ;;  %v2484_v62 = vpop.f32.mrf.mxu1 }
 0x291   : > { %2603 = vst [vmem:[%s6199_s5] sm:$0xff] %v2571_v29  ;;  %v2532_v1 = vadd.f32 %v2531_v59, %v2483_v47 }
 0x293   : > { %v2572_v44 = vpack.c.bf16 %v2532_v1, %v2532_v1 }
 0x294   : > { %v1978_v19 = vpop.f32.mrf.mxu3 }
 0x295   : > { %v2435_v5 = vpop.f32.mrf.mxu0  ;;  %2604 = vst [vmem:[%s6199_s5 + $0x8] sm:$0xf] %v2572_v44  ;;  %v1979_v22 = vadd.f32 %v1978_v19, %v6057_v12 }
 0x296   : > { %v2485_v49 = vadd.f32 %v2484_v62, %v2435_v5 }
 0x297   : > { %v2573_v57 = vpack.c.bf16 %v1979_v22, %v5743_v7 }
 0x298   : > { %v2533_v43 = vpop.f32.mrf.mxu2  ;;  %v2487_v52 = vpop.f32.mrf.mxu1 }
 0x299   : > { %2605 = vst [vmem:[%s6199_s5 + $0xc] sm:$0xff] %v2573_v57  ;;  %v2534_v38 = vadd.f32 %v2533_v43, %v2485_v49 }
 0x29b   : > { %v2574_v8 = vpack.c.bf16 %v2534_v38, %v2534_v38 }
 0x29c   : > { %v1981_v60 = vpop.f32.mrf.mxu3 }
 0x29d   : > { %v2438_v53 = vpop.f32.mrf.mxu0  ;;  %2606 = vst [vmem:[%s6199_s5 + $0x14] sm:$0xf] %v2574_v8  ;;  %v1982_v31 = vadd.f32 %v1981_v60, %v6063_v33 }
 0x29e   : > { %v2488_v55 = vadd.f32 %v2487_v52, %v2438_v53 }
 0x29f   : > { %v2575_v39 = vpack.c.bf16 %v1982_v31, %v5774_v35 }
 0x2a0   : > { %v2536_v12 = vpop.f32.mrf.mxu2  ;;  %v2489_v17 = vpop.f32.mrf.mxu1 }
 0x2a1   : > { %2607 = vst [vmem:[%s6199_s5 + $0x18] sm:$0xff] %v2575_v39  ;;  %v2537_v7 = vadd.f32 %v2536_v12, %v2488_v55 }
 0x2a3   : > { %v2576_v20 = vpack.c.bf16 %v2537_v7, %v2537_v7 }
 0x2a4   : > { %v1983_v11 = vpop.f32.mrf.mxu3 }
 0x2a5   : > { %v2440_v63 = vpop.f32.mrf.mxu0  ;;  %2608 = vst [vmem:[%s6199_s5 + $0x20] sm:$0xf] %v2576_v20  ;;  %v1984_v21 = vadd.f32 %v1983_v11, %v6078_v61 }
 0x2a6   : > { %v2490_v13 = vadd.f32 %v2489_v17, %v2440_v63 }
 0x2a7   : > { %v2577_v4 = vpack.c.bf16 %v1984_v21, %v5784_v30 }
 0x2a8   : > { %v2538_v33 = vpop.f32.mrf.mxu2  ;;  %v2492_v48 = vpop.f32.mrf.mxu1 }
 0x2a9   : > { %2609 = vst [vmem:[%s6199_s5 + $0x24] sm:$0xff] %v2577_v4  ;;  %v2539_v35 = vadd.f32 %v2538_v33, %v2490_v13 }
 0x2ab   : > { %v2578_v16 = vpack.c.bf16 %v2539_v35, %v2539_v35 }
 0x2ac   : > { %v1986_v14 = vpop.f32.mrf.mxu3 }
 0x2ad   : > { %v2443_v27 = vpop.f32.mrf.mxu0  ;;  %2610 = vst [vmem:[%s6199_s5 + $0x2c] sm:$0xf] %v2578_v16  ;;  %v1987_v0 = vadd.f32 %v1986_v14, %v6084_v9 }
 0x2ae   : > { %v2493_v15 = vadd.f32 %v2492_v48, %v2443_v27 }
 0x2af   : > { %v2579_v45 = vpack.c.bf16 %v1987_v0, %v5816_v51 }
 0x2b0   : > { %v2541_v61 = vpop.f32.mrf.mxu2  ;;  %v2494_v47 = vpop.f32.mrf.mxu1 }
 0x2b1   : > { %2611 = vst [vmem:[%s6199_s5 + $0x30] sm:$0xff] %v2579_v45  ;;  %v2542_v30 = vadd.f32 %v2541_v61, %v2493_v15 }
 0x2b3   : > { %v2580_v29 = vpack.c.bf16 %v2542_v30, %v2542_v30 }
 0x2b4   : > { %v1988_v59 = vpop.f32.mrf.mxu3 }
 0x2b5   : > { %v2445_v62 = vpop.f32.mrf.mxu0  ;;  %2612 = vst [vmem:[%s6199_s5 + $0x38] sm:$0xf] %v2580_v29  ;;  %v1989_v1 = vadd.f32 %v1988_v59, %v6099_v41 }
 0x2b6   : > { %v2495_v44 = vadd.f32 %v2494_v47, %v2445_v62 }
 0x2b7   : > { %v2581_v19 = vpack.c.bf16 %v1989_v1, %v5827_v28 }
 0x2b8   : > { %v2543_v9 = vpop.f32.mrf.mxu2  ;;  %v2497_v5 = vpop.f32.mrf.mxu1 }
 0x2b9   : > { %2613 = vst [vmem:[%s6199_s5 + $0x3c] sm:$0xff] %v2581_v19  ;;  %v2544_v51 = vadd.f32 %v2543_v9, %v2495_v44 }
 0x2bb   : > { %v2582_v22 = vpack.c.bf16 %v2544_v51, %v2544_v51 }
 0x2bc   : > { %v1991_v49 = vpop.f32.mrf.mxu3 }
 0x2bd   : > { %v2448_v57 = vpop.f32.mrf.mxu0  ;;  %2614 = vst [vmem:[%s6199_s5 + $0x44] sm:$0xf] %v2582_v22  ;;  %v1992_v43 = vadd.f32 %v1991_v49, %v6105_v36 }
 0x2be   : > { %v2498_v52 = vadd.f32 %v2497_v5, %v2448_v57 }
 0x2bf   : > { %v2583_v38 = vpack.c.bf16 %v1992_v43, %v5859_v3 }
 0x2c0   : > { %v2546_v41 = vpop.f32.mrf.mxu2  ;;  %v2499_v8 = vpop.f32.mrf.mxu1 }
 0x2c1   : > { %2615 = vst [vmem:[%s6199_s5 + $0x48] sm:$0xff] %v2583_v38  ;;  %v2547_v28 = vadd.f32 %v2546_v41, %v2498_v52 }
 0x2c3   : > { %v2584_v60 = vpack.c.bf16 %v2547_v28, %v2547_v28 }
 0x2c4   : > { %v1993_v53 = vpop.f32.mrf.mxu3 }
 0x2c5   : > { %v2450_v31 = vpop.f32.mrf.mxu0  ;;  %2616 = vst [vmem:[%s6199_s5 + $0x50] sm:$0xf] %v2584_v60  ;;  %v1994_v55 = vadd.f32 %v1993_v53, %v6120_v23 }
 0x2c6   : > { %v2500_v39 = vadd.f32 %v2499_v8, %v2450_v31 }
 0x2c7   : > { %v2585_v12 = vpack.c.bf16 %v1994_v55, %v5870_v10 }
 0x2c8   : > { %v2548_v36 = vpop.f32.mrf.mxu2  ;;  %v2502_v17 = vpop.f32.mrf.mxu1 }
 0x2c9   : > { %2617 = vst [vmem:[%s6199_s5 + $0x54] sm:$0xff] %v2585_v12  ;;  %v2549_v3 = vadd.f32 %v2548_v36, %v2500_v39 }
 0x2cb   : > { %v2586_v7 = vpack.c.bf16 %v2549_v3, %v2549_v3 }
 0x2cc   : > { %v1996_v20 = vpop.f32.mrf.mxu3 }
 0x2cd   : > { %v2453_v11 = vpop.f32.mrf.mxu0  ;;  %2618 = vst [vmem:[%s6199_s5 + $0x5c] sm:$0xf] %v2586_v7  ;;  %v1997_v63 = vadd.f32 %v1996_v20, %v6126_v40 }
 0x2ce   : > { %v2503_v21 = vadd.f32 %v2502_v17, %v2453_v11 }
 0x2cf   : > { %v2587_v13 = vpack.c.bf16 %v1997_v63, %v5902_v32 }
 0x2d0   : > { %v2551_v23 = vpop.f32.mrf.mxu2  ;;  %v2504_v4 = vpop.f32.mrf.mxu1 }
 0x2d1   : > { %2619 = vst [vmem:[%s6199_s5 + $0x60] sm:$0xff] %v2587_v13  ;;  %v2552_v10 = vadd.f32 %v2551_v23, %v2503_v21 }
 0x2d3   : > { %v2588_v33 = vpack.c.bf16 %v2552_v10, %v2552_v10 }
 0x2d4   : > { %v1998_v48 = vpop.f32.mrf.mxu3 }
 0x2d5   : > { %v2455_v35 = vpop.f32.mrf.mxu0  ;;  %2620 = vst [vmem:[%s6199_s5 + $0x68] sm:$0xf] %v2588_v33  ;;  %v1999_v16 = vadd.f32 %v1998_v48, %v6141_v2 }
 0x2d6   : > { %v2505_v14 = vadd.f32 %v2504_v4, %v2455_v35 }
 0x2d7   : > { %v2589_v27 = vpack.c.bf16 %v1999_v16, %v5913_v25 }
 0x2d8   : > { %v2553_v40 = vpop.f32.mrf.mxu2  ;;  %v2507_v0 = vpop.f32.mrf.mxu1 }
 0x2d9   : > { %2621 = vst [vmem:[%s6199_s5 + $0x6c] sm:$0xff] %v2589_v27  ;;  %v2554_v32 = vadd.f32 %v2553_v40, %v2505_v14 }
 0x2db   : > { %v2590_v15 = vpack.c.bf16 %v2554_v32, %v2554_v32 }
 0x2dc   : > { %v2001_v45 = vpop.f32.mrf.mxu3 }
 0x2dd   : > { %v2458_v61 = vpop.f32.mrf.mxu0  ;;  %2622 = vst [vmem:[%s6199_s5 + $0x74] sm:$0xf] %v2590_v15  ;;  %v2002_v47 = vadd.f32 %v2001_v45, %v6147_v46 }
 0x2de   : > { %v2508_v30 = vadd.f32 %v2507_v0, %v2458_v61 }
 0x2df   : > { %v2591_v29 = vpack.c.bf16 %v2002_v47, %v5945_v42 }
 0x2e0   : > { %v2556_v2 = vpop.f32.mrf.mxu2  ;;  %v2509_v59 = vpop.f32.mrf.mxu1 }
 0x2e1   : > { %2623 = vst [vmem:[%s6199_s5 + $0x78] sm:$0xff] %v2591_v29  ;;  %v2557_v25 = vadd.f32 %v2556_v2, %v2508_v30 }
 0x2e3   : > { %v2592_v62 = vpack.c.bf16 %v2557_v25, %v2557_v25 }
 0x2e4   : > { %v2003_v1 = vpop.f32.mrf.mxu3 }
 0x2e5   : > { %v2460_v44 = vpop.f32.mrf.mxu0  ;;  %2624 = vst [vmem:[%s6199_s5 + $0x80] sm:$0xf] %v2592_v62  ;;  %v2004_v19 = vadd.f32 %v2003_v1, %v6162_v18 }
 0x2e6   : > { %v2510_v9 = vadd.f32 %v2509_v59, %v2460_v44 }
 0x2e7   : > { %v2593_v5 = vpack.c.bf16 %v2004_v19, %v5956_v56 }
 0x2e8   : > { %v2558_v46 = vpop.f32.mrf.mxu2  ;;  %v2512_v51 = vpop.f32.mrf.mxu1 }
 0x2e9   : > { %2625 = vst [vmem:[%s6199_s5 + $0x84] sm:$0xff] %v2593_v5  ;;  %v2559_v42 = vadd.f32 %v2558_v46, %v2510_v9 }
 0x2eb   : > { %v2594_v22 = vpack.c.bf16 %v2559_v42, %v2559_v42 }
 0x2ec   : > { %v2006_v49 = vpop.f32.mrf.mxu3 }
 0x2ed   : > { %v2463_v57 = vpop.f32.mrf.mxu0  ;;  %2626 = vst [vmem:[%s6199_s5 + $0x8c] sm:$0xf] %v2594_v22  ;;  %v2007_v43 = vadd.f32 %v2006_v49, %v6168_v26 }
 0x2ee   : > { %v2513_v52 = vadd.f32 %v2512_v51, %v2463_v57 }
 0x2ef   : > { %v2595_v38 = vpack.c.bf16 %v2007_v43, %v5985_v24 }
 0x2f0   : > { %v2561_v18 = vpop.f32.mrf.mxu2  ;;  %v2514_v41 = vpop.f32.mrf.mxu1 }
 0x2f1   : > { %2627 = vst [vmem:[%s6199_s5 + $0x90] sm:$0xff] %v2595_v38  ;;  %v2562_v56 = vadd.f32 %v2561_v18, %v2513_v52 }
 0x2f3   : > { %v2596_v8 = vpack.c.bf16 %v2562_v56, %v2562_v56 }
 0x2f4   : > { %v2008_v28 = vpop.f32.mrf.mxu3 }
 0x2f5   : > { %v2465_v60 = vpop.f32.mrf.mxu0  ;;  %2628 = vst [vmem:[%s6199_s5 + $0x98] sm:$0xf] %v2596_v8  ;;  %v2009_v53 = vadd.f32 %v2008_v28, %v6183_v6 }
 0x2f6   : > { %v2515_v31 = vadd.f32 %v2514_v41, %v2465_v60 }
 0x2f7   : > { %v2597_v55 = vpack.c.bf16 %v2009_v53, %v5990_v54 }
 0x2f8   : > { %v2563_v26 = vpop.f32.mrf.mxu2  ;;  %v2517_v24 = vpop.f32.mrf.mxu1 }
 0x2f9   : > { %2629 = vst [vmem:[%s6199_s5 + $0x9c] sm:$0xff] %v2597_v55  ;;  %v2564_v39 = vadd.f32 %v2563_v26, %v2515_v31 }
 0x2fb   : > { %v2598_v12 = vpack.c.bf16 %v2564_v39, %v2564_v39 }
 0x2fc   : > { %v2011_v36 = vpop.f32.mrf.mxu3 }
 0x2fd   : > { %v2468_v17 = vpop.f32.mrf.mxu0  ;;  %2630 = vst [vmem:[%s6199_s5 + $0xa4] sm:$0xf] %v2598_v12  ;;  %v2012_v3 = vadd.f32 %v2011_v36, %v6189_v34 }
 0x2fe   : > { %v2518_v7 = vadd.f32 %v2517_v24, %v2468_v17 }
 0x2ff   : > { %v2599_v20 = vpack.c.bf16 %v2012_v3, %v6019_v50 }
 0x300   : > { %v2566_v6 = vpop.f32.mrf.mxu2  ;;  %v2519_v63 = vpop.f32.mrf.mxu1 }
 0x301   : > { %2631 = vst [vmem:[%s6199_s5 + $0xa8] sm:$0xff] %v2599_v20  ;;  %v2567_v11 = vadd.f32 %v2566_v6, %v2518_v7 }
 0x303   : > { %v2600_v54 = vpack.c.bf16 %v2567_v11, %v2567_v11 }
 0x304   : > { %v2013_v21 = vpop.f32.mrf.mxu3 }
 0x305   : > { %v2470_v13 = vpop.f32.mrf.mxu0  ;;  %2632 = vst [vmem:[%s6199_s5 + $0xb0] sm:$0xf] %v2600_v54  ;;  %v2014_v23 = vadd.f32 %v2013_v21, %v6195_v58 }
 0x306   : > { %v2520_v4 = vadd.f32 %v2519_v63, %v2470_v13 }
 0x307   : > { %v2601_v50 = vpack.c.bf16 %v2014_v23, %v6028_v37 }
 0x308   : > { %v2568_v34 = vpop.f32.mrf.mxu2 }
 0x309   : > { %2633 = vst [vmem:[%s6199_s5 + $0xb4] sm:$0xff] %v2601_v50  ;;  %v2569_v10 = vadd.f32 %v2568_v34, %v2520_v4 }
 0x30b   : > { %v2602_v33 = vpack.c.bf16 %v2569_v10, %v2569_v10 }
 0x30d   : > { %2634 = vst [vmem:[%s6199_s5 + $0xbc] sm:$0xf] %v2602_v33 }
 0x30e   : > { %3901 = shalt.err (!%p3898_p8)
}
 0x30f   : > { %s3949_s28 = smov 192   ;;  %s3950_s29 = smov 12  }
 0x310   : > { %3753 = dma.vmem_to_hbm [thread:$0]  (%p4009_p5), %s2650_s10, 3072, %s2652_s16, %s2636_s11, %s3949_s28, %s3949_s28, %s3950_s29  }
 0x311 PF: > { %p3765_p9 = scmp.ge.s32.totalorder %s3940_s15, 2  ;;  %s2666_s30 = sand.u32 1, %s3928_s12  }
 0x312   : > { %s2667_s4 = scalar_lea.sflag [#allocation4], %s2666_s30 }
 0x313   : > { %p3760_p10 = pnand %p3765_p9, %p4013_p6 }
 0x315   : > { %p3761_p11 = pneg %p3760_p10 }
 0x317   : > { %3923 = dma.done.wait (%p3761_p11), %s2667_s4, 3072  }
 0x318   : > { %3925 = vsyncadd (%p3761_p11), %s2667_s4, 4294964224  ;;  %p14_p12 = scmp.ge.s32.totalorder %s3996_s18, 4   ;;  %s6989_s12 = smov %s3932_s13 }
 0x319   : > { %s6990_s13 = smov %s3936_s14  ;;  %s6991_s14 = smov %s4007_s21 }
 0x31a   : > { %s6992_s15 = smov %s3996_s18  ;;  %16 = sbr.rel (!%p14_p12) target bundleno = 4 (0x4), region = 72 }
 0x31f   :  { %2673 = vsyncpa [#allocation3], 1 }
 0x320   :  { %2675 = vsyncpa [#allocation3 + $0x1], 1 }
 0x321   :  { %2676 = vsyncpa [#allocation4], 1 }
 0x322   :  { %2678 = vsyncpa [#allocation4 + $0x1], 1 }

</bundles_post_ra>
